<compile_context>
chip_gen: v5e
topology: v5e:2x2
jax: 0.10.0
libtpu: 0.0.40
codegen_flags: <defaults>
</compile_context>

<pallas_src>
import jax
import jax.numpy as jnp
from jax.experimental import pallas as pl
from jax.experimental.pallas import tpu as pltpu

EPS = 1e-5  # nn.BatchNorm2d default

_TAPS = ((0, 0), (0, 1), (1, 0), (1, 1))  # (dy, dx) tap order, row-major


def _up_conv_kernel(xp_ref, w_ref, b_ref, o_ref):
    """Phase-decomposed 2x-up conv + folded-BN bias + ReLU for one (n, strip).

    xp_ref: (1, H+2, W+2, Cin) bf16   whole zero-padded LOW-RES image (NHWC)
    w_ref : (2, 2, 4, Cout, Cin) bf16 per-phase per-tap weights (BN folded),
                                      whole-array VMEM resident (single copy)
    b_ref : (Cout, 1) f32             folded bias, whole-array VMEM resident
    o_ref : (1, 2, 2, Cout, Hs*W) bf16 phase-separated channels-major strip
    """
    W = xp_ref.shape[2] - 2
    Cin = xp_ref.shape[3]
    HsW = o_ref.shape[4]
    Hs = HsW // W

    strip = pl.program_id(1)      # strip index along the low-res H axis
    row0 = strip * Hs             # first padded row of this strip's window
    bias = b_ref[...]             # (Cout, 1) f32, hoisted out of the loops

    # Static loop over the 4 output phases; all slice offsets are static except
    # the strip row offset.  No im2col scratch: each tap slice feeds the MXU
    # directly via an accumulating dot_general (K = Cin).
    for py in range(2):
        for px in range(2):
            acc = None
            for t, (dy, dx) in enumerate(_TAPS):
                tap = xp_ref[0, pl.ds(row0 + py + dy, Hs),
                             px + dx:px + dx + W, :]
                tap = tap.reshape(HsW, Cin)          # lane dim (Cin) preserved
                # MXU: (Cout, Cin) x (HsW, Cin)^T -> (Cout, HsW), f32 acc.
                part = jax.lax.dot_general(
                    w_ref[py, px, t], tap,
                    dimension_numbers=(((1,), (1,)), ((), ())),
                    preferred_element_type=jnp.float32)
                acc = part if acc is None else acc + part
            # f32 epilogue (bias + ReLU), lane-dense bf16 store (HsW % 128 == 0).
            o_ref[0, py, px, :, :] = jnp.maximum(acc + bias, 0.0).astype(
                o_ref.dtype)


def _pick_strip(H, W):
    """Largest proper divisor s of H with s*W a lane-dense multiple of 128."""
    for s in range(H // 2, 0, -1):
        if H % s == 0 and (s * W) % 128 == 0 and s * W <= 4096:
            return s
    return H  # single strip; block last dim == full dim, still legal


@jax.jit
def up_conv_forward(x_nchw, w_hwio, b, gamma, beta, run_mean, run_var):
    """(N, Cin, H, W) f32 -> (N, Cout, 2H, 2W) f32, matching PyTorch up_conv."""
    N, Cin, H, W = x_nchw.shape
    Cout = w_hwio.shape[-1]
    f32, bf16 = jnp.float32, jnp.bfloat16

    # ---- fold eval-mode BatchNorm into conv weight / bias (exact, in f32) ---
    s = gamma.astype(f32) * jax.lax.rsqrt(run_var.astype(f32) + EPS)  # (Cout,)
    w_f = w_hwio.astype(f32) * s                                      # (3,3,Cin,Cout)
    b_f = (b.astype(f32) - run_mean.astype(f32)) * s + beta.astype(f32)

    # ---- sub-pixel decomposition: 4 effective 2x2 kernels from the 3x3 ------
    # R[phase, eff_tap, orig_tap]: how the 3 original kernel rows/cols collapse
    # onto the 2 distinct low-res rows/cols seen by each output phase.
    R = jnp.array([[[1., 0., 0.], [0., 1., 1.]],
                   [[1., 1., 0.], [0., 0., 1.]]], f32)                # (2,2,3)
    # (py, px, a, b, Cout, Cin); tap order (a,b) row-major == _TAPS.
    w_eff = jnp.einsum('pak,qbl,klio->pqaboi', R, R, w_f)
    w_eff = w_eff.reshape(2, 2, 4, Cout, Cin).astype(bf16)

    # ---- input glue on the LOW-RES input only (pad fuses with transpose) ----
    x_pad = jnp.pad(jnp.transpose(x_nchw, (0, 2, 3, 1)),
                    ((0, 0), (1, 1), (1, 1), (0, 0))).astype(bf16)    # (N,H+2,W+2,Cin)

    Hs = _pick_strip(H, W)
    nstrips = H // Hs

    flops = 2 * N * 4 * 4 * Cout * Cin * H * W          # 4 phases x 4 taps
    bytes_accessed = (x_pad.size + w_eff.size + N * 4 * Cout * H * W) * 2

    out5 = pl.pallas_call(
        _up_conv_kernel,
        out_shape=jax.ShapeDtypeStruct((N, 2, 2, Cout, H * W), bf16),
        grid_spec=pltpu.PrefetchScalarGridSpec(
            num_scalar_prefetch=0,
            grid=(N, nstrips),
            in_specs=[
                # Whole padded low-res image per batch item; the block index is
                # constant along the inner strip axis, so it is not re-fetched.
                pl.BlockSpec((1, H + 2, W + 2, Cin),
                             lambda n, st: (n, 0, 0, 0)),
                # Grid-invariant weights / bias: whole-array, single VMEM copy
                # (no double-buffering of the largest constant tensor).
                pl.BlockSpec(memory_space=pltpu.MemorySpace.VMEM),
                pl.BlockSpec(memory_space=pltpu.MemorySpace.VMEM),
            ],
            out_specs=pl.BlockSpec((1, 2, 2, Cout, Hs * W),
                                   lambda n, st: (n, 0, 0, 0, st)),
        ),
        compiler_params=pltpu.CompilerParams(
            dimension_semantics=("parallel", "parallel"),
            vmem_limit_bytes=48 * 1024 * 1024),
        cost_estimate=pl.CostEstimate(flops=flops, transcendentals=0,
                                      bytes_accessed=bytes_accessed),
    )(x_pad, w_eff, b_f.reshape(Cout, 1))

    # Phase interleave back to NCHW: (n,py,px,c,y,x) -> (n,c,2y+py,2x+px).
    # Reshapes are free (row-major); the transpose + bf16->f32 cast is one
    # fused XLA pass reading bf16 and writing the final f32 output.
    out = out5.reshape(N, 2, 2, Cout, H, W).transpose(0, 3, 4, 1, 5, 2)
    return out.reshape(N, Cout, 2 * H, 2 * W).astype(f32)


def _reference(x_nchw, w_hwio, b, gamma, beta, run_mean, run_var):
    """Pure-JAX f32 reference of the same forward (upsample->conv->BN->ReLU)."""
    x_up = jnp.repeat(jnp.repeat(x_nchw, 2, axis=2), 2, axis=3)
    x_nhwc = jnp.transpose(x_up, (0, 2, 3, 1)).astype(jnp.float32)
    y = jax.lax.conv_general_dilated(
        x_nhwc, w_hwio.astype(jnp.float32),
        window_strides=(1, 1), padding="SAME",
        dimension_numbers=("NHWC", "HWIO", "NHWC"))
    y = y + b[None, None, None, :]
    y = (y - run_mean) * jax.lax.rsqrt(run_var + EPS) * gamma + beta
    y = jnp.maximum(y, 0.0)
    return jnp.transpose(y, (0, 3, 1, 2))


if __name__ == "__main__":
    key = jax.random.PRNGKey(0)
    k_x, k_w, k_b, k_g, k_be, k_m, k_v = jax.random.split(key, 7)

    N, Cin, H, W = 2, 4, 16, 16
    Cout = 8

    x = jax.random.normal(k_x, (N, Cin, H, W), dtype=jnp.float32)

    # deterministic parameter init (shapes from nn.Conv2d(in_ch,out_ch,3) + BN)
    fan_in = Cin * 3 * 3
    w = jax.random.normal(k_w, (3, 3, Cin, Cout), jnp.float32) / jnp.sqrt(fan_in)
    b = 0.1 * jax.random.normal(k_b, (Cout,), jnp.float32)
    gamma = 1.0 + 0.1 * jax.random.normal(k_g, (Cout,), jnp.float32)
    beta = 0.1 * jax.random.normal(k_be, (Cout,), jnp.float32)
    run_mean = 0.1 * jax.random.normal(k_m, (Cout,), jnp.float32)
    run_var = jnp.abs(1.0 + 0.1 * jax.random.normal(k_v, (Cout,), jnp.float32))

    out = up_conv_forward(x, w, b, gamma, beta, run_mean, run_var)
    out = jax.block_until_ready(out)

    ref = _reference(x, w, b, gamma, beta, run_mean, run_var)
    assert out.shape == (N, Cout, 2 * H, 2 * W), out.shape
    # bf16 MXU operands + bf16 intermediate output (f32 accumulate/epilogue):
    # tolerance loosened vs the pure-f32 reference accordingly.
    max_err = float(jnp.max(jnp.abs(out - ref)))
    assert jnp.allclose(out, ref, atol=5e-2, rtol=5e-2), max_err

    print("KERNEL_OK")
</pallas_src>

<mosaic_0001>
module attributes {stable_mosaic.version = 11 : i64} {
  func.func @_up_conv_kernel(%arg0: i32, %arg1: i32, %arg2: memref<1x18x18x4xbf16, #tpu.memory_space<vmem>>, %arg3: memref<2x2x4x8x4xbf16, #tpu.memory_space<vmem>>, %arg4: memref<8x1xf32, #tpu.memory_space<vmem>>, %arg5: memref<1x2x2x8x128xbf16, #tpu.memory_space<vmem>>) attributes {dimension_semantics = [#tpu.dimension_semantics<parallel>, #tpu.dimension_semantics<parallel>], iteration_bounds = array<i64: 2, 2>, scalar_prefetch = 0 : i64, scratch_operands = 0 : i64, tpu.core_type = #tpu.core_type<tc>, window_params = [{transform_indices = @transform_0, window_bounds = array<i64: 1, 18, 18, 4>}, {pipeline_mode = #tpu.pipeline_mode<synchronous>, transform_indices = @transform_1, window_bounds = array<i64: 2, 2, 4, 8, 4>}, {pipeline_mode = #tpu.pipeline_mode<synchronous>, transform_indices = @transform_2, window_bounds = array<i64: 8, 1>}, {transform_indices = @transform_3, window_bounds = array<i64: 1, 2, 2, 8, 128>}]} {
    %c8_i32 = arith.constant 8 : i32
    %0 = arith.muli %arg1, %c8_i32 : i32
    %c0 = arith.constant 0 : index
    %c0_0 = arith.constant 0 : index
    %1 = vector.load %arg4[%c0, %c0_0] : memref<8x1xf32, #tpu.memory_space<vmem>>, vector<8x1xf32>
    %c0_i32 = arith.constant 0 : i32
    %2 = arith.addi %0, %c0_i32 : i32
    %c0_i32_1 = arith.constant 0 : i32
    %3 = arith.addi %2, %c0_i32_1 : i32
    %c0_2 = arith.constant 0 : index
    %4 = arith.index_cast %3 : i32 to index
    %c0_3 = arith.constant 0 : index
    %c0_4 = arith.constant 0 : index
    %5 = vector.load %arg2[%c0_2, %4, %c0_3, %c0_4] : memref<1x18x18x4xbf16, #tpu.memory_space<vmem>>, vector<1x8x16x4xbf16>
    %6 = vector.shape_cast %5 : vector<1x8x16x4xbf16> to vector<8x16x4xbf16>
    %7 = vector.shape_cast %6 : vector<8x16x4xbf16> to vector<128x4xbf16>
    %c0_5 = arith.constant 0 : index
    %c0_6 = arith.constant 0 : index
    %c0_7 = arith.constant 0 : index
    %c0_8 = arith.constant 0 : index
    %c0_9 = arith.constant 0 : index
    %8 = vector.load %arg3[%c0_5, %c0_6, %c0_7, %c0_8, %c0_9] : memref<2x2x4x8x4xbf16, #tpu.memory_space<vmem>>, vector<1x1x1x8x4xbf16>
    %9 = vector.shape_cast %8 : vector<1x1x1x8x4xbf16> to vector<8x4xbf16>
    %cst = arith.constant dense<0.000000e+00> : vector<8x128xf32>
    %10 = tpu.matmul %9, %7, %cst {dimension_numbers = #tpu.dot_dimension_numbers<[1], [1], [0], [0], [0, 0, 1, 0], [], []>} : vector<8x4xbf16>, vector<128x4xbf16>, vector<8x128xf32> -> vector<8x128xf32>
    %c0_i32_10 = arith.constant 0 : i32
    %11 = arith.addi %0, %c0_i32_10 : i32
    %c0_i32_11 = arith.constant 0 : i32
    %12 = arith.addi %11, %c0_i32_11 : i32
    %c0_12 = arith.constant 0 : index
    %13 = arith.index_cast %12 : i32 to index
    %c1 = arith.constant 1 : index
    %c0_13 = arith.constant 0 : index
    %14 = vector.load %arg2[%c0_12, %13, %c1, %c0_13] : memref<1x18x18x4xbf16, #tpu.memory_space<vmem>>, vector<1x8x16x4xbf16>
    %15 = vector.shape_cast %14 : vector<1x8x16x4xbf16> to vector<8x16x4xbf16>
    %16 = vector.shape_cast %15 : vector<8x16x4xbf16> to vector<128x4xbf16>
    %c0_14 = arith.constant 0 : index
    %c0_15 = arith.constant 0 : index
    %c1_16 = arith.constant 1 : index
    %c0_17 = arith.constant 0 : index
    %c0_18 = arith.constant 0 : index
    %17 = vector.load %arg3[%c0_14, %c0_15, %c1_16, %c0_17, %c0_18] : memref<2x2x4x8x4xbf16, #tpu.memory_space<vmem>>, vector<1x1x1x8x4xbf16>
    %18 = vector.shape_cast %17 : vector<1x1x1x8x4xbf16> to vector<8x4xbf16>
    %cst_19 = arith.constant dense<0.000000e+00> : vector<8x128xf32>
    %19 = tpu.matmul %18, %16, %cst_19 {dimension_numbers = #tpu.dot_dimension_numbers<[1], [1], [0], [0], [0, 0, 1, 0], [], []>} : vector<8x4xbf16>, vector<128x4xbf16>, vector<8x128xf32> -> vector<8x128xf32>
    %20 = arith.addf %10, %19 : vector<8x128xf32>
    %c0_i32_20 = arith.constant 0 : i32
    %21 = arith.addi %0, %c0_i32_20 : i32
    %c1_i32 = arith.constant 1 : i32
    %22 = arith.addi %21, %c1_i32 : i32
    %c0_21 = arith.constant 0 : index
    %23 = arith.index_cast %22 : i32 to index
    %c0_22 = arith.constant 0 : index
    %c0_23 = arith.constant 0 : index
    %24 = vector.load %arg2[%c0_21, %23, %c0_22, %c0_23] : memref<1x18x18x4xbf16, #tpu.memory_space<vmem>>, vector<1x8x16x4xbf16>
    %25 = vector.shape_cast %24 : vector<1x8x16x4xbf16> to vector<8x16x4xbf16>
    %26 = vector.shape_cast %25 : vector<8x16x4xbf16> to vector<128x4xbf16>
    %c0_24 = arith.constant 0 : index
    %c0_25 = arith.constant 0 : index
    %c2 = arith.constant 2 : index
    %c0_26 = arith.constant 0 : index
    %c0_27 = arith.constant 0 : index
    %27 = vector.load %arg3[%c0_24, %c0_25, %c2, %c0_26, %c0_27] : memref<2x2x4x8x4xbf16, #tpu.memory_space<vmem>>, vector<1x1x1x8x4xbf16>
    %28 = vector.shape_cast %27 : vector<1x1x1x8x4xbf16> to vector<8x4xbf16>
    %cst_28 = arith.constant dense<0.000000e+00> : vector<8x128xf32>
    %29 = tpu.matmul %28, %26, %cst_28 {dimension_numbers = #tpu.dot_dimension_numbers<[1], [1], [0], [0], [0, 0, 1, 0], [], []>} : vector<8x4xbf16>, vector<128x4xbf16>, vector<8x128xf32> -> vector<8x128xf32>
    %30 = arith.addf %20, %29 : vector<8x128xf32>
    %c0_i32_29 = arith.constant 0 : i32
    %31 = arith.addi %0, %c0_i32_29 : i32
    %c1_i32_30 = arith.constant 1 : i32
    %32 = arith.addi %31, %c1_i32_30 : i32
    %c0_31 = arith.constant 0 : index
    %33 = arith.index_cast %32 : i32 to index
    %c1_32 = arith.constant 1 : index
    %c0_33 = arith.constant 0 : index
    %34 = vector.load %arg2[%c0_31, %33, %c1_32, %c0_33] : memref<1x18x18x4xbf16, #tpu.memory_space<vmem>>, vector<1x8x16x4xbf16>
    %35 = vector.shape_cast %34 : vector<1x8x16x4xbf16> to vector<8x16x4xbf16>
    %36 = vector.shape_cast %35 : vector<8x16x4xbf16> to vector<128x4xbf16>
    %c0_34 = arith.constant 0 : index
    %c0_35 = arith.constant 0 : index
    %c3 = arith.constant 3 : index
    %c0_36 = arith.constant 0 : index
    %c0_37 = arith.constant 0 : index
    %37 = vector.load %arg3[%c0_34, %c0_35, %c3, %c0_36, %c0_37] : memref<2x2x4x8x4xbf16, #tpu.memory_space<vmem>>, vector<1x1x1x8x4xbf16>
    %38 = vector.shape_cast %37 : vector<1x1x1x8x4xbf16> to vector<8x4xbf16>
    %cst_38 = arith.constant dense<0.000000e+00> : vector<8x128xf32>
    %39 = tpu.matmul %38, %36, %cst_38 {dimension_numbers = #tpu.dot_dimension_numbers<[1], [1], [0], [0], [0, 0, 1, 0], [], []>} : vector<8x4xbf16>, vector<128x4xbf16>, vector<8x128xf32> -> vector<8x128xf32>
    %40 = arith.addf %30, %39 : vector<8x128xf32>
    %41 = vector.broadcast %1 : vector<8x1xf32> to vector<8x128xf32>
    %42 = arith.addf %40, %41 : vector<8x128xf32>
    %cst_39 = arith.constant 0.000000e+00 : f32
    %43 = vector.broadcast %cst_39 : f32 to vector<8x128xf32>
    %44 = arith.maximumf %42, %43 : vector<8x128xf32>
    %45 = arith.truncf %44 : vector<8x128xf32> to vector<8x128xbf16>
    %c0_40 = arith.constant 0 : index
    %c0_41 = arith.constant 0 : index
    %c0_42 = arith.constant 0 : index
    %c0_43 = arith.constant 0 : index
    %c0_44 = arith.constant 0 : index
    %46 = vector.load %arg5[%c0_40, %c0_41, %c0_42, %c0_43, %c0_44] : memref<1x2x2x8x128xbf16, #tpu.memory_space<vmem>>, vector<1x1x1x8x128xbf16>
    %47 = vector.shape_cast %46 : vector<1x1x1x8x128xbf16> to vector<8x128xbf16>
    %48 = vector.shape_cast %45 : vector<8x128xbf16> to vector<1x1x1x8x128xbf16>
    tpu.vector_store %arg5[%c0_40, %c0_41, %c0_42, %c0_43, %c0_44], %48 {strides = array<i32>} : memref<1x2x2x8x128xbf16, #tpu.memory_space<vmem>>, vector<1x1x1x8x128xbf16>,
    %c0_i32_45 = arith.constant 0 : i32
    %49 = arith.addi %0, %c0_i32_45 : i32
    %c0_i32_46 = arith.constant 0 : i32
    %50 = arith.addi %49, %c0_i32_46 : i32
    %c0_47 = arith.constant 0 : index
    %51 = arith.index_cast %50 : i32 to index
    %c1_48 = arith.constant 1 : index
    %c0_49 = arith.constant 0 : index
    %52 = vector.load %arg2[%c0_47, %51, %c1_48, %c0_49] : memref<1x18x18x4xbf16, #tpu.memory_space<vmem>>, vector<1x8x16x4xbf16>
    %53 = vector.shape_cast %52 : vector<1x8x16x4xbf16> to vector<8x16x4xbf16>
    %54 = vector.shape_cast %53 : vector<8x16x4xbf16> to vector<128x4xbf16>
    %c0_50 = arith.constant 0 : index
    %c1_51 = arith.constant 1 : index
    %c0_52 = arith.constant 0 : index
    %c0_53 = arith.constant 0 : index
    %c0_54 = arith.constant 0 : index
    %55 = vector.load %arg3[%c0_50, %c1_51, %c0_52, %c0_53, %c0_54] : memref<2x2x4x8x4xbf16, #tpu.memory_space<vmem>>, vector<1x1x1x8x4xbf16>
    %56 = vector.shape_cast %55 : vector<1x1x1x8x4xbf16> to vector<8x4xbf16>
    %cst_55 = arith.constant dense<0.000000e+00> : vector<8x128xf32>
    %57 = tpu.matmul %56, %54, %cst_55 {dimension_numbers = #tpu.dot_dimension_numbers<[1], [1], [0], [0], [0, 0, 1, 0], [], []>} : vector<8x4xbf16>, vector<128x4xbf16>, vector<8x128xf32> -> vector<8x128xf32>
    %c0_i32_56 = arith.constant 0 : i32
    %58 = arith.addi %0, %c0_i32_56 : i32
    %c0_i32_57 = arith.constant 0 : i32
    %59 = arith.addi %58, %c0_i32_57 : i32
    %c0_58 = arith.constant 0 : index
    %60 = arith.index_cast %59 : i32 to index
    %c2_59 = arith.constant 2 : index
    %c0_60 = arith.constant 0 : index
    %61 = vector.load %arg2[%c0_58, %60, %c2_59, %c0_60] : memref<1x18x18x4xbf16, #tpu.memory_space<vmem>>, vector<1x8x16x4xbf16>
    %62 = vector.shape_cast %61 : vector<1x8x16x4xbf16> to vector<8x16x4xbf16>
    %63 = vector.shape_cast %62 : vector<8x16x4xbf16> to vector<128x4xbf16>
    %c0_61 = arith.constant 0 : index
    %c1_62 = arith.constant 1 : index
    %c1_63 = arith.constant 1 : index
    %c0_64 = arith.constant 0 : index
    %c0_65 = arith.constant 0 : index
    %64 = vector.load %arg3[%c0_61, %c1_62, %c1_63, %c0_64, %c0_65] : memref<2x2x4x8x4xbf16, #tpu.memory_space<vmem>>, vector<1x1x1x8x4xbf16>
    %65 = vector.shape_cast %64 : vector<1x1x1x8x4xbf16> to vector<8x4xbf16>
    %cst_66 = arith.constant dense<0.000000e+00> : vector<8x128xf32>
    %66 = tpu.matmul %65, %63, %cst_66 {dimension_numbers = #tpu.dot_dimension_numbers<[1], [1], [0], [0], [0, 0, 1, 0], [], []>} : vector<8x4xbf16>, vector<128x4xbf16>, vector<8x128xf32> -> vector<8x128xf32>
    %67 = arith.addf %57, %66 : vector<8x128xf32>
    %c0_i32_67 = arith.constant 0 : i32
    %68 = arith.addi %0, %c0_i32_67 : i32
    %c1_i32_68 = arith.constant 1 : i32
    %69 = arith.addi %68, %c1_i32_68 : i32
    %c0_69 = arith.constant 0 : index
    %70 = arith.index_cast %69 : i32 to index
    %c1_70 = arith.constant 1 : index
    %c0_71 = arith.constant 0 : index
    %71 = vector.load %arg2[%c0_69, %70, %c1_70, %c0_71] : memref<1x18x18x4xbf16, #tpu.memory_space<vmem>>, vector<1x8x16x4xbf16>
    %72 = vector.shape_cast %71 : vector<1x8x16x4xbf16> to vector<8x16x4xbf16>
    %73 = vector.shape_cast %72 : vector<8x16x4xbf16> to vector<128x4xbf16>
    %c0_72 = arith.constant 0 : index
    %c1_73 = arith.constant 1 : index
    %c2_74 = arith.constant 2 : index
    %c0_75 = arith.constant 0 : index
    %c0_76 = arith.constant 0 : index
    %74 = vector.load %arg3[%c0_72, %c1_73, %c2_74, %c0_75, %c0_76] : memref<2x2x4x8x4xbf16, #tpu.memory_space<vmem>>, vector<1x1x1x8x4xbf16>
    %75 = vector.shape_cast %74 : vector<1x1x1x8x4xbf16> to vector<8x4xbf16>
    %cst_77 = arith.constant dense<0.000000e+00> : vector<8x128xf32>
    %76 = tpu.matmul %75, %73, %cst_77 {dimension_numbers = #tpu.dot_dimension_numbers<[1], [1], [0], [0], [0, 0, 1, 0], [], []>} : vector<8x4xbf16>, vector<128x4xbf16>, vector<8x128xf32> -> vector<8x128xf32>
    %77 = arith.addf %67, %76 : vector<8x128xf32>
    %c0_i32_78 = arith.constant 0 : i32
    %78 = arith.addi %0, %c0_i32_78 : i32
    %c1_i32_79 = arith.constant 1 : i32
    %79 = arith.addi %78, %c1_i32_79 : i32
    %c0_80 = arith.constant 0 : index
    %80 = arith.index_cast %79 : i32 to index
    %c2_81 = arith.constant 2 : index
    %c0_82 = arith.constant 0 : index
    %81 = vector.load %arg2[%c0_80, %80, %c2_81, %c0_82] : memref<1x18x18x4xbf16, #tpu.memory_space<vmem>>, vector<1x8x16x4xbf16>
    %82 = vector.shape_cast %81 : vector<1x8x16x4xbf16> to vector<8x16x4xbf16>
    %83 = vector.shape_cast %82 : vector<8x16x4xbf16> to vector<128x4xbf16>
    %c0_83 = arith.constant 0 : index
    %c1_84 = arith.constant 1 : index
    %c3_85 = arith.constant 3 : index
    %c0_86 = arith.constant 0 : index
    %c0_87 = arith.constant 0 : index
    %84 = vector.load %arg3[%c0_83, %c1_84, %c3_85, %c0_86, %c0_87] : memref<2x2x4x8x4xbf16, #tpu.memory_space<vmem>>, vector<1x1x1x8x4xbf16>
    %85 = vector.shape_cast %84 : vector<1x1x1x8x4xbf16> to vector<8x4xbf16>
    %cst_88 = arith.constant dense<0.000000e+00> : vector<8x128xf32>
    %86 = tpu.matmul %85, %83, %cst_88 {dimension_numbers = #tpu.dot_dimension_numbers<[1], [1], [0], [0], [0, 0, 1, 0], [], []>} : vector<8x4xbf16>, vector<128x4xbf16>, vector<8x128xf32> -> vector<8x128xf32>
    %87 = arith.addf %77, %86 : vector<8x128xf32>
    %88 = vector.broadcast %1 : vector<8x1xf32> to vector<8x128xf32>
    %89 = arith.addf %87, %88 : vector<8x128xf32>
    %cst_89 = arith.constant 0.000000e+00 : f32
    %90 = vector.broadcast %cst_89 : f32 to vector<8x128xf32>
    %91 = arith.maximumf %89, %90 : vector<8x128xf32>
    %92 = arith.truncf %91 : vector<8x128xf32> to vector<8x128xbf16>
    %c0_90 = arith.constant 0 : index
    %c0_91 = arith.constant 0 : index
    %c1_92 = arith.constant 1 : index
    %c0_93 = arith.constant 0 : index
    %c0_94 = arith.constant 0 : index
    %93 = vector.load %arg5[%c0_90, %c0_91, %c1_92, %c0_93, %c0_94] : memref<1x2x2x8x128xbf16, #tpu.memory_space<vmem>>, vector<1x1x1x8x128xbf16>
    %94 = vector.shape_cast %93 : vector<1x1x1x8x128xbf16> to vector<8x128xbf16>
    %95 = vector.shape_cast %92 : vector<8x128xbf16> to vector<1x1x1x8x128xbf16>
    tpu.vector_store %arg5[%c0_90, %c0_91, %c1_92, %c0_93, %c0_94], %95 {strides = array<i32>} : memref<1x2x2x8x128xbf16, #tpu.memory_space<vmem>>, vector<1x1x1x8x128xbf16>,
    %c1_i32_95 = arith.constant 1 : i32
    %96 = arith.addi %0, %c1_i32_95 : i32
    %c0_i32_96 = arith.constant 0 : i32
    %97 = arith.addi %96, %c0_i32_96 : i32
    %c0_97 = arith.constant 0 : index
    %98 = arith.index_cast %97 : i32 to index
    %c0_98 = arith.constant 0 : index
    %c0_99 = arith.constant 0 : index
    %99 = vector.load %arg2[%c0_97, %98, %c0_98, %c0_99] : memref<1x18x18x4xbf16, #tpu.memory_space<vmem>>, vector<1x8x16x4xbf16>
    %100 = vector.shape_cast %99 : vector<1x8x16x4xbf16> to vector<8x16x4xbf16>
    %101 = vector.shape_cast %100 : vector<8x16x4xbf16> to vector<128x4xbf16>
    %c1_100 = arith.constant 1 : index
    %c0_101 = arith.constant 0 : index
    %c0_102 = arith.constant 0 : index
    %c0_103 = arith.constant 0 : index
    %c0_104 = arith.constant 0 : index
    %102 = vector.load %arg3[%c1_100, %c0_101, %c0_102, %c0_103, %c0_104] : memref<2x2x4x8x4xbf16, #tpu.memory_space<vmem>>, vector<1x1x1x8x4xbf16>
    %103 = vector.shape_cast %102 : vector<1x1x1x8x4xbf16> to vector<8x4xbf16>
    %cst_105 = arith.constant dense<0.000000e+00> : vector<8x128xf32>
    %104 = tpu.matmul %103, %101, %cst_105 {dimension_numbers = #tpu.dot_dimension_numbers<[1], [1], [0], [0], [0, 0, 1, 0], [], []>} : vector<8x4xbf16>, vector<128x4xbf16>, vector<8x128xf32> -> vector<8x128xf32>
    %c1_i32_106 = arith.constant 1 : i32
    %105 = arith.addi %0, %c1_i32_106 : i32
    %c0_i32_107 = arith.constant 0 : i32
    %106 = arith.addi %105, %c0_i32_107 : i32
    %c0_108 = arith.constant 0 : index
    %107 = arith.index_cast %106 : i32 to index
    %c1_109 = arith.constant 1 : index
    %c0_110 = arith.constant 0 : index
    %108 = vector.load %arg2[%c0_108, %107, %c1_109, %c0_110] : memref<1x18x18x4xbf16, #tpu.memory_space<vmem>>, vector<1x8x16x4xbf16>
    %109 = vector.shape_cast %108 : vector<1x8x16x4xbf16> to vector<8x16x4xbf16>
    %110 = vector.shape_cast %109 : vector<8x16x4xbf16> to vector<128x4xbf16>
    %c1_111 = arith.constant 1 : index
    %c0_112 = arith.constant 0 : index
    %c1_113 = arith.constant 1 : index
    %c0_114 = arith.constant 0 : index
    %c0_115 = arith.constant 0 : index
    %111 = vector.load %arg3[%c1_111, %c0_112, %c1_113, %c0_114, %c0_115] : memref<2x2x4x8x4xbf16, #tpu.memory_space<vmem>>, vector<1x1x1x8x4xbf16>
    %112 = vector.shape_cast %111 : vector<1x1x1x8x4xbf16> to vector<8x4xbf16>
    %cst_116 = arith.constant dense<0.000000e+00> : vector<8x128xf32>
    %113 = tpu.matmul %112, %110, %cst_116 {dimension_numbers = #tpu.dot_dimension_numbers<[1], [1], [0], [0], [0, 0, 1, 0], [], []>} : vector<8x4xbf16>, vector<128x4xbf16>, vector<8x128xf32> -> vector<8x128xf32>
    %114 = arith.addf %104, %113 : vector<8x128xf32>
    %c1_i32_117 = arith.constant 1 : i32
    %115 = arith.addi %0, %c1_i32_117 : i32
    %c1_i32_118 = arith.constant 1 : i32
    %116 = arith.addi %115, %c1_i32_118 : i32
    %c0_119 = arith.constant 0 : index
    %117 = arith.index_cast %116 : i32 to index
    %c0_120 = arith.constant 0 : index
    %c0_121 = arith.constant 0 : index
    %118 = vector.load %arg2[%c0_119, %117, %c0_120, %c0_121] : memref<1x18x18x4xbf16, #tpu.memory_space<vmem>>, vector<1x8x16x4xbf16>
    %119 = vector.shape_cast %118 : vector<1x8x16x4xbf16> to vector<8x16x4xbf16>
    %120 = vector.shape_cast %119 : vector<8x16x4xbf16> to vector<128x4xbf16>
    %c1_122 = arith.constant 1 : index
    %c0_123 = arith.constant 0 : index
    %c2_124 = arith.constant 2 : index
    %c0_125 = arith.constant 0 : index
    %c0_126 = arith.constant 0 : index
    %121 = vector.load %arg3[%c1_122, %c0_123, %c2_124, %c0_125, %c0_126] : memref<2x2x4x8x4xbf16, #tpu.memory_space<vmem>>, vector<1x1x1x8x4xbf16>
    %122 = vector.shape_cast %121 : vector<1x1x1x8x4xbf16> to vector<8x4xbf16>
    %cst_127 = arith.constant dense<0.000000e+00> : vector<8x128xf32>
    %123 = tpu.matmul %122, %120, %cst_127 {dimension_numbers = #tpu.dot_dimension_numbers<[1], [1], [0], [0], [0, 0, 1, 0], [], []>} : vector<8x4xbf16>, vector<128x4xbf16>, vector<8x128xf32> -> vector<8x128xf32>
    %124 = arith.addf %114, %123 : vector<8x128xf32>
    %c1_i32_128 = arith.constant 1 : i32
    %125 = arith.addi %0, %c1_i32_128 : i32
    %c1_i32_129 = arith.constant 1 : i32
    %126 = arith.addi %125, %c1_i32_129 : i32
    %c0_130 = arith.constant 0 : index
    %127 = arith.index_cast %126 : i32 to index
    %c1_131 = arith.constant 1 : index
    %c0_132 = arith.constant 0 : index
    %128 = vector.load %arg2[%c0_130, %127, %c1_131, %c0_132] : memref<1x18x18x4xbf16, #tpu.memory_space<vmem>>, vector<1x8x16x4xbf16>
    %129 = vector.shape_cast %128 : vector<1x8x16x4xbf16> to vector<8x16x4xbf16>
    %130 = vector.shape_cast %129 : vector<8x16x4xbf16> to vector<128x4xbf16>
    %c1_133 = arith.constant 1 : index
    %c0_134 = arith.constant 0 : index
    %c3_135 = arith.constant 3 : index
    %c0_136 = arith.constant 0 : index
    %c0_137 = arith.constant 0 : index
    %131 = vector.load %arg3[%c1_133, %c0_134, %c3_135, %c0_136, %c0_137] : memref<2x2x4x8x4xbf16, #tpu.memory_space<vmem>>, vector<1x1x1x8x4xbf16>
    %132 = vector.shape_cast %131 : vector<1x1x1x8x4xbf16> to vector<8x4xbf16>
    %cst_138 = arith.constant dense<0.000000e+00> : vector<8x128xf32>
    %133 = tpu.matmul %132, %130, %cst_138 {dimension_numbers = #tpu.dot_dimension_numbers<[1], [1], [0], [0], [0, 0, 1, 0], [], []>} : vector<8x4xbf16>, vector<128x4xbf16>, vector<8x128xf32> -> vector<8x128xf32>
    %134 = arith.addf %124, %133 : vector<8x128xf32>
    %135 = vector.broadcast %1 : vector<8x1xf32> to vector<8x128xf32>
    %136 = arith.addf %134, %135 : vector<8x128xf32>
    %cst_139 = arith.constant 0.000000e+00 : f32
    %137 = vector.broadcast %cst_139 : f32 to vector<8x128xf32>
    %138 = arith.maximumf %136, %137 : vector<8x128xf32>
    %139 = arith.truncf %138 : vector<8x128xf32> to vector<8x128xbf16>
    %c0_140 = arith.constant 0 : index
    %c1_141 = arith.constant 1 : index
    %c0_142 = arith.constant 0 : index
    %c0_143 = arith.constant 0 : index
    %c0_144 = arith.constant 0 : index
    %140 = vector.load %arg5[%c0_140, %c1_141, %c0_142, %c0_143, %c0_144] : memref<1x2x2x8x128xbf16, #tpu.memory_space<vmem>>, vector<1x1x1x8x128xbf16>
    %141 = vector.shape_cast %140 : vector<1x1x1x8x128xbf16> to vector<8x128xbf16>
    %142 = vector.shape_cast %139 : vector<8x128xbf16> to vector<1x1x1x8x128xbf16>
    tpu.vector_store %arg5[%c0_140, %c1_141, %c0_142, %c0_143, %c0_144], %142 {strides = array<i32>} : memref<1x2x2x8x128xbf16, #tpu.memory_space<vmem>>, vector<1x1x1x8x128xbf16>,
    %c1_i32_145 = arith.constant 1 : i32
    %143 = arith.addi %0, %c1_i32_145 : i32
    %c0_i32_146 = arith.constant 0 : i32
    %144 = arith.addi %143, %c0_i32_146 : i32
    %c0_147 = arith.constant 0 : index
    %145 = arith.index_cast %144 : i32 to index
    %c1_148 = arith.constant 1 : index
    %c0_149 = arith.constant 0 : index
    %146 = vector.load %arg2[%c0_147, %145, %c1_148, %c0_149] : memref<1x18x18x4xbf16, #tpu.memory_space<vmem>>, vector<1x8x16x4xbf16>
    %147 = vector.shape_cast %146 : vector<1x8x16x4xbf16> to vector<8x16x4xbf16>
    %148 = vector.shape_cast %147 : vector<8x16x4xbf16> to vector<128x4xbf16>
    %c1_150 = arith.constant 1 : index
    %c1_151 = arith.constant 1 : index
    %c0_152 = arith.constant 0 : index
    %c0_153 = arith.constant 0 : index
    %c0_154 = arith.constant 0 : index
    %149 = vector.load %arg3[%c1_150, %c1_151, %c0_152, %c0_153, %c0_154] : memref<2x2x4x8x4xbf16, #tpu.memory_space<vmem>>, vector<1x1x1x8x4xbf16>
    %150 = vector.shape_cast %149 : vector<1x1x1x8x4xbf16> to vector<8x4xbf16>
    %cst_155 = arith.constant dense<0.000000e+00> : vector<8x128xf32>
    %151 = tpu.matmul %150, %148, %cst_155 {dimension_numbers = #tpu.dot_dimension_numbers<[1], [1], [0], [0], [0, 0, 1, 0], [], []>} : vector<8x4xbf16>, vector<128x4xbf16>, vector<8x128xf32> -> vector<8x128xf32>
    %c1_i32_156 = arith.constant 1 : i32
    %152 = arith.addi %0, %c1_i32_156 : i32
    %c0_i32_157 = arith.constant 0 : i32
    %153 = arith.addi %152, %c0_i32_157 : i32
    %c0_158 = arith.constant 0 : index
    %154 = arith.index_cast %153 : i32 to index
    %c2_159 = arith.constant 2 : index
    %c0_160 = arith.constant 0 : index
    %155 = vector.load %arg2[%c0_158, %154, %c2_159, %c0_160] : memref<1x18x18x4xbf16, #tpu.memory_space<vmem>>, vector<1x8x16x4xbf16>
    %156 = vector.shape_cast %155 : vector<1x8x16x4xbf16> to vector<8x16x4xbf16>
    %157 = vector.shape_cast %156 : vector<8x16x4xbf16> to vector<128x4xbf16>
    %c1_161 = arith.constant 1 : index
    %c1_162 = arith.constant 1 : index
    %c1_163 = arith.constant 1 : index
    %c0_164 = arith.constant 0 : index
    %c0_165 = arith.constant 0 : index
    %158 = vector.load %arg3[%c1_161, %c1_162, %c1_163, %c0_164, %c0_165] : memref<2x2x4x8x4xbf16, #tpu.memory_space<vmem>>, vector<1x1x1x8x4xbf16>
    %159 = vector.shape_cast %158 : vector<1x1x1x8x4xbf16> to vector<8x4xbf16>
    %cst_166 = arith.constant dense<0.000000e+00> : vector<8x128xf32>
    %160 = tpu.matmul %159, %157, %cst_166 {dimension_numbers = #tpu.dot_dimension_numbers<[1], [1], [0], [0], [0, 0, 1, 0], [], []>} : vector<8x4xbf16>, vector<128x4xbf16>, vector<8x128xf32> -> vector<8x128xf32>
    %161 = arith.addf %151, %160 : vector<8x128xf32>
    %c1_i32_167 = arith.constant 1 : i32
    %162 = arith.addi %0, %c1_i32_167 : i32
    %c1_i32_168 = arith.constant 1 : i32
    %163 = arith.addi %162, %c1_i32_168 : i32
    %c0_169 = arith.constant 0 : index
    %164 = arith.index_cast %163 : i32 to index
    %c1_170 = arith.constant 1 : index
    %c0_171 = arith.constant 0 : index
    %165 = vector.load %arg2[%c0_169, %164, %c1_170, %c0_171] : memref<1x18x18x4xbf16, #tpu.memory_space<vmem>>, vector<1x8x16x4xbf16>
    %166 = vector.shape_cast %165 : vector<1x8x16x4xbf16> to vector<8x16x4xbf16>
    %167 = vector.shape_cast %166 : vector<8x16x4xbf16> to vector<128x4xbf16>
    %c1_172 = arith.constant 1 : index
    %c1_173 = arith.constant 1 : index
    %c2_174 = arith.constant 2 : index
    %c0_175 = arith.constant 0 : index
    %c0_176 = arith.constant 0 : index
    %168 = vector.load %arg3[%c1_172, %c1_173, %c2_174, %c0_175, %c0_176] : memref<2x2x4x8x4xbf16, #tpu.memory_space<vmem>>, vector<1x1x1x8x4xbf16>
    %169 = vector.shape_cast %168 : vector<1x1x1x8x4xbf16> to vector<8x4xbf16>
    %cst_177 = arith.constant dense<0.000000e+00> : vector<8x128xf32>
    %170 = tpu.matmul %169, %167, %cst_177 {dimension_numbers = #tpu.dot_dimension_numbers<[1], [1], [0], [0], [0, 0, 1, 0], [], []>} : vector<8x4xbf16>, vector<128x4xbf16>, vector<8x128xf32> -> vector<8x128xf32>
    %171 = arith.addf %161, %170 : vector<8x128xf32>
    %c1_i32_178 = arith.constant 1 : i32
    %172 = arith.addi %0, %c1_i32_178 : i32
    %c1_i32_179 = arith.constant 1 : i32
    %173 = arith.addi %172, %c1_i32_179 : i32
    %c0_180 = arith.constant 0 : index
    %174 = arith.index_cast %173 : i32 to index
    %c2_181 = arith.constant 2 : index
    %c0_182 = arith.constant 0 : index
    %175 = vector.load %arg2[%c0_180, %174, %c2_181, %c0_182] : memref<1x18x18x4xbf16, #tpu.memory_space<vmem>>, vector<1x8x16x4xbf16>
    %176 = vector.shape_cast %175 : vector<1x8x16x4xbf16> to vector<8x16x4xbf16>
    %177 = vector.shape_cast %176 : vector<8x16x4xbf16> to vector<128x4xbf16>
    %c1_183 = arith.constant 1 : index
    %c1_184 = arith.constant 1 : index
    %c3_185 = arith.constant 3 : index
    %c0_186 = arith.constant 0 : index
    %c0_187 = arith.constant 0 : index
    %178 = vector.load %arg3[%c1_183, %c1_184, %c3_185, %c0_186, %c0_187] : memref<2x2x4x8x4xbf16, #tpu.memory_space<vmem>>, vector<1x1x1x8x4xbf16>
    %179 = vector.shape_cast %178 : vector<1x1x1x8x4xbf16> to vector<8x4xbf16>
    %cst_188 = arith.constant dense<0.000000e+00> : vector<8x128xf32>
    %180 = tpu.matmul %179, %177, %cst_188 {dimension_numbers = #tpu.dot_dimension_numbers<[1], [1], [0], [0], [0, 0, 1, 0], [], []>} : vector<8x4xbf16>, vector<128x4xbf16>, vector<8x128xf32> -> vector<8x128xf32>
    %181 = arith.addf %171, %180 : vector<8x128xf32>
    %182 = vector.broadcast %1 : vector<8x1xf32> to vector<8x128xf32>
    %183 = arith.addf %181, %182 : vector<8x128xf32>
    %cst_189 = arith.constant 0.000000e+00 : f32
    %184 = vector.broadcast %cst_189 : f32 to vector<8x128xf32>
    %185 = arith.maximumf %183, %184 : vector<8x128xf32>
    %186 = arith.truncf %185 : vector<8x128xf32> to vector<8x128xbf16>
    %c0_190 = arith.constant 0 : index
    %c1_191 = arith.constant 1 : index
    %c1_192 = arith.constant 1 : index
    %c0_193 = arith.constant 0 : index
    %c0_194 = arith.constant 0 : index
    %187 = vector.load %arg5[%c0_190, %c1_191, %c1_192, %c0_193, %c0_194] : memref<1x2x2x8x128xbf16, #tpu.memory_space<vmem>>, vector<1x1x1x8x128xbf16>
    %188 = vector.shape_cast %187 : vector<1x1x1x8x128xbf16> to vector<8x128xbf16>
    %189 = vector.shape_cast %186 : vector<8x128xbf16> to vector<1x1x1x8x128xbf16>
    tpu.vector_store %arg5[%c0_190, %c1_191, %c1_192, %c0_193, %c0_194], %189 {strides = array<i32>} : memref<1x2x2x8x128xbf16, #tpu.memory_space<vmem>>, vector<1x1x1x8x128xbf16>,
    return
  }
  func.func @transform_0(%arg0: i32, %arg1: i32) -> (i32, i32, i32, i32) {
    %c0_i32 = arith.constant 0 : i32
    %c0_i32_0 = arith.constant 0 : i32
    %c0_i32_1 = arith.constant 0 : i32
    %c0_i32_2 = arith.constant 0 : i32
    return %arg0, %c0_i32, %c0_i32_0, %c0_i32_1 : i32, i32, i32, i32
  }
  func.func @transform_1(%arg0: i32, %arg1: i32) -> (i32, i32, i32, i32, i32) {
    %c0_i32 = arith.constant 0 : i32
    %c0_i32_0 = arith.constant 0 : i32
    %c0_i32_1 = arith.constant 0 : i32
    %c0_i32_2 = arith.constant 0 : i32
    %c0_i32_3 = arith.constant 0 : i32
    %c0_i32_4 = arith.constant 0 : i32
    return %c0_i32, %c0_i32_0, %c0_i32_1, %c0_i32_2, %c0_i32_3 : i32, i32, i32, i32, i32
  }
  func.func @transform_2(%arg0: i32, %arg1: i32) -> (i32, i32) {
    %c0_i32 = arith.constant 0 : i32
    %c0_i32_0 = arith.constant 0 : i32
    %c0_i32_1 = arith.constant 0 : i32
    return %c0_i32, %c0_i32_0 : i32, i32
  }
  func.func @transform_3(%arg0: i32, %arg1: i32) -> (i32, i32, i32, i32, i32) {
    %c0_i32 = arith.constant 0 : i32
    %c0_i32_0 = arith.constant 0 : i32
    %c0_i32_1 = arith.constant 0 : i32
    %c0_i32_2 = arith.constant 0 : i32
    return %arg0, %c0_i32, %c0_i32_0, %c0_i32_1, %arg1 : i32, i32, i32, i32, i32
  }
}

</mosaic_0001>

<bundles_post_ra>
// kernel: up_conv_forward.1
= control target key start
LH: loop header
LB: loop body
LE: loop exit
PB: predicated region body
PF: predicated region fallthrough
CT: control target
= control target key end

     0   :  { %s4182_s12 = smov 0   ;;  %s4184_s13 = smov 0   ;;  %s5408_s0 = inlined_call_operand.vmem [shape: bf16[2,18,18,4], index: 0, kind: input, shape index: {}]   ;;  %s5409_s1 = inlined_call_operand.vmem [shape: bf16[2,2,4,8,4], index: 1, kind: input, shape index: {}]   ;;  %s5410_s2 = inlined_call_operand.vmem [shape: f32[8,1], index: 2, kind: input, shape index: {}]   ;;  %s5411_s3 = inlined_call_operand.vmem [shape: bf16[2,2,2,8,256], index: 3, kind: output, shape index: {}]  }
   0x1   :  { %s4186_s14 = smov 0   ;;  %s4188_s15 = smov 0  }
   0x2   :  { %s4190_s16 = smov 0   ;;  %s4192_s17 = smov 0  }
   0x3   :  { %s4194_s18 = smov 0  }
   0x4 LB: > { %s22_s19 = sadd.s32 1, %s4151_s16  ;;  %s25_s20 = sadd.s32 1, %s4155_s17  ;;  %s4159_s18 = sphi %s4194_s18, %s13_s18   ;;  %s4155_s17 = sphi %s4192_s17, %s5422_s17   ;;  %s4151_s16 = sphi %s4190_s16, %s5421_s16   ;;  %s4147_s15 = sphi %s4188_s15, %s5420_s15   ;;  %s4143_s14 = sphi %s4186_s14, %s5419_s14   ;;  %s4139_s13 = sphi %s4184_s13, %s5418_s13   ;;  %s4135_s12 = sphi %s4182_s12, %s5417_s12  }
   0x5   : > { %p23_p0 = scmp.ge.s32.totalorder %s22_s19, 2  ;;  %s3600_s21 = sadd.s32 4294967295, %s4159_s18  }
   0x6   : > { %p112_p1 = scmp.ne.s32.totalorder %s4139_s13, %s4135_s12  ;;  %p113_p2 = scmp.eq.s32.totalorder %s3600_s21, 3 }
   0x7   : > { %s5424_s19 = smov (%p23_p0, %s22_s19), 0  ;;  %s5426_s20 = smov (!%p23_p0, %s25_s20), %s4155_s17 }
   0x8   : > { %s98_s22 = ssub.s32 %s4151_s16, %s5424_s19  ;;  %p27_p3 = scmp.ge.s32.totalorder %s5426_s20, 2 }
   0x9   : > { %p3604_p4 = scmp.ge.s32.totalorder %s4159_s18, 1  ;;  %p4228_p5 = por %p113_p2, %p112_p1 }
   0xa   : > { %p151_p6 = scmp.lt.s32.totalorder %s4159_s18, 5  ;;  %s5428_s20 = smov (%p27_p3, %s5426_s20), 0 }
   0xb   : > { %s97_s24 = ssub.s32 %s4155_s17, %s5428_s20  ;;  %s102_s26 = sadd.s32 1, %s4139_s13 }
   0xc   : > { %p152_p7 = pnand %p3604_p4, %p151_p6  ;;  %s99_s25 = sor.u32 %s98_s22, %s97_s24 }
   0xd   : > { %p100_p8 = scmp.eq.s32.totalorder %s99_s25, 0  ;;  %p174_p9 = scmp.lt.s32.totalorder (!%p152_p7), %s4147_s15, 1 }
   0xe   : > { %155 = sbr.rel (%p152_p7) target bundleno = 595 (0x253), region = 32  ;;  %s171_s4 = sand.u32 (!%p152_p7), 1, %s4135_s12  }
   0xf   : > { %s4239_s27 = scalar_select %p100_p8, %s4139_s13, %s102_s26  }
  0x10   : > { %s4013_s29 = smul.u32 (!%p152_p7), 96, %s4143_s14  ;;  %s3605_s5 = sshll.u32 (!%p152_p7), %s171_s4, 4 }
  0x11   : > { %s5367_s21 = scalar_lea.vmem (!%p152_p7), [#allocation2], %s3605_s5 }
  0x13   : > { %s175_s28 = scalar_select %p174_p9, %s4147_s15, 1  ;;  %vm430_vm0 = vcmask 31744   ;;  %vm209_vm1 = vsmask.f32 3328  ;;  %vm210_vm2 = vsmask.f32 7440 }
  0x14   : > { %vm4268_vm3 = vmor %vm209_vm1, %vm210_vm2  ;;  %vm1196_vm4 = vcmask 1042432   ;;  %vm1197_vm5 = vcmask 1046532   ;;  %s4009_s22 = sshll.u32 (%p4228_p5), %s4147_s15, 3 }
  0x15   : > { %s4046_s30 = smul.u32 216, %s175_s28  ;;  %vm4456_vm6 = vmor %vm1196_vm4, %vm1197_vm5  ;;  %s3470_s24 = sadd.s32 (%p4228_p5), %s4143_s14, %s4009_s22 }
  0x16   : > { %s4010_s25 = sshll.u32 (%p4228_p5), %s3470_s24, 2 }
  0x17   : > { %s178_s6 = scalar_lea.vmem %s5408_s0, %s4046_s30 }
  0x18   : > { %s4247_s7 = scalar_lea.vmem %s178_s6, %s4013_s29  ;;  %s3472_s29 = scalar_lea.vmem (%p4228_p5), %s5411_s3, %s4010_s25 }
  0x19   : > { %v4029_v0 = vld [vmem:[%s4247_s7 + $0x60] sm:$0xff]  ;;  %v4021_v1 = vld [vmem:[%s4247_s7 + $0x54] sm:$0xff]  ;;  %v208_v5 = vld [vmem:[%s4247_s7 + $0x5c] sm:$0x1] }
  0x1a   : > { %v4028_v2 = vld [vmem:[%s4247_s7 + $0x54] sm:$0xff]  ;;  %v638_v6 = vsel %vm430_vm0, %v4029_v0, 0  ;;  %v536_v7 = vsel %vm430_vm0, %v4021_v1, 0  ;;  %v3718_v10 = vld [vmem:[%s4247_s7 + $0x60] sm:$0xf]  ;;  %v400_v14 = vshll.u32 %v208_v5, 16 }
  0x1b   : > { %v198_v3 = vld [vmem:[%s4247_s7 + $0x54] sm:$0xf]  ;;  %v199_v4 = vld [vmem:[%s4247_s7 + $0x58] sm:$0xf]  ;;  %v635_v8 = vsel %vm430_vm0, %v4028_v2, 0  ;;  %640 = vmatpush.bf16.xpose.msra.mxu2 %v638_v6  ;;  %538 = vmatpush.bf16.xpose.msra.mxu1 %v536_v7  ;;  %v847_v18 = vshrl.u32 %v3718_v10, 16 }
  0x1c   : > { %v381_v9 = vshrl.u32 %v198_v3, 16  ;;  %v384_v11 = vshll.u32 %v198_v3, 16  ;;  %v390_v12 = vshll.u32 %v199_v4, 16  ;;  %v394_v13 = vshrl.u32 %v199_v4, 16  ;;  %v3719_v15 = vld [vmem:[%s4247_s7 + $0x64] sm:$0xf] }
  0x1d   : > { %v3720_v17 = vld [vmem:[%s4247_s7 + $0x68] sm:$0x1]  ;;  %v850_v19 = vshll.u32 %v3718_v10, 16  ;;  %v856_v20 = vshll.u32 %v3719_v15, 16  ;;  %v402_v24 = vrot.slane %v400_v14, 5  ;;  %v849_v27 = vrot.slane %v847_v18, 4 }
  0x1e   : > { %v383_v16 = vrot.slane %v381_v9, 4  ;;  %v386_v21 = vrot.slane %v384_v11, 5  ;;  %v392_v22 = vrot.slane %v390_v12, 5  ;;  %v396_v23 = vrot.slane %v394_v13, 4  ;;  %v4020_v25 = vld [vmem:[%s4247_s7 + $0x48] sm:$0xff]  ;;  %v4019_v10 = vld [vmem:[%s4247_s7 + $0x3c] sm:$0xff] }
  0x1f   : > { %v4027_v26 = vld [vmem:[%s4247_s7 + $0x48] sm:$0xff]  ;;  %v852_v28 = vrot.slane %v850_v19, 5  ;;  %v858_v29 = vrot.slane %v856_v20, 5  ;;  %v860_v30 = vshrl.u32 %v3719_v15, 16  ;;  %v866_v34 = vshll.u32 %v3720_v17, 16  ;;  %v4026_v15 = vld [vmem:[%s4247_s7 + $0x3c] sm:$0xff] }
  0x20   : > { %v196_v31 = vld [vmem:[%s4247_s7 + $0x48] sm:$0xf]  ;;  %v387_v32 = vor.u32 %v386_v21, %v383_v16  ;;  %v397_v33 = vor.u32 %v396_v23, %v392_v22  ;;  %v533_v35 = vsel %vm430_vm0, %v4020_v25, 0  ;;  %v197_v36 = vld [vmem:[%s4247_s7 + $0x4c] sm:$0xf]  ;;  %v632_v40 = vsel %vm430_vm0, %v4027_v26, 0 }
  0x21   : > { %v853_v38 = vor.u32 %v852_v28, %v849_v27  ;;  %v862_v39 = vrot.slane %v860_v30, 4  ;;  %v357_v41 = vshrl.u32 %v196_v31, 16  ;;  %v868_v44 = vrot.slane %v866_v34, 5  ;;  %v207_v52 = vld [vmem:[%s4247_s7 + $0x50] sm:$0x1] }
  0x22   : > { %v388_v42 = vrot.slane %v387_v32, 4  ;;  %v398_v43 = vrot.slane %v397_v33, 4  ;;  %v360_v45 = vshll.u32 %v196_v31, 16  ;;  %v366_v49 = vshll.u32 %v197_v36, 16  ;;  %v3715_v55 = vld [vmem:[%s4247_s7 + $0x54] sm:$0xf] }
  0x23   : > { %v854_v46 = vrot.slane %v853_v38, 4  ;;  %v863_v47 = vor.u32 %v862_v39, %v858_v29  ;;  %v359_v48 = vrot.slane %v357_v41, 4  ;;  %641 = vmatpush.bf16.xpose.msra.mxu2 %v635_v8  ;;  %539 = vmatpush.bf16.xpose.msra.mxu1 %v533_v35  ;;  %v370_v54 = vshrl.u32 %v197_v36, 16  ;;  %v3716_v0 = vld [vmem:[%s4247_s7 + $0x58] sm:$0xf] }
  0x24   : > { %v393_v50 = vsel %vm4268_vm3, %v388_v42, %v392_v22  ;;  %v403_v51 = vsel %vm4268_vm3, %v398_v43, %v402_v24  ;;  %v362_v53 = vrot.slane %v360_v45, 5  ;;  %v368_v62 = vrot.slane %v366_v49, 5  ;;  %v3717_v8 = vld [vmem:[%s4247_s7 + $0x5c] sm:$0x1]  ;;  %v195_v25 = vld [vmem:[%s4247_s7 + $0x40] sm:$0xf] }
  0x25   : > { %v420_v56 = vunpack.c.l.b16 %v393_v50  ;;  %v421_v57 = vunpack.c.l.b16 %v403_v51  ;;  %v859_v58 = vsel %vm4268_vm3, %v854_v46, %v858_v29  ;;  %v864_v59 = vrot.slane %v863_v47, 4  ;;  %v194_v20 = vld [vmem:[%s4247_s7 + $0x3c] sm:$0xf]  ;;  %v206_v30 = vld [vmem:[%s4247_s7 + $0x44] sm:$0x1] }
  0x26   : > { %v886_v60 = vunpack.c.l.b16 %v859_v58  ;;  %v363_v61 = vor.u32 %v362_v53, %v359_v48  ;;  %v372_v63 = vrot.slane %v370_v54, 4  ;;  %v376_v3 = vshll.u32 %v207_v52, 16  ;;  %v3713_v49 = vld [vmem:[%s4247_s7 + $0x4c] sm:$0xf] }
  0x27   : > { %v429_v1 = vpack.c.b16 %v421_v57, %v420_v56  ;;  %v869_v2 = vsel %vm4268_vm3, %v864_v59, %v868_v44  ;;  %v823_v4 = vshrl.u32 %v3715_v55, 16  ;;  %v826_v9 = vshll.u32 %v3715_v55, 16  ;;  %v3712_v44 = vld [vmem:[%s4247_s7 + $0x48] sm:$0xf]  ;;  %v3714_v56 = vld [vmem:[%s4247_s7 + $0x50] sm:$0x1] }
  0x28   : > { %v887_v5 = vunpack.c.l.b16 %v869_v2  ;;  %v364_v6 = vrot.slane %v363_v61, 4  ;;  %v373_v7 = vor.u32 %v372_v63, %v368_v62  ;;  %v378_v12 = vrot.slane %v376_v3, 5  ;;  %v4018_v59 = vld [vmem:[%s4247_s7 + $0x30] sm:$0xff] }
  0x29   : > { %v456_v11 = vsel %vm430_vm0, %v429_v1, 0  ;;  %v825_v13 = vrot.slane %v823_v4, 4  ;;  %v832_v14 = vshll.u32 %v3716_v0, 16  ;;  %v828_v19 = vrot.slane %v826_v9, 5  ;;  %v4025_v4 = vld [vmem:[%s4247_s7 + $0x30] sm:$0xff] }
  0x2a   : > { %458 = vmatpush.bf16.xpose.msra.mxu0 %v456_v11  ;;  %v895_v16 = vpack.c.b16 %v887_v5, %v886_v60  ;;  %v369_v17 = vsel %vm4268_vm3, %v364_v6, %v368_v62  ;;  %v374_v18 = vrot.slane %v373_v7, 4  ;;  %v836_v23 = vshrl.u32 %v3716_v0, 16 }
  0x2b   : > { %v418_v21 = vunpack.c.l.b16 %v369_v17  ;;  %v834_v22 = vrot.slane %v832_v14, 5  ;;  %v842_v24 = vshll.u32 %v3717_v8, 16  ;;  %642 = vmatpush.bf16.xpose.msra.mxu2 %v632_v40  ;;  %v829_v28 = vor.u32 %v828_v19, %v825_v13  ;;  %v192_v13 = vld [vmem:[%s4247_s7 + $0x30] sm:$0xf]  ;;  %v193_v14 = vld [vmem:[%s4247_s7 + $0x34] sm:$0xf] }
  0x2c   : > { %v921_v26 = vsel %vm430_vm0, %v895_v16, 0  ;;  %v379_v27 = vsel %vm4268_vm3, %v374_v18, %v378_v12  ;;  %v530_v29 = vsel %vm430_vm0, %v4019_v10, 0  ;;  %v838_v32 = vrot.slane %v836_v23, 4  ;;  %v205_v19 = vld [vmem:[%s4247_s7 + $0x38] sm:$0x1] }
  0x2d   : > { %923 = vmatpush.bf16.xpose.msra.mxu3 %v921_v26  ;;  %v419_v31 = vunpack.c.l.b16 %v379_v27  ;;  %v844_v33 = vrot.slane %v842_v24, 5  ;;  %540 = vmatpush.bf16.xpose.msra.mxu1 %v530_v29  ;;  %v629_v34 = vsel %vm430_vm0, %v4026_v15, 0  ;;  %v830_v35 = vrot.slane %v829_v28, 4 }
  0x2e   : > { %v333_v36 = vshrl.u32 %v194_v20, 16  ;;  %v336_v38 = vshll.u32 %v194_v20, 16  ;;  %v342_v39 = vshll.u32 %v195_v25, 16  ;;  %v839_v41 = vor.u32 %v838_v32, %v834_v22  ;;  %v3709_v32 = vld [vmem:[%s4247_s7 + $0x3c] sm:$0xf] }
  0x2f   : > { %v428_v40 = vpack.c.b16 %v419_v31, %v418_v21  ;;  %v346_v42 = vshrl.u32 %v195_v25, 16  ;;  %v352_v43 = vshll.u32 %v206_v30, 16  ;;  %v835_v45 = vsel %vm4268_vm3, %v830_v35, %v834_v22 }
  0x30   : > { %v335_v46 = vrot.slane %v333_v36, 4  ;;  %v338_v47 = vrot.slane %v336_v38, 5  ;;  %v344_v48 = vrot.slane %v342_v39, 5  ;;  %v840_v51 = vrot.slane %v839_v41, 4  ;;  %v3710_v38 = vld [vmem:[%s4247_s7 + $0x40] sm:$0xf] }
  0x31   : > { %v453_v50 = vsel %vm430_vm0, %v428_v40, 0  ;;  %v884_v52 = vunpack.c.l.b16 %v835_v45  ;;  %v348_v53 = vrot.slane %v346_v42, 4  ;;  %v354_v55 = vrot.slane %v352_v43, 5  ;;  %v3711_v43 = vld [vmem:[%s4247_s7 + $0x44] sm:$0x1] }
  0x32   : > { %459 = vmatpush.bf16.xpose.msra.mxu0 %v453_v50  ;;  %v339_v54 = vor.u32 %v338_v47, %v335_v46  ;;  %v799_v57 = vshrl.u32 %v3712_v44, 16  ;;  %v802_v58 = vshll.u32 %v3712_v44, 16  ;;  %v845_v60 = vsel %vm4268_vm3, %v840_v51, %v844_v33 }
  0x33   : > { %v349_v61 = vor.u32 %v348_v53, %v344_v48  ;;  %v808_v62 = vshll.u32 %v3713_v49, 16  ;;  %v812_v63 = vshrl.u32 %v3713_v49, 16  ;;  %v885_v0 = vunpack.c.l.b16 %v845_v60  ;;  %643 = vmatpush.bf16.xpose.msra.mxu2 %v629_v34  ;;  %v4024_v53 = vld [vmem:[%s4247_s7 + $0x24] sm:$0xff] }
  0x34   : > { %v340_v1 = vrot.slane %v339_v54, 4  ;;  %v801_v2 = vrot.slane %v799_v57, 4  ;;  %v804_v3 = vrot.slane %v802_v58, 5  ;;  %v818_v8 = vshll.u32 %v3714_v56, 16 }
  0x35   : > { %v350_v5 = vrot.slane %v349_v61, 4  ;;  %v810_v6 = vrot.slane %v808_v62, 5  ;;  %v814_v7 = vrot.slane %v812_v63, 4  ;;  %v894_v9 = vpack.c.b16 %v885_v0, %v884_v52  ;;  %v190_v62 = vld [vmem:[%s4247_s7 + $0x24] sm:$0xf] }
  0x36   : > { %v345_v10 = vsel %vm4268_vm3, %v340_v1, %v344_v48  ;;  %v805_v11 = vor.u32 %v804_v3, %v801_v2  ;;  %v527_v12 = vsel %vm430_vm0, %v4018_v59, 0  ;;  %v820_v18 = vrot.slane %v818_v8, 5  ;;  %v4017_v48 = vld [vmem:[%s4247_s7 + $0x24] sm:$0xff] }
  0x37   : > { %v355_v15 = vsel %vm4268_vm3, %v350_v5, %v354_v55  ;;  %v416_v16 = vunpack.c.l.b16 %v345_v10  ;;  %v815_v17 = vor.u32 %v814_v7, %v810_v6  ;;  %541 = vmatpush.bf16.xpose.msra.mxu1 %v527_v12  ;;  %v918_v20 = vsel %vm430_vm0, %v894_v9, 0  ;;  %v191_v3 = vld [vmem:[%s4247_s7 + $0x28] sm:$0xf] }
  0x38   : > { %v417_v21 = vunpack.c.l.b16 %v355_v15  ;;  %v806_v22 = vrot.slane %v805_v11, 4  ;;  %v626_v23 = vsel %vm430_vm0, %v4025_v4, 0  ;;  %924 = vmatpush.bf16.xpose.msra.mxu3 %v918_v20  ;;  %v309_v25 = vshrl.u32 %v192_v13, 16  ;;  %v204_v4 = vld [vmem:[%s4247_s7 + $0x2c] sm:$0x1] }
  0x39   : > { %v816_v24 = vrot.slane %v815_v17, 4  ;;  %v312_v26 = vshll.u32 %v192_v13, 16  ;;  %v318_v27 = vshll.u32 %v193_v14, 16  ;;  %v322_v30 = vshrl.u32 %v193_v14, 16 }
  0x3a   : > { %v427_v28 = vpack.c.b16 %v417_v21, %v416_v16  ;;  %v811_v29 = vsel %vm4268_vm3, %v806_v22, %v810_v6  ;;  %v328_v31 = vshll.u32 %v205_v19, 16  ;;  %v311_v35 = vrot.slane %v309_v25, 4  ;;  %v3706_v21 = vld [vmem:[%s4247_s7 + $0x30] sm:$0xf]  ;;  %v3707_v22 = vld [vmem:[%s4247_s7 + $0x34] sm:$0xf] }
  0x3b   : > { %v821_v33 = vsel %vm4268_vm3, %v816_v24, %v820_v18  ;;  %v882_v34 = vunpack.c.l.b16 %v811_v29  ;;  %v314_v36 = vrot.slane %v312_v26, 5  ;;  %644 = vmatpush.bf16.xpose.msra.mxu2 %v626_v23  ;;  %v320_v41 = vrot.slane %v318_v27, 5  ;;  %v3708_v27 = vld [vmem:[%s4247_s7 + $0x38] sm:$0x1] }
  0x3c   : > { %v450_v39 = vsel %vm430_vm0, %v427_v28, 0  ;;  %v883_v40 = vunpack.c.l.b16 %v821_v33  ;;  %v324_v42 = vrot.slane %v322_v30, 4  ;;  %v330_v45 = vrot.slane %v328_v31, 5 }
  0x3d   : > { %460 = vmatpush.bf16.xpose.msra.mxu0 %v450_v39  ;;  %v315_v44 = vor.u32 %v314_v36, %v311_v35  ;;  %v775_v46 = vshrl.u32 %v3709_v32, 16  ;;  %v778_v47 = vshll.u32 %v3709_v32, 16  ;;  %v784_v51 = vshll.u32 %v3710_v38, 16  ;;  %v4016_v36 = vld [vmem:[%s4247_s7 + $0x18] sm:$0xff] }
  0x3e   : > { %v893_v49 = vpack.c.b16 %v883_v40, %v882_v34  ;;  %v325_v50 = vor.u32 %v324_v42, %v320_v41  ;;  %v788_v52 = vshrl.u32 %v3710_v38, 16  ;;  %v794_v57 = vshll.u32 %v3711_v43, 16  ;;  %v4023_v42 = vld [vmem:[%s4247_s7 + $0x18] sm:$0xff] }
  0x3f   : > { %v316_v54 = vrot.slane %v315_v44, 4  ;;  %v777_v55 = vrot.slane %v775_v46, 4  ;;  %v780_v56 = vrot.slane %v778_v47, 5  ;;  %v786_v60 = vrot.slane %v784_v51, 5  ;;  %v188_v47 = vld [vmem:[%s4247_s7 + $0x18] sm:$0xf] }
  0x40   : > { %v915_v58 = vsel %vm430_vm0, %v893_v49, 0  ;;  %v326_v59 = vrot.slane %v325_v50, 4  ;;  %v790_v61 = vrot.slane %v788_v52, 4  ;;  %v796_v1 = vrot.slane %v794_v57, 5  ;;  %v189_v52 = vld [vmem:[%s4247_s7 + $0x1c] sm:$0xf] }
  0x41   : > { %925 = vmatpush.bf16.xpose.msra.mxu3 %v915_v58  ;;  %v321_v63 = vsel %vm4268_vm3, %v316_v54, %v320_v41  ;;  %v781_v0 = vor.u32 %v780_v56, %v777_v55  ;;  %v524_v2 = vsel %vm430_vm0, %v4017_v48, 0  ;;  %v623_v8 = vsel %vm430_vm0, %v4024_v53, 0  ;;  %v203_v57 = vld [vmem:[%s4247_s7 + $0x20] sm:$0x1] }
  0x42   : > { %v331_v5 = vsel %vm4268_vm3, %v326_v59, %v330_v45  ;;  %v414_v6 = vunpack.c.l.b16 %v321_v63  ;;  %v791_v7 = vor.u32 %v790_v61, %v786_v60  ;;  %542 = vmatpush.bf16.xpose.msra.mxu1 %v524_v2  ;;  %v285_v11 = vshrl.u32 %v190_v62, 16  ;;  %v3703_v2 = vld [vmem:[%s4247_s7 + $0x24] sm:$0xf] }
  0x43   : > { %v415_v9 = vunpack.c.l.b16 %v331_v5  ;;  %v782_v10 = vrot.slane %v781_v0, 4  ;;  %v288_v12 = vshll.u32 %v190_v62, 16  ;;  %645 = vmatpush.bf16.xpose.msra.mxu2 %v623_v8  ;;  %v294_v14 = vshll.u32 %v191_v3, 16 }
  0x44   : > { %v792_v13 = vrot.slane %v791_v7, 4  ;;  %v298_v15 = vshrl.u32 %v191_v3, 16  ;;  %v304_v16 = vshll.u32 %v204_v4, 16  ;;  %v287_v19 = vrot.slane %v285_v11, 4  ;;  %v3704_v7 = vld [vmem:[%s4247_s7 + $0x28] sm:$0xf] }
  0x45   : > { %v426_v17 = vpack.c.b16 %v415_v9, %v414_v6  ;;  %v787_v18 = vsel %vm4268_vm3, %v782_v10, %v786_v60  ;;  %v290_v20 = vrot.slane %v288_v12, 5  ;;  %v296_v25 = vrot.slane %v294_v14, 5  ;;  %v3705_v12 = vld [vmem:[%s4247_s7 + $0x2c] sm:$0x1] }
  0x46   : > { %v797_v23 = vsel %vm4268_vm3, %v792_v13, %v796_v1  ;;  %v880_v24 = vunpack.c.l.b16 %v787_v18  ;;  %v300_v26 = vrot.slane %v298_v15, 4  ;;  %v306_v31 = vrot.slane %v304_v16, 5 }
  0x47   : > { %v447_v28 = vsel %vm430_vm0, %v426_v17, 0  ;;  %v881_v29 = vunpack.c.l.b16 %v797_v23  ;;  %v291_v30 = vor.u32 %v290_v20, %v287_v19  ;;  %v751_v33 = vshrl.u32 %v3706_v21, 16 }
  0x48   : > { %461 = vmatpush.bf16.xpose.msra.mxu0 %v447_v28  ;;  %v301_v32 = vor.u32 %v300_v26, %v296_v25  ;;  %v754_v34 = vshll.u32 %v3706_v21, 16  ;;  %v760_v35 = vshll.u32 %v3707_v22, 16  ;;  %v764_v40 = vshrl.u32 %v3707_v22, 16  ;;  %v4015_v21 = vld [vmem:[%s4247_s7 + $0xc] sm:$0xff] }
  0x49   : > { %v892_v38 = vpack.c.b16 %v881_v29, %v880_v24  ;;  %v292_v39 = vrot.slane %v291_v30, 4  ;;  %v770_v41 = vshll.u32 %v3708_v27, 16  ;;  %v753_v44 = vrot.slane %v751_v33, 4  ;;  %v4022_v30 = vld [vmem:[%s4247_s7 + $0xc] sm:$0xff] }
  0x4a   : > { %v302_v43 = vrot.slane %v301_v32, 4  ;;  %v756_v45 = vrot.slane %v754_v34, 5  ;;  %v762_v46 = vrot.slane %v760_v35, 5  ;;  %v766_v50 = vrot.slane %v764_v40, 4 }
  0x4b   : > { %v912_v48 = vsel %vm430_vm0, %v892_v38, 0  ;;  %v297_v49 = vsel %vm4268_vm3, %v292_v39, %v296_v25  ;;  %v772_v51 = vrot.slane %v770_v41, 5  ;;  %v521_v56 = vsel %vm430_vm0, %v4016_v36, 0  ;;  %v4370_v36 = vld [vmem:[%s4247_s7 + $0x64] sm:$0xf] }
  0x4c   : > { %926 = vmatpush.bf16.xpose.msra.mxu3 %v912_v48  ;;  %v307_v53 = vsel %vm4268_vm3, %v302_v43, %v306_v31  ;;  %v412_v54 = vunpack.c.l.b16 %v297_v49  ;;  %v757_v55 = vor.u32 %v756_v45, %v753_v44  ;;  %v767_v59 = vor.u32 %v766_v50, %v762_v46  ;;  %543 = vmatpush.bf16.xpose.msra.mxu1 %v521_v56  ;;  %v3756_v31 = vld [vmem:[%s4247_s7 + $0x60] sm:$0xf] }
  0x4d   : > { %v413_v58 = vunpack.c.l.b16 %v307_v53  ;;  %v620_v60 = vsel %vm430_vm0, %v4023_v42, 0  ;;  %v261_v61 = vshrl.u32 %v188_v47, 16  ;;  %v264_v63 = vshll.u32 %v188_v47, 16 }
  0x4e   : > { %v758_v62 = vrot.slane %v757_v55, 4  ;;  %646 = vmatpush.bf16.xpose.msra.mxu2 %v620_v60  ;;  %v270_v0 = vshll.u32 %v189_v52, 16  ;;  %v274_v1 = vshrl.u32 %v189_v52, 16  ;;  %v768_v4 = vrot.slane %v767_v59, 4  ;;  %v186_v55 = vld [vmem:[%s4247_s7 + $0xc] sm:$0xf] }
  0x4f   : > { %v425_v3 = vpack.c.b16 %v413_v58, %v412_v54  ;;  %v263_v5 = vrot.slane %v261_v61, 4  ;;  %v280_v6 = vshll.u32 %v203_v57, 16  ;;  %v266_v9 = vrot.slane %v264_v63, 5  ;;  %v187_v60 = vld [vmem:[%s4247_s7 + $0x10] sm:$0xf] }
  0x50   : > { %v763_v8 = vsel %vm4268_vm3, %v758_v62, %v762_v46  ;;  %v272_v10 = vrot.slane %v270_v0, 5  ;;  %v276_v11 = vrot.slane %v274_v1, 4  ;;  %v773_v14 = vsel %vm4268_vm3, %v768_v4, %v772_v51  ;;  %v4379_v46 = vld [vmem:[%s4247_s7 + $0x68] sm:$0x1]  ;;  %v202_v1 = vld [vmem:[%s4247_s7 + $0x14] sm:$0x1] }
  0x51   : > { %v444_v13 = vsel %vm430_vm0, %v425_v3, 0  ;;  %v878_v15 = vunpack.c.l.b16 %v763_v8  ;;  %v282_v16 = vrot.slane %v280_v6, 5  ;;  %v879_v17 = vunpack.c.l.b16 %v773_v14  ;;  %v3700_v14 = vld [vmem:[%s4247_s7 + $0x18] sm:$0xf] }
  0x52   : > { %462 = vmatpush.bf16.xpose.msra.mxu0 %v444_v13  ;;  %v267_v18 = vor.u32 %v266_v9, %v263_v5  ;;  %v277_v19 = vor.u32 %v276_v11, %v272_v10  ;;  %v727_v20 = vshrl.u32 %v3703_v2, 16  ;;  %v730_v22 = vshll.u32 %v3703_v2, 16 }
  0x53   : > { %v736_v23 = vshll.u32 %v3704_v7, 16  ;;  %v740_v24 = vshrl.u32 %v3704_v7, 16  ;;  %v746_v25 = vshll.u32 %v3705_v12, 16  ;;  %v891_v26 = vpack.c.b16 %v879_v17, %v878_v15 }
  0x54   : > { %v268_v27 = vrot.slane %v267_v18, 4  ;;  %v278_v28 = vrot.slane %v277_v19, 4  ;;  %v729_v29 = vrot.slane %v727_v20, 4  ;;  %v732_v32 = vrot.slane %v730_v22, 5  ;;  %v3701_v19 = vld [vmem:[%s4247_s7 + $0x1c] sm:$0xf] }
  0x55   : > { %v738_v33 = vrot.slane %v736_v23, 5  ;;  %v742_v34 = vrot.slane %v740_v24, 4  ;;  %v748_v35 = vrot.slane %v746_v25, 5  ;;  %v909_v38 = vsel %vm430_vm0, %v891_v26, 0  ;;  %v3702_v24 = vld [vmem:[%s4247_s7 + $0x20] sm:$0x1] }
  0x56   : > { %v273_v39 = vsel %vm4268_vm3, %v268_v27, %v272_v10  ;;  %v283_v40 = vsel %vm4268_vm3, %v278_v28, %v282_v16  ;;  %v518_v41 = vsel %vm430_vm0, %v4015_v21, 0  ;;  %927 = vmatpush.bf16.xpose.msra.mxu3 %v909_v38  ;;  %v733_v44 = vor.u32 %v732_v32, %v729_v29  ;;  %v4014_v29 = vld [vmem:[%s4247_s7] sm:$0xff] }
  0x57   : > { %v410_v42 = vunpack.c.l.b16 %v273_v39  ;;  %v411_v43 = vunpack.c.l.b16 %v283_v40  ;;  %v743_v45 = vor.u32 %v742_v34, %v738_v33  ;;  %544 = vmatpush.bf16.xpose.msra.mxu1 %v518_v41  ;;  %v617_v47 = vsel %vm430_vm0, %v4022_v30, 0  ;;  %v967_v40 = vld [vmem:[%s4247_s7 + $0x54] sm:$0xf] }
  0x58   : > { %v1578_v48 = vshrl.u32 %v3756_v31, 16  ;;  %v1581_v49 = vshll.u32 %v3756_v31, 16  ;;  %v1587_v50 = vshll.u32 %v4370_v36, 16  ;;  %v734_v52 = vrot.slane %v733_v44, 4  ;;  %647 = vmatpush.bf16.xpose.msra.mxu2 %v617_v47 }
  0x59   : > { %v424_v51 = vpack.c.b16 %v411_v43, %v410_v42  ;;  %v744_v53 = vrot.slane %v743_v45, 4  ;;  %v1591_v54 = vshrl.u32 %v4370_v36, 16  ;;  %v1597_v59 = vshll.u32 %v4379_v46, 16  ;;  %v4404_v45 = vld [vmem:[%s4247_s7 + $0x58] sm:$0xf] }
  0x5a   : > { %v1580_v56 = vrot.slane %v1578_v48, 4  ;;  %v1583_v57 = vrot.slane %v1581_v49, 5  ;;  %v1589_v58 = vrot.slane %v1587_v50, 5  ;;  %v739_v62 = vsel %vm4268_vm3, %v734_v52, %v738_v33 }
  0x5b   : > { %v441_v61 = vsel %vm430_vm0, %v424_v51, 0  ;;  %v749_v63 = vsel %vm4268_vm3, %v744_v53, %v748_v35  ;;  %v1593_v0 = vrot.slane %v1591_v54, 4  ;;  %v876_v2 = vunpack.c.l.b16 %v739_v62  ;;  %v4410_v51 = vld [vmem:[%s4247_s7 + $0x5c] sm:$0x1] }
  0x5c   : > { %463 = vmatpush.bf16.xpose.msra.mxu0 %v441_v61  ;;  %v877_v3 = vunpack.c.l.b16 %v749_v63  ;;  %v1584_v4 = vor.u32 %v1583_v57, %v1580_v56  ;;  %v1599_v5 = vrot.slane %v1597_v59, 5  ;;  %v237_v7 = vshrl.u32 %v186_v55, 16 }
  0x5d   : > { %v1594_v6 = vor.u32 %v1593_v0, %v1589_v58  ;;  %v240_v8 = vshll.u32 %v186_v55, 16  ;;  %v246_v9 = vshll.u32 %v187_v60, 16  ;;  %v250_v12 = vshrl.u32 %v187_v60, 16  ;;  %v3753_v0 = vld [vmem:[%s4247_s7 + $0x54] sm:$0xf] }
  0x5e   : > { %v890_v10 = vpack.c.b16 %v877_v3, %v876_v2  ;;  %v1585_v11 = vrot.slane %v1584_v4, 4  ;;  %v256_v13 = vshll.u32 %v202_v1, 16  ;;  %v239_v16 = vrot.slane %v237_v7, 4 }
  0x5f   : > { %v1595_v15 = vrot.slane %v1594_v6, 4  ;;  %v242_v17 = vrot.slane %v240_v8, 5  ;;  %v248_v18 = vrot.slane %v246_v9, 5  ;;  %v252_v22 = vrot.slane %v250_v12, 4 }
  0x60   : > { %v906_v20 = vsel %vm430_vm0, %v890_v10, 0  ;;  %v1590_v21 = vsel %vm4268_vm3, %v1585_v11, %v1589_v58  ;;  %v258_v23 = vrot.slane %v256_v13, 5  ;;  %v703_v28 = vshrl.u32 %v3700_v14, 16  ;;  %v4425_v10 = vld [vmem:[%s4247_s7 + $0x5c] sm:$0x1] }
  0x61   : > { %928 = vmatpush.bf16.xpose.msra.mxu3 %v906_v20  ;;  %v1600_v25 = vsel %vm4268_vm3, %v1595_v15, %v1599_v5  ;;  %v1617_v26 = vunpack.c.l.b16 %v1590_v21  ;;  %v243_v27 = vor.u32 %v242_v17, %v239_v16  ;;  %v253_v31 = vor.u32 %v252_v22, %v248_v18  ;;  %v4420_v5 = vld [vmem:[%s4247_s7 + $0x58] sm:$0xf] }
  0x62   : > { %v1618_v30 = vunpack.c.l.b16 %v1600_v25  ;;  %v706_v32 = vshll.u32 %v3700_v14, 16  ;;  %v712_v33 = vshll.u32 %v3701_v19, 16  ;;  %v705_v35 = vrot.slane %v703_v28, 4  ;;  %v185_v28 = vld [vmem:[%s4247_s7 + $0x4] sm:$0xf] }
  0x63   : > { %v244_v34 = vrot.slane %v243_v27, 4  ;;  %v716_v38 = vshrl.u32 %v3701_v19, 16  ;;  %v722_v39 = vshll.u32 %v3702_v24, 16  ;;  %v254_v42 = vrot.slane %v253_v31, 4 }
  0x64   : > { %v1626_v41 = vpack.c.b16 %v1618_v30, %v1617_v26  ;;  %v708_v43 = vrot.slane %v706_v32, 5  ;;  %v714_v44 = vrot.slane %v712_v33, 5  ;;  %v515_v50 = vsel %vm430_vm0, %v4014_v29, 0  ;;  %v201_v33 = vld [vmem:[%s4247_s7 + $0x8] sm:$0x1] }
  0x65   : > { %v249_v47 = vsel %vm4268_vm3, %v244_v34, %v248_v18  ;;  %v718_v48 = vrot.slane %v716_v38, 4  ;;  %v724_v49 = vrot.slane %v722_v39, 5  ;;  %v259_v53 = vsel %vm4268_vm3, %v254_v42, %v258_v23  ;;  %545 = vmatpush.bf16.xpose.msra.mxu1 %v515_v50  ;;  %v184_v23 = vld [vmem:[%s4247_s7] sm:$0xf]  ;;  %v3697_v50 = vld [vmem:[%s4247_s7 + $0xc] sm:$0xf] }
  0x66   : > { %v1652_v52 = vsel %vm430_vm0, %v1626_v41, 0  ;;  %v408_v54 = vunpack.c.l.b16 %v249_v47  ;;  %v709_v55 = vor.u32 %v708_v43, %v705_v35  ;;  %v409_v56 = vunpack.c.l.b16 %v259_v53 }
  0x67   : > { %1654 = vmatpush.bf16.xpose.msrb.mxu2 %v1652_v52  ;;  %v719_v57 = vor.u32 %v718_v48, %v714_v44  ;;  %v1139_v58 = vshrl.u32 %v967_v40, 16  ;;  %v1142_v59 = vshll.u32 %v967_v40, 16  ;;  %v1148_v61 = vshll.u32 %v4404_v45, 16 }
  0x68   : > { %v710_v60 = vrot.slane %v709_v55, 4  ;;  %v1152_v62 = vshrl.u32 %v4404_v45, 16  ;;  %v1158_v63 = vshll.u32 %v4410_v51, 16  ;;  %v423_v1 = vpack.c.b16 %v409_v56, %v408_v54  ;;  %v3698_v56 = vld [vmem:[%s4247_s7 + $0x10] sm:$0xf] }
  0x69   : > { %v720_v2 = vrot.slane %v719_v57, 4  ;;  %v1141_v3 = vrot.slane %v1139_v58, 4  ;;  %v1144_v4 = vrot.slane %v1142_v59, 5  ;;  %v1150_v7 = vrot.slane %v1148_v61, 5  ;;  %v3699_v61 = vld [vmem:[%s4247_s7 + $0x14] sm:$0x1] }
  0x6a   : > { %v715_v6 = vsel %vm4268_vm3, %v710_v60, %v714_v44  ;;  %v1154_v8 = vrot.slane %v1152_v62, 4  ;;  %v1160_v9 = vrot.slane %v1158_v63, 5  ;;  %v438_v11 = vsel %vm430_vm0, %v423_v1, 0 }
  0x6b   : > { %v725_v12 = vsel %vm4268_vm3, %v720_v2, %v724_v49  ;;  %v874_v13 = vunpack.c.l.b16 %v715_v6  ;;  %v1145_v14 = vor.u32 %v1144_v4, %v1141_v3  ;;  %464 = vmatpush.bf16.xpose.msra.mxu0 %v438_v11  ;;  %v1554_v17 = vshrl.u32 %v3753_v0, 16 }
  0x6c   : > { %v875_v15 = vunpack.c.l.b16 %v725_v12  ;;  %v1155_v16 = vor.u32 %v1154_v8, %v1150_v7  ;;  %v1557_v18 = vshll.u32 %v3753_v0, 16  ;;  %v1563_v20 = vshll.u32 %v4420_v5, 16 }
  0x6d   : > { %v1146_v19 = vrot.slane %v1145_v14, 4  ;;  %v1567_v21 = vshrl.u32 %v4420_v5, 16  ;;  %v1573_v22 = vshll.u32 %v4425_v10, 16  ;;  %v1556_v26 = vrot.slane %v1554_v17, 4 }
  0x6e   : > { %v889_v24 = vpack.c.b16 %v875_v15, %v874_v13  ;;  %v1156_v25 = vrot.slane %v1155_v16, 4  ;;  %v1559_v27 = vrot.slane %v1557_v18, 5  ;;  %v1565_v30 = vrot.slane %v1563_v20, 5  ;;  %v1171_v20 = vld [vmem:[%s4247_s7 + $0x54] sm:$0xe] }
  0x6f   : > { %v1151_v29 = vsel %vm4268_vm3, %v1146_v19, %v1150_v7  ;;  %v1569_v31 = vrot.slane %v1567_v21, 4  ;;  %v1575_v32 = vrot.slane %v1573_v22, 5  ;;  %v213_v42 = vshrl.u32 %v184_v23, 16 }
  0x70   : > { %v903_v34 = vsel %vm430_vm0, %v889_v24, 0  ;;  %v1161_v35 = vsel %vm4268_vm3, %v1156_v25, %v1160_v9  ;;  %v1335_v38 = vunpack.c.l.b16 %v1151_v29  ;;  %v1560_v39 = vor.u32 %v1559_v27, %v1556_v26  ;;  %v3768_v25 = vld [vmem:[%s4247_s7 + $0x60] sm:$0xe] }
  0x71   : > { %929 = vmatpush.bf16.xpose.msra.mxu3 %v903_v34  ;;  %v1336_v40 = vunpack.c.l.b16 %v1161_v35  ;;  %v1570_v41 = vor.u32 %v1569_v31, %v1565_v30  ;;  %v216_v43 = vshll.u32 %v184_v23, 16  ;;  %v222_v47 = vshll.u32 %v185_v28, 16 }
  0x72   : > { %v1561_v44 = vrot.slane %v1560_v39, 4  ;;  %v226_v48 = vshrl.u32 %v185_v28, 16  ;;  %v232_v49 = vshll.u32 %v201_v33, 16  ;;  %v215_v54 = vrot.slane %v213_v42, 4 }
  0x73   : > { %v1344_v52 = vpack.c.b16 %v1336_v40, %v1335_v38  ;;  %v1571_v53 = vrot.slane %v1570_v41, 4  ;;  %v218_v55 = vrot.slane %v216_v43, 5  ;;  %v224_v58 = vrot.slane %v222_v47, 5  ;;  %v964_v43 = vld [vmem:[%s4247_s7 + $0x48] sm:$0xf] }
  0x74   : > { %v1566_v57 = vsel %vm4268_vm3, %v1561_v44, %v1565_v30  ;;  %v228_v59 = vrot.slane %v226_v48, 4  ;;  %v234_v60 = vrot.slane %v232_v49, 5  ;;  %v679_v4 = vshrl.u32 %v3697_v50, 16 }
  0x75   : > { %v1370_v62 = vsel %vm430_vm0, %v1344_v52, 0  ;;  %v1576_v63 = vsel %vm4268_vm3, %v1571_v53, %v1575_v32  ;;  %v1615_v0 = vunpack.c.l.b16 %v1566_v57  ;;  %v219_v1 = vor.u32 %v218_v55, %v215_v54  ;;  %v4478_v54 = vld [vmem:[%s4247_s7 + $0x50] sm:$0x1] }
  0x76   : > { %1372 = vmatpush.bf16.xpose.msrb.mxu1 %v1370_v62  ;;  %v1616_v2 = vunpack.c.l.b16 %v1576_v63  ;;  %v229_v3 = vor.u32 %v228_v59, %v224_v58  ;;  %v682_v6 = vshll.u32 %v3697_v50, 16  ;;  %v688_v8 = vshll.u32 %v3698_v56, 16 }
  0x77   : > { %v220_v7 = vrot.slane %v219_v1, 4  ;;  %v692_v9 = vshrl.u32 %v3698_v56, 16  ;;  %v698_v11 = vshll.u32 %v3699_v61, 16  ;;  %v681_v14 = vrot.slane %v679_v4, 4  ;;  %v3750_v61 = vld [vmem:[%s4247_s7 + $0x48] sm:$0xf] }
  0x78   : > { %v1625_v12 = vpack.c.b16 %v1616_v2, %v1615_v0  ;;  %v230_v13 = vrot.slane %v229_v3, 4  ;;  %v684_v15 = vrot.slane %v682_v6, 5  ;;  %v690_v17 = vrot.slane %v688_v8, 5  ;;  %v4484_v2 = vld [vmem:[%s4247_s7 + $0x4c] sm:$0xf] }
  0x79   : > { %v225_v16 = vsel %vm4268_vm3, %v220_v7, %v224_v58  ;;  %v694_v18 = vrot.slane %v692_v9, 4  ;;  %v700_v19 = vrot.slane %v698_v11, 5  ;;  %v3731_v30 = vrot.slane %v1171_v20, 9 }
  0x7a   : > { %v1649_v21 = vsel %vm430_vm0, %v1625_v12, 0  ;;  %v235_v22 = vsel %vm4268_vm3, %v230_v13, %v234_v60  ;;  %v406_v23 = vunpack.c.l.b16 %v225_v16  ;;  %v685_v24 = vor.u32 %v684_v15, %v681_v14  ;;  %v4490_v12 = vld [vmem:[%s4247_s7 + $0x50] sm:$0x1] }
  0x7b   : > { %1655 = vmatpush.bf16.xpose.msrb.mxu2 %v1649_v21  ;;  %v407_v26 = vunpack.c.l.b16 %v235_v22  ;;  %v695_v27 = vor.u32 %v694_v18, %v690_v17  ;;  %v1250_v31 = vrot.slane %v4404_v45, 5  ;;  %v1253_v32 = vrot.slane %v4410_v51, 5  ;;  %v1170_v18 = vld [vmem:[%s4247_s7 + $0x48] sm:$0xe] }
  0x7c   : > { %v686_v28 = vrot.slane %v685_v24, 4  ;;  %v3776_v35 = vrot.slane %v3768_v25, 9  ;;  %v1751_v38 = vrot.slane %v4370_v36, 5  ;;  %v1754_v42 = vrot.slane %v4379_v46, 5  ;;  %v965_v36 = vld [vmem:[%s4247_s7 + $0x4c] sm:$0xf] }
  0x7d   : > { %v422_v33 = vpack.c.b16 %v407_v26, %v406_v23  ;;  %v696_v34 = vrot.slane %v695_v27, 4  ;;  %v1251_v40 = vsel %vm4456_vm6, %v3731_v30, %v1250_v31  ;;  %v1252_v41 = vrot.slane %v1250_v31, 4 }
  0x7e   : > { %v691_v39 = vsel %vm4268_vm3, %v686_v28, %v690_v17  ;;  %v1271_v47 = vunpack.c.l.b16 %v1251_v40  ;;  %v1752_v50 = vsel %vm4456_vm6, %v3776_v35, %v1751_v38  ;;  %v1753_v46 = vrot.slane %v1751_v38, 4 }
  0x7f   : > { %v435_v45 = vsel %vm430_vm0, %v422_v33, 0  ;;  %v701_v51 = vsel %vm4268_vm3, %v696_v34, %v700_v19  ;;  %v872_v44 = vunpack.c.l.b16 %v691_v39  ;;  %v1254_v49 = vsel %vm4456_vm6, %v1252_v41, %v1253_v32  ;;  %v3767_v32 = vld [vmem:[%s4247_s7 + $0x54] sm:$0xe] }
  0x80   : > { %465 = vmatpush.bf16.xpose.msra.mxu0 %v435_v45  ;;  %v873_v48 = vunpack.c.l.b16 %v701_v51  ;;  %v1272_v52 = vunpack.c.l.b16 %v1254_v49  ;;  %v1772_v53 = vunpack.c.l.b16 %v1752_v50  ;;  %v1115_v55 = vshrl.u32 %v964_v43, 16 }
  0x81   : > { %v1118_v56 = vshll.u32 %v964_v43, 16  ;;  %v1755_v58 = vsel %vm4456_vm6, %v1753_v46, %v1754_v42  ;;  %v1124_v59 = vshll.u32 %v965_v36, 16  ;;  %v1128_v60 = vshrl.u32 %v965_v36, 16  ;;  %v961_v43 = vld [vmem:[%s4247_s7 + $0x3c] sm:$0xf] }
  0x82   : > { %v888_v57 = vpack.c.b16 %v873_v48, %v872_v44  ;;  %v1280_v62 = vpack.c.b16 %v1272_v52, %v1271_v47  ;;  %v1773_v63 = vunpack.c.l.b16 %v1755_v58  ;;  %v1117_v0 = vrot.slane %v1115_v55, 4 }
  0x83   : > { %v1120_v1 = vrot.slane %v1118_v56, 5  ;;  %v1126_v4 = vrot.slane %v1124_v59, 5  ;;  %v1130_v6 = vrot.slane %v1128_v60, 4  ;;  %v1134_v7 = vshll.u32 %v4478_v54, 16 }
  0x84   : > { %v900_v3 = vsel %vm430_vm0, %v888_v57, 0  ;;  %v1306_v8 = vsel %vm430_vm0, %v1280_v62, 0  ;;  %v1781_v9 = vpack.c.b16 %v1773_v63, %v1772_v53  ;;  %v1530_v13 = vshrl.u32 %v3750_v61, 16  ;;  %v4513_v53 = vld [vmem:[%s4247_s7 + $0x40] sm:$0xf] }
  0x85   : > { %930 = vmatpush.bf16.xpose.msra.mxu3 %v900_v3  ;;  %v1121_v11 = vor.u32 %v1120_v1, %v1117_v0  ;;  %v1131_v14 = vor.u32 %v1130_v6, %v1126_v4  ;;  %v1136_v15 = vrot.slane %v1134_v7, 5  ;;  %v1533_v16 = vshll.u32 %v3750_v61, 16 }
  0x86   : > { %v1539_v17 = vshll.u32 %v4484_v2, 16  ;;  %v1807_v19 = vsel %vm430_vm0, %v1781_v9, 0  ;;  %v1532_v21 = vrot.slane %v1530_v13, 4  ;;  %v1543_v22 = vshrl.u32 %v4484_v2, 16 }
  0x87   : > { %v1122_v20 = vrot.slane %v1121_v11, 4  ;;  %v1132_v23 = vrot.slane %v1131_v14, 4  ;;  %v1535_v24 = vrot.slane %v1533_v16, 5  ;;  %v1549_v26 = vshll.u32 %v4490_v12, 16  ;;  %v4530_v11 = vld [vmem:[%s4247_s7 + $0x40] sm:$0xf] }
  0x88   : > { %1308 = vmatpush.bf16.xpose.msrb.mxu0 %v1306_v8  ;;  %v1541_v25 = vrot.slane %v1539_v17, 5  ;;  %v1545_v28 = vrot.slane %v1543_v22, 4  ;;  %v3730_v30 = vrot.slane %v1170_v18, 9  ;;  %v1243_v31 = vrot.slane %v965_v36, 5  ;;  %v4534_v17 = vld [vmem:[%s4247_s7 + $0x44] sm:$0x1] }
  0x89   : > { %v1127_v27 = vsel %vm4268_vm3, %v1122_v20, %v1126_v4  ;;  %v1137_v33 = vsel %vm4268_vm3, %v1132_v23, %v1136_v15  ;;  %v1536_v35 = vor.u32 %v1535_v24, %v1532_v21  ;;  %v1551_v38 = vrot.slane %v1549_v26, 5  ;;  %v3747_v4 = vld [vmem:[%s4247_s7 + $0x3c] sm:$0xf] }
  0x8a   : > { %v1333_v34 = vunpack.c.l.b16 %v1127_v27  ;;  %v1334_v39 = vunpack.c.l.b16 %v1137_v33  ;;  %v1546_v40 = vor.u32 %v1545_v28, %v1541_v25  ;;  %v1244_v41 = vsel %vm4456_vm6, %v3730_v30, %v1243_v31 }
  0x8b   : > { %v1245_v42 = vrot.slane %v1243_v31, 4  ;;  %v1537_v45 = vrot.slane %v1536_v35, 4  ;;  %v1246_v51 = vrot.slane %v4478_v54, 5  ;;  %v1269_v44 = vunpack.c.l.b16 %v1244_v41  ;;  %v1169_v31 = vld [vmem:[%s4247_s7 + $0x3c] sm:$0xe] }
  0x8c   : > { %v3775_v47 = vrot.slane %v3767_v32, 9  ;;  %v1343_v36 = vpack.c.b16 %v1334_v39, %v1333_v34  ;;  %v1547_v48 = vrot.slane %v1546_v40, 4  ;;  %v1744_v49 = vrot.slane %v4420_v5, 5 }
  0x8d   : > { %1809 = vmatpush.bf16.xpose.msrb.mxu3 %v1807_v19  ;;  %v1747_v50 = vrot.slane %v4425_v10, 5  ;;  %v1542_v46 = vsel %vm4268_vm3, %v1537_v45, %v1541_v25  ;;  %v1247_v52 = vsel %vm4456_vm6, %v1245_v42, %v1246_v51  ;;  %v1091_v55 = vshrl.u32 %v961_v43, 16  ;;  %v4519_v10 = vld [vmem:[%s4247_s7 + $0x44] sm:$0x1] }
  0x8e   : > { %v1094_v54 = vshll.u32 %v961_v43, 16  ;;  %v1367_v56 = vsel %vm430_vm0, %v1343_v36, 0  ;;  %v1552_v57 = vsel %vm4268_vm3, %v1547_v48, %v1551_v38  ;;  %v1613_v58 = vunpack.c.l.b16 %v1542_v46  ;;  %v3766_v38 = vld [vmem:[%s4247_s7 + $0x48] sm:$0xe] }
  0x8f   : > { %v1270_v5 = vunpack.c.l.b16 %v1247_v52  ;;  %1373 = vmatpush.bf16.xpose.msrb.mxu1 %v1367_v56  ;;  %v1614_v59 = vunpack.c.l.b16 %v1552_v57  ;;  %v1745_v60 = vsel %vm4456_vm6, %v3775_v47, %v1744_v49  ;;  %v1746_v61 = vrot.slane %v1744_v49, 4 }
  0x90   : > { %v1093_v62 = vrot.slane %v1091_v55, 4  ;;  %v1770_v0 = vunpack.c.l.b16 %v1745_v60  ;;  %v1096_v1 = vrot.slane %v1094_v54, 5  ;;  %v1100_v3 = vshll.u32 %v4513_v53, 16  ;;  %v959_v60 = vld [vmem:[%s4247_s7 + $0x34] sm:$0xf] }
  0x91   : > { %v1279_v63 = vpack.c.b16 %v1270_v5, %v1269_v44  ;;  %v1624_v6 = vpack.c.b16 %v1614_v59, %v1613_v58  ;;  %v1748_v7 = vsel %vm4456_vm6, %v1746_v61, %v1747_v50  ;;  %v1104_v8 = vshrl.u32 %v4513_v53, 16  ;;  %v958_v58 = vld [vmem:[%s4247_s7 + $0x30] sm:$0xf] }
  0x92   : > { %v1110_v9 = vshll.u32 %v4519_v10, 16  ;;  %v1771_v14 = vunpack.c.l.b16 %v1748_v7  ;;  %v1097_v15 = vor.u32 %v1096_v1, %v1093_v62  ;;  %v1102_v16 = vrot.slane %v1100_v3, 5  ;;  %v4564_v1 = vld [vmem:[%s4247_s7 + $0x38] sm:$0x1] }
  0x93   : > { %v1303_v13 = vsel %vm430_vm0, %v1279_v63, 0  ;;  %v1646_v18 = vsel %vm430_vm0, %v1624_v6, 0  ;;  %v1106_v19 = vrot.slane %v1104_v8, 4  ;;  %v1506_v21 = vshrl.u32 %v3747_v4, 16 }
  0x94   : > { %1309 = vmatpush.bf16.xpose.msrb.mxu0 %v1303_v13  ;;  %v1112_v20 = vrot.slane %v1110_v9, 5  ;;  %1656 = vmatpush.bf16.xpose.msrb.mxu2 %v1646_v18  ;;  %v1780_v22 = vpack.c.b16 %v1771_v14, %v1770_v0  ;;  %v1098_v23 = vrot.slane %v1097_v15, 4  ;;  %v1509_v24 = vshll.u32 %v3747_v4, 16  ;;  %v3744_v14 = vld [vmem:[%s4247_s7 + $0x30] sm:$0xf] }
  0x95   : > { %v1515_v25 = vshll.u32 %v4530_v11, 16  ;;  %v1107_v26 = vor.u32 %v1106_v19, %v1102_v16  ;;  %v1508_v27 = vrot.slane %v1506_v21, 4  ;;  %v1519_v28 = vshrl.u32 %v4530_v11, 16 }
  0x96   : > { %v1525_v30 = vshll.u32 %v4534_v17, 16  ;;  %v1804_v32 = vsel %vm430_vm0, %v1780_v22, 0  ;;  %v1103_v33 = vsel %vm4268_vm3, %v1098_v23, %v1102_v16  ;;  %v1511_v34 = vrot.slane %v1509_v24, 5 }
  0x97   : > { %v1517_v35 = vrot.slane %v1515_v25, 5  ;;  %1810 = vmatpush.bf16.xpose.msrb.mxu3 %v1804_v32  ;;  %v1108_v39 = vrot.slane %v1107_v26, 4  ;;  %v1331_v40 = vunpack.c.l.b16 %v1103_v33  ;;  %v1521_v41 = vrot.slane %v1519_v28, 4  ;;  %v4576_v25 = vld [vmem:[%s4247_s7 + $0x38] sm:$0x1] }
  0x98   : > { %v1527_v42 = vrot.slane %v1525_v30, 5  ;;  %v1512_v43 = vor.u32 %v1511_v34, %v1508_v27  ;;  %v3729_v45 = vrot.slane %v1169_v31, 9  ;;  %v1236_v51 = vrot.slane %v4513_v53, 5  ;;  %v1168_v31 = vld [vmem:[%s4247_s7 + $0x30] sm:$0xe] }
  0x99   : > { %v1239_v44 = vrot.slane %v4519_v10, 5  ;;  %v1113_v47 = vsel %vm4268_vm3, %v1108_v39, %v1112_v20  ;;  %v1522_v36 = vor.u32 %v1521_v41, %v1517_v35  ;;  %v3774_v48 = vrot.slane %v3766_v38, 9  ;;  %v4572_v20 = vld [vmem:[%s4247_s7 + $0x34] sm:$0xf] }
  0x9a   : > { %v1737_v49 = vrot.slane %v4484_v2, 5  ;;  %v1332_v50 = vunpack.c.l.b16 %v1113_v47  ;;  %v1513_v46 = vrot.slane %v1512_v43, 4  ;;  %v1237_v52 = vsel %vm4456_vm6, %v3729_v45, %v1236_v51 }
  0x9b   : > { %v1238_v55 = vrot.slane %v1236_v51, 4  ;;  %v1523_v54 = vrot.slane %v1522_v36, 4  ;;  %v1267_v56 = vunpack.c.l.b16 %v1237_v52  ;;  %v1740_v59 = vrot.slane %v4490_v12, 5 }
  0x9c   : > { %v1738_v53 = vsel %vm4456_vm6, %v3774_v48, %v1737_v49  ;;  %v1739_v57 = vrot.slane %v1737_v49, 4  ;;  %v1342_v5 = vpack.c.b16 %v1332_v50, %v1331_v40  ;;  %v1518_v10 = vsel %vm4268_vm3, %v1513_v46, %v1517_v35 }
  0x9d   : > { %v1240_v2 = vsel %vm4456_vm6, %v1238_v55, %v1239_v44  ;;  %v1528_v61 = vsel %vm4268_vm3, %v1523_v54, %v1527_v42  ;;  %v1611_v62 = vunpack.c.l.b16 %v1518_v10  ;;  %v1768_v0 = vunpack.c.l.b16 %v1738_v53  ;;  %v3765_v42 = vld [vmem:[%s4247_s7 + $0x3c] sm:$0xe]  ;;  %v955_v54 = vld [vmem:[%s4247_s7 + $0x24] sm:$0xf] }
  0x9e   : > { %v1268_v63 = vunpack.c.l.b16 %v1240_v2  ;;  %v1364_v3 = vsel %vm430_vm0, %v1342_v5, 0  ;;  %v1612_v4 = vunpack.c.l.b16 %v1528_v61  ;;  %v1741_v6 = vsel %vm4456_vm6, %v1739_v57, %v1740_v59 }
  0x9f   : > { %v1067_v7 = vshrl.u32 %v958_v58, 16  ;;  %1374 = vmatpush.bf16.xpose.msrb.mxu1 %v1364_v3  ;;  %v1769_v8 = vunpack.c.l.b16 %v1741_v6  ;;  %v1070_v9 = vshll.u32 %v958_v58, 16  ;;  %v1076_v13 = vshll.u32 %v959_v60, 16 }
  0xa0   : > { %v1278_v12 = vpack.c.b16 %v1268_v63, %v1267_v56  ;;  %v1623_v15 = vpack.c.b16 %v1612_v4, %v1611_v62  ;;  %v1080_v18 = vshrl.u32 %v959_v60, 16  ;;  %v1086_v19 = vshll.u32 %v4564_v1, 16  ;;  %v4600_v4 = vld [vmem:[%s4247_s7 + $0x28] sm:$0xf] }
  0xa1   : > { %v1069_v16 = vrot.slane %v1067_v7, 4  ;;  %v1779_v22 = vpack.c.b16 %v1769_v8, %v1768_v0  ;;  %v1072_v23 = vrot.slane %v1070_v9, 5  ;;  %v1078_v24 = vrot.slane %v1076_v13, 5 }
  0xa2   : > { %v1300_v21 = vsel %vm430_vm0, %v1278_v12, 0  ;;  %v1643_v26 = vsel %vm430_vm0, %v1623_v15, 0  ;;  %v1082_v27 = vrot.slane %v1080_v18, 4  ;;  %v1088_v28 = vrot.slane %v1086_v19, 5 }
  0xa3   : > { %1310 = vmatpush.bf16.xpose.msrb.mxu0 %v1300_v21  ;;  %v1482_v30 = vshrl.u32 %v3744_v14, 16  ;;  %1657 = vmatpush.bf16.xpose.msrb.mxu2 %v1643_v26  ;;  %v1801_v32 = vsel %vm430_vm0, %v1779_v22, 0  ;;  %v1073_v33 = vor.u32 %v1072_v23, %v1069_v16  ;;  %v1485_v34 = vshll.u32 %v3744_v14, 16  ;;  %v3741_v22 = vld [vmem:[%s4247_s7 + $0x24] sm:$0xf] }
  0xa4   : > { %v1491_v35 = vshll.u32 %v4572_v20, 16  ;;  %1811 = vmatpush.bf16.xpose.msrb.mxu3 %v1801_v32  ;;  %v1083_v38 = vor.u32 %v1082_v27, %v1078_v24  ;;  %v1495_v40 = vshrl.u32 %v4572_v20, 16  ;;  %v1501_v41 = vshll.u32 %v4576_v25, 16 }
  0xa5   : > { %v1484_v39 = vrot.slane %v1482_v30, 4  ;;  %v1074_v43 = vrot.slane %v1073_v33, 4  ;;  %v1487_v45 = vrot.slane %v1485_v34, 5  ;;  %v3728_v44 = vrot.slane %v1168_v31, 9  ;;  %v4621_v34 = vld [vmem:[%s4247_s7 + $0x2c] sm:$0x1] }
  0xa6   : > { %v1493_v51 = vrot.slane %v1491_v35, 5  ;;  %v1084_v47 = vrot.slane %v1083_v38, 4  ;;  %v1497_v36 = vrot.slane %v1495_v40, 4  ;;  %v1503_v48 = vrot.slane %v1501_v41, 5 }
  0xa7   : > { %v1229_v49 = vrot.slane %v959_v60, 5  ;;  %v1079_v50 = vsel %vm4268_vm3, %v1074_v43, %v1078_v24  ;;  %v1488_v46 = vor.u32 %v1487_v45, %v1484_v39  ;;  %v1232_v52 = vrot.slane %v4564_v1, 5 }
  0xa8   : > { %v3773_v55 = vrot.slane %v3765_v42, 9  ;;  %v1089_v56 = vsel %vm4268_vm3, %v1084_v47, %v1088_v28  ;;  %v1329_v53 = vunpack.c.l.b16 %v1079_v50  ;;  %v1498_v57 = vor.u32 %v1497_v36, %v1493_v51  ;;  %v4617_v28 = vld [vmem:[%s4247_s7 + $0x28] sm:$0xf] }
  0xa9   : > { %v1230_v58 = vsel %vm4456_vm6, %v3728_v44, %v1229_v49  ;;  %v1330_v5 = vunpack.c.l.b16 %v1089_v56  ;;  %v1489_v10 = vrot.slane %v1488_v46, 4  ;;  %v1231_v2 = vrot.slane %v1229_v49, 4 }
  0xaa   : > { %v1265_v59 = vunpack.c.l.b16 %v1230_v58  ;;  %v1499_v60 = vrot.slane %v1498_v57, 4  ;;  %v1730_v61 = vrot.slane %v4530_v11, 5  ;;  %v1733_v62 = vrot.slane %v4534_v17, 5  ;;  %v4607_v17 = vld [vmem:[%s4247_s7 + $0x2c] sm:$0x1] }
  0xab   : > { %v1043_v63 = vshrl.u32 %v955_v54, 16  ;;  %v1341_v0 = vpack.c.b16 %v1330_v5, %v1329_v53  ;;  %v1494_v1 = vsel %vm4268_vm3, %v1489_v10, %v1493_v51  ;;  %v1233_v3 = vsel %vm4456_vm6, %v1231_v2, %v1232_v52 }
  0xac   : > { %v1046_v6 = vshll.u32 %v955_v54, 16  ;;  %v1504_v7 = vsel %vm4268_vm3, %v1499_v60, %v1503_v48  ;;  %v1609_v12 = vunpack.c.l.b16 %v1494_v1  ;;  %v1266_v8 = vunpack.c.l.b16 %v1233_v3  ;;  %v1167_v48 = vld [vmem:[%s4247_s7 + $0x24] sm:$0xe] }
  0xad   : > { %v1731_v11 = vsel %vm4456_vm6, %v3773_v55, %v1730_v61  ;;  %v1361_v9 = vsel %vm430_vm0, %v1341_v0, 0  ;;  %v1610_v13 = vunpack.c.l.b16 %v1504_v7  ;;  %v1732_v14 = vrot.slane %v1730_v61, 4  ;;  %v3764_v55 = vld [vmem:[%s4247_s7 + $0x30] sm:$0xe] }
  0xae   : > { %v1766_v15 = vunpack.c.l.b16 %v1731_v11  ;;  %1375 = vmatpush.bf16.xpose.msrb.mxu1 %v1361_v9  ;;  %v1277_v16 = vpack.c.b16 %v1266_v8, %v1265_v59  ;;  %v1045_v18 = vrot.slane %v1043_v63, 4  ;;  %v1048_v19 = vrot.slane %v1046_v6, 5  ;;  %v952_v8 = vld [vmem:[%s4247_s7 + $0x18] sm:$0xf] }
  0xaf   : > { %v1052_v21 = vshll.u32 %v4600_v4, 16  ;;  %v1622_v23 = vpack.c.b16 %v1610_v13, %v1609_v12  ;;  %v1734_v24 = vsel %vm4456_vm6, %v1732_v14, %v1733_v62  ;;  %v1056_v26 = vshrl.u32 %v4600_v4, 16  ;;  %v4648_v13 = vld [vmem:[%s4247_s7 + $0x1c] sm:$0xf] }
  0xb0   : > { %v1062_v27 = vshll.u32 %v4607_v17, 16  ;;  %v1297_v30 = vsel %vm430_vm0, %v1277_v16, 0  ;;  %v1767_v31 = vunpack.c.l.b16 %v1734_v24  ;;  %v1049_v32 = vor.u32 %v1048_v19, %v1045_v18  ;;  %v4653_v19 = vld [vmem:[%s4247_s7 + $0x20] sm:$0x1] }
  0xb1   : > { %v1054_v33 = vrot.slane %v1052_v21, 5  ;;  %v1640_v35 = vsel %vm430_vm0, %v1622_v23, 0  ;;  %1311 = vmatpush.bf16.xpose.msrb.mxu0 %v1297_v30  ;;  %v1058_v38 = vrot.slane %v1056_v26, 4  ;;  %v1458_v40 = vshrl.u32 %v3741_v22, 16 }
  0xb2   : > { %v1064_v39 = vrot.slane %v1062_v27, 5  ;;  %1658 = vmatpush.bf16.xpose.msrb.mxu2 %v1640_v35  ;;  %v1778_v41 = vpack.c.b16 %v1767_v31, %v1766_v15  ;;  %v1050_v42 = vrot.slane %v1049_v32, 4  ;;  %v1461_v43 = vshll.u32 %v3741_v22, 16  ;;  %v3738_v31 = vld [vmem:[%s4247_s7 + $0x18] sm:$0xf] }
  0xb3   : > { %v1467_v45 = vshll.u32 %v4617_v28, 16  ;;  %v1059_v51 = vor.u32 %v1058_v38, %v1054_v33  ;;  %v1460_v44 = vrot.slane %v1458_v40, 4  ;;  %v1471_v47 = vshrl.u32 %v4617_v28, 16  ;;  %v4661_v32 = vld [vmem:[%s4247_s7 + $0x1c] sm:$0xf] }
  0xb4   : > { %v1477_v36 = vshll.u32 %v4621_v34, 16  ;;  %v1798_v49 = vsel %vm430_vm0, %v1778_v41, 0  ;;  %v1055_v50 = vsel %vm4268_vm3, %v1050_v42, %v1054_v33  ;;  %v1463_v46 = vrot.slane %v1461_v43, 5  ;;  %v4666_v40 = vld [vmem:[%s4247_s7 + $0x20] sm:$0x1] }
  0xb5   : > { %v1469_v52 = vrot.slane %v1467_v45, 5  ;;  %1812 = vmatpush.bf16.xpose.msrb.mxu3 %v1798_v49  ;;  %v1060_v54 = vrot.slane %v1059_v51, 4  ;;  %v1327_v56 = vunpack.c.l.b16 %v1055_v50  ;;  %v1473_v53 = vrot.slane %v1471_v47, 4  ;;  %v3663_v51 = vld [vmem:[%s5409_s1 + $0x8] sm:$0xf] }
  0xb6   : > { %v1479_v57 = vrot.slane %v1477_v36, 5  ;;  %v1464_v58 = vor.u32 %v1463_v46, %v1460_v44  ;;  %v3727_v5 = vrot.slane %v1167_v48, 9  ;;  %v1222_v10 = vrot.slane %v4600_v4, 5  ;;  %v1166_v49 = vld [vmem:[%s4247_s7 + $0x18] sm:$0xe]  ;;  %3696 = vmatmul.msk.bf16.vlgmr.msra.gmra.mxu2 %vm430_vm0, %v3663_v51 }
  0xb7   : > { %v1225_v2 = vrot.slane %v4607_v17, 5  ;;  %v1065_v59 = vsel %vm4268_vm3, %v1060_v54, %v1064_v39  ;;  %v1474_v60 = vor.u32 %v1473_v53, %v1469_v52  ;;  %v3772_v61 = vrot.slane %v3764_v55, 9  ;;  %v3763_v54 = vld [vmem:[%s4247_s7 + $0x24] sm:$0xe] }
  0xb8   : > { %v1723_v62 = vrot.slane %v4572_v20, 5  ;;  %v1328_v63 = vunpack.c.l.b16 %v1065_v59  ;;  %v1465_v0 = vrot.slane %v1464_v58, 4  ;;  %v1223_v1 = vsel %vm4456_vm6, %v3727_v5, %v1222_v10  ;;  %v3721_v5 = vld [vmem:[%s5409_s1 + $0xc] sm:$0xf] }
  0xb9   : > { %v1224_v3 = vrot.slane %v1222_v10, 4  ;;  %v1475_v6 = vrot.slane %v1474_v60, 4  ;;  %v1263_v7 = vunpack.c.l.b16 %v1223_v1  ;;  %v1726_v9 = vrot.slane %v4576_v25, 5  ;;  %3722 = vmatmul.msk.bf16.vlgmr.msra.gmra.mxu3 %vm430_vm0, %v3721_v5 }
  0xba   : > { %v1724_v4 = vsel %vm4456_vm6, %v3772_v61, %v1723_v62  ;;  %v1725_v12 = vrot.slane %v1723_v62, 4  ;;  %v1340_v11 = vpack.c.b16 %v1328_v63, %v1327_v56  ;;  %v1470_v17 = vsel %vm4268_vm3, %v1465_v0, %v1469_v52 }
  0xbb   : > { %v1226_v20 = vsel %vm4456_vm6, %v1224_v3, %v1225_v2  ;;  %v1480_v14 = vsel %vm4268_vm3, %v1475_v6, %v1479_v57  ;;  %v1607_v15 = vunpack.c.l.b16 %v1470_v17  ;;  %v1764_v18 = vunpack.c.l.b16 %v1724_v4  ;;  %v949_v4 = vld [vmem:[%s4247_s7 + $0xc] sm:$0xf] }
  0xbc   : > { %v1264_v16 = vunpack.c.l.b16 %v1226_v20  ;;  %v1358_v21 = vsel %vm430_vm0, %v1340_v11, 0  ;;  %v1608_v22 = vunpack.c.l.b16 %v1480_v14  ;;  %v1727_v23 = vsel %vm4456_vm6, %v1725_v12, %v1726_v9 }
  0xbd   : > { %v1019_v25 = vshrl.u32 %v952_v8, 16  ;;  %1376 = vmatpush.bf16.xpose.msrb.mxu1 %v1358_v21  ;;  %v1765_v26 = vunpack.c.l.b16 %v1727_v23  ;;  %v1022_v27 = vshll.u32 %v952_v8, 16  ;;  %v1028_v30 = vshll.u32 %v4648_v13, 16 }
  0xbe   : > { %v1276_v24 = vpack.c.b16 %v1264_v16, %v1263_v7  ;;  %v1621_v33 = vpack.c.b16 %v1608_v22, %v1607_v15  ;;  %v1032_v38 = vshrl.u32 %v4648_v13, 16  ;;  %v1038_v39 = vshll.u32 %v4653_v19, 16 }
  0xbf   : > { %v1021_v35 = vrot.slane %v1019_v25, 4  ;;  %v1777_v42 = vpack.c.b16 %v1765_v26, %v1764_v18  ;;  %v1024_v43 = vrot.slane %v1022_v27, 5  ;;  %v1030_v45 = vrot.slane %v1028_v30, 5  ;;  %v4700_v25 = vld [vmem:[%s4247_s7 + $0x10] sm:$0xf] }
  0xc0   : > { %v1294_v41 = vsel %vm430_vm0, %v1276_v24, 0  ;;  %v1637_v44 = vsel %vm430_vm0, %v1621_v33, 0  ;;  %v1034_v47 = vrot.slane %v1032_v38, 4  ;;  %v1040_v36 = vrot.slane %v1038_v39, 5  ;;  %v200_v33 = vld [vmem:[%s5409_s1] sm:$0xf] }
  0xc1   : > { %1312 = vmatpush.bf16.xpose.msrb.mxu0 %v1294_v41  ;;  %v1434_v48 = vshrl.u32 %v3738_v31, 16  ;;  %1659 = vmatpush.bf16.xpose.msrb.mxu2 %v1637_v44  ;;  %v1795_v50 = vsel %vm430_vm0, %v1777_v42, 0  ;;  %v1025_v46 = vor.u32 %v1024_v43, %v1021_v35  ;;  %v1437_v52 = vshll.u32 %v3738_v31, 16  ;;  %v3610_v31 = vld [vmem:[%s5409_s1 + $0x4] sm:$0xf] }
  0xc2   : > { %v1443_v55 = vshll.u32 %v4661_v32, 16  ;;  %1813 = vmatpush.bf16.xpose.msrb.mxu3 %v1795_v50  ;;  %v1035_v56 = vor.u32 %v1034_v47, %v1030_v45  ;;  %v1447_v57 = vshrl.u32 %v4661_v32, 16  ;;  %v1453_v58 = vshll.u32 %v4666_v40, 16  ;;  %3611 = vmatmul.msk.bf16.vlgmr.msra.gmra.mxu0 %vm430_vm0, %v3610_v31  ;;  %v3735_v44 = vld [vmem:[%s4247_s7 + $0xc] sm:$0xf] }
  0xc3   : > { %v1436_v53 = vrot.slane %v1434_v48, 4  ;;  %v1026_v10 = vrot.slane %v1025_v46, 4  ;;  %v1439_v2 = vrot.slane %v1437_v52, 5  ;;  %v3726_v60 = vrot.slane %v1166_v49, 9  ;;  %3644 = vmatmul.msk.bf16.vlgmr.msra.gmra.mxu1 %vm430_vm0, %v200_v33  ;;  %v4725_v50 = vld [vmem:[%s4247_s7 + $0x10] sm:$0xf] }
  0xc4   : > { %v1445_v59 = vrot.slane %v1443_v55, 5  ;;  %v1036_v61 = vrot.slane %v1035_v56, 4  ;;  %v1449_v62 = vrot.slane %v1447_v57, 4  ;;  %v1455_v63 = vrot.slane %v1453_v58, 5  ;;  %v4729_v56 = vld [vmem:[%s4247_s7 + $0x14] sm:$0x1] }
  0xc5   : > { %v1215_v0 = vrot.slane %v4648_v13, 5  ;;  %v1031_v1 = vsel %vm4268_vm3, %v1026_v10, %v1030_v45  ;;  %v1440_v3 = vor.u32 %v1439_v2, %v1436_v53  ;;  %v1218_v6 = vrot.slane %v4653_v19, 5 }
  0xc6   : > { %v3771_v7 = vrot.slane %v3763_v54, 9  ;;  %v1041_v12 = vsel %vm4268_vm3, %v1036_v61, %v1040_v36  ;;  %v1325_v8 = vunpack.c.l.b16 %v1031_v1  ;;  %v1450_v11 = vor.u32 %v1449_v62, %v1445_v59  ;;  %v4045_v61 = vld [vmem:[%s4247_s7 + $0x6c] sm:$0xff] }
  0xc7   : > { %v1216_v17 = vsel %vm4456_vm6, %v3726_v60, %v1215_v0  ;;  %v1326_v20 = vunpack.c.l.b16 %v1041_v12  ;;  %v1441_v9 = vrot.slane %v1440_v3, 4  ;;  %v1217_v13 = vrot.slane %v1215_v0, 4  ;;  %v1165_v3 = vld [vmem:[%s4247_s7 + $0xc] sm:$0xe] }
  0xc8   : > { %v1261_v14 = vunpack.c.l.b16 %v1216_v17  ;;  %v1451_v15 = vrot.slane %v1450_v11, 4  ;;  %v1716_v16 = vrot.slane %v4617_v28, 5  ;;  %v1719_v18 = vrot.slane %v4621_v34, 5  ;;  %v4707_v34 = vld [vmem:[%s4247_s7 + $0x14] sm:$0x1] }
  0xc9   : > { %v995_v19 = vshrl.u32 %v949_v4, 16  ;;  %v1339_v21 = vpack.c.b16 %v1326_v20, %v1325_v8  ;;  %v1446_v22 = vsel %vm4268_vm3, %v1441_v9, %v1445_v59  ;;  %v1219_v23 = vsel %vm4456_vm6, %v1217_v13, %v1218_v6  ;;  %v3762_v8 = vld [vmem:[%s4247_s7 + $0x18] sm:$0xe] }
  0xca   : > { %v998_v24 = vshll.u32 %v949_v4, 16  ;;  %v1456_v26 = vsel %vm4268_vm3, %v1451_v15, %v1455_v63  ;;  %v1605_v27 = vunpack.c.l.b16 %v1446_v22  ;;  %v1262_v30 = vunpack.c.l.b16 %v1219_v23  ;;  %v946_v23 = vld [vmem:[%s4247_s7] sm:$0xf] }
  0xcb   : > { %v1717_v28 = vsel %vm4456_vm6, %v3771_v7, %v1716_v16  ;;  %v1355_v35 = vsel %vm430_vm0, %v1339_v21, 0  ;;  %v1606_v38 = vunpack.c.l.b16 %v1456_v26  ;;  %v1718_v39 = vrot.slane %v1716_v16, 4 }
  0xcc   : > { %v1762_v41 = vunpack.c.l.b16 %v1717_v28  ;;  %1377 = vmatpush.bf16.xpose.msrb.mxu1 %v1355_v35  ;;  %v1275_v42 = vpack.c.b16 %v1262_v30, %v1261_v14  ;;  %v997_v43 = vrot.slane %v995_v19, 4  ;;  %v1000_v45 = vrot.slane %v998_v24, 5 }
  0xcd   : > { %v1004_v51 = vshll.u32 %v4700_v25, 16  ;;  %v1620_v47 = vpack.c.b16 %v1606_v38, %v1605_v27  ;;  %v1720_v36 = vsel %vm4456_vm6, %v1718_v39, %v1719_v18  ;;  %v1008_v48 = vshrl.u32 %v4700_v25, 16  ;;  %v947_v39 = vld [vmem:[%s4247_s7 + $0x4] sm:$0xf] }
  0xce   : > { %v1014_v49 = vshll.u32 %v4707_v34, 16  ;;  %v1291_v46 = vsel %vm430_vm0, %v1275_v42, 0  ;;  %v1763_v52 = vunpack.c.l.b16 %v1720_v36  ;;  %v1001_v55 = vor.u32 %v1000_v45, %v997_v43 }
  0xcf   : > { %v1006_v54 = vrot.slane %v1004_v51, 5  ;;  %v1634_v53 = vsel %vm430_vm0, %v1620_v47, 0  ;;  %1313 = vmatpush.bf16.xpose.msrb.mxu0 %v1291_v46  ;;  %v1010_v57 = vrot.slane %v1008_v48, 4  ;;  %v1410_v5 = vshrl.u32 %v3735_v44, 16  ;;  %v948_v51 = vld [vmem:[%s4247_s7 + $0x8] sm:$0x1] }
  0xd0   : > { %v1016_v58 = vrot.slane %v1014_v49, 5  ;;  %1660 = vmatpush.bf16.xpose.msrb.mxu2 %v1634_v53  ;;  %v1776_v10 = vpack.c.b16 %v1763_v52, %v1762_v41  ;;  %v1002_v2 = vrot.slane %v1001_v55, 4  ;;  %v1413_v59 = vshll.u32 %v3735_v44, 16  ;;  %v4037_v48 = vld [vmem:[%s4247_s7 + $0x60] sm:$0xff] }
  0xd1   : > { %v1419_v60 = vshll.u32 %v4725_v50, 16  ;;  %v1011_v62 = vor.u32 %v1010_v57, %v1006_v54  ;;  %v1412_v63 = vrot.slane %v1410_v5, 4  ;;  %v1423_v0 = vshrl.u32 %v4725_v50, 16 }
  0xd2   : > { %v1429_v1 = vshll.u32 %v4729_v56, 16  ;;  %v1792_v6 = vsel %vm430_vm0, %v1776_v10, 0  ;;  %v1007_v7 = vsel %vm4268_vm3, %v1002_v2, %v1006_v54  ;;  %v1415_v4 = vrot.slane %v1413_v59, 5  ;;  %v4044_v54 = vld [vmem:[%s4247_s7 + $0x60] sm:$0xff] }
  0xd3   : > { %v1421_v12 = vrot.slane %v1419_v60, 5  ;;  %1814 = vmatpush.bf16.xpose.msrb.mxu3 %v1792_v6  ;;  %v1012_v11 = vrot.slane %v1011_v62, 4  ;;  %v1323_v17 = vunpack.c.l.b16 %v1007_v7  ;;  %v1425_v20 = vrot.slane %v1423_v0, 4  ;;  %v1164_v10 = vld [vmem:[%s4247_s7] sm:$0xe] }
  0xd4   : > { %v1431_v9 = vrot.slane %v1429_v1, 5  ;;  %v1416_v13 = vor.u32 %v1415_v4, %v1412_v63  ;;  %v2279_v14 = vsel %vm430_vm0, %v4045_v61, 0  ;;  %v3725_v15 = vrot.slane %v1165_v3, 9  ;;  %v3761_v62 = vld [vmem:[%s4247_s7 + $0xc] sm:$0xe] }
  0xd5   : > { %v1208_v16 = vrot.slane %v4700_v25, 5  ;;  %v1017_v18 = vsel %vm4268_vm3, %v1012_v11, %v1016_v58  ;;  %v1426_v19 = vor.u32 %v1425_v20, %v1421_v12  ;;  %v1211_v21 = vrot.slane %v4707_v34, 5 }
  0xd6   : > { %v3770_v22 = vrot.slane %v3762_v8, 9  ;;  %v1324_v24 = vunpack.c.l.b16 %v1017_v18  ;;  %v1417_v26 = vrot.slane %v1416_v13, 4  ;;  %v1709_v25 = vrot.slane %v4661_v32, 5  ;;  %v3794_v8 = vld [vmem:[%s4247_s7 + $0x60] sm:$0xf] }
  0xd7   : > { %v1209_v27 = vsel %vm4456_vm6, %v3725_v15, %v1208_v16  ;;  %v1210_v30 = vrot.slane %v1208_v16, 4  ;;  %v1427_v28 = vrot.slane %v1426_v19, 4  ;;  %v1712_v33 = vrot.slane %v4666_v40, 5 }
  0xd8   : > { %v1259_v31 = vunpack.c.l.b16 %v1209_v27  ;;  %v1338_v35 = vpack.c.b16 %v1324_v24, %v1323_v17  ;;  %v1422_v34 = vsel %vm4268_vm3, %v1417_v26, %v1421_v12  ;;  %v971_v41 = vshrl.u32 %v946_v23, 16 }
  0xd9   : > { %v1212_v38 = vsel %vm4456_vm6, %v1210_v30, %v1211_v21  ;;  %v1432_v42 = vsel %vm4268_vm3, %v1427_v28, %v1431_v9  ;;  %v1603_v43 = vunpack.c.l.b16 %v1422_v34  ;;  %v1710_v32 = vsel %vm4456_vm6, %v3770_v22, %v1709_v25 }
  0xda   : > { %v1260_v45 = vunpack.c.l.b16 %v1212_v38  ;;  %v1352_v40 = vsel %vm430_vm0, %v1338_v35, 0  ;;  %v1604_v44 = vunpack.c.l.b16 %v1432_v42  ;;  %v1711_v47 = vrot.slane %v1709_v25, 4  ;;  %v3804_v25 = vld [vmem:[%s4247_s7 + $0x68] sm:$0x1] }
  0xdb   : > { %v1760_v36 = vunpack.c.l.b16 %v1710_v32  ;;  %1378 = vmatpush.bf16.xpose.msrb.mxu1 %v1352_v40  ;;  %v973_v46 = vrot.slane %v971_v41, 4  ;;  %v974_v52 = vshll.u32 %v946_v23, 16  ;;  %v980_v55 = vshll.u32 %v947_v39, 16 }
  0xdc   : > { %v1274_v49 = vpack.c.b16 %v1260_v45, %v1259_v31  ;;  %v1619_v53 = vpack.c.b16 %v1604_v44, %v1603_v43  ;;  %v1713_v57 = vsel %vm4456_vm6, %v1711_v47, %v1712_v33  ;;  %v984_v58 = vshrl.u32 %v947_v39, 16  ;;  %v3913_v33 = vld [vmem:[%s4247_s7 + $0x6c] sm:$0xf]  ;;  %v3914_v44 = vld [vmem:[%s4247_s7 + $0x70] sm:$0xf] }
  0xdd   : > { %v990_v5 = vshll.u32 %v948_v51, 16  ;;  %v1761_v59 = vunpack.c.l.b16 %v1713_v57  ;;  %v976_v60 = vrot.slane %v974_v52, 5  ;;  %v982_v61 = vrot.slane %v980_v55, 5  ;;  %v3915_v55 = vld [vmem:[%s4247_s7 + $0x74] sm:$0x1] }
  0xde   : > { %v1288_v2 = vsel %vm430_vm0, %v1274_v49, 0  ;;  %v1631_v63 = vsel %vm430_vm0, %v1619_v53, 0  ;;  %v986_v0 = vrot.slane %v984_v58, 4  ;;  %v4771_v3 = vsel %vm430_vm0, %v4037_v48, 0 }
  0xdf   : > { %1314 = vmatpush.bf16.xpose.msrb.mxu0 %v1288_v2  ;;  %v992_v1 = vrot.slane %v990_v5, 5  ;;  %1661 = vmatpush.bf16.xpose.msrb.mxu2 %v1631_v63  ;;  %v1775_v6 = vpack.c.b16 %v1761_v59, %v1760_v36  ;;  %v977_v7 = vor.u32 %v976_v60, %v973_v46  ;;  %v2276_v4 = vsel %vm430_vm0, %v4044_v54, 0  ;;  %v4036_v36 = vld [vmem:[%s4247_s7 + $0x54] sm:$0xff] }
  0xe0   : > { %v3724_v12 = vrot.slane %v1164_v10, 9  ;;  %v987_v11 = vor.u32 %v986_v0, %v982_v61  ;;  %v1201_v17 = vrot.slane %v947_v39, 5  ;;  %v1204_v20 = vrot.slane %v948_v51, 5  ;;  %v4043_v54 = vld [vmem:[%s4247_s7 + $0x54] sm:$0xff] }
  0xe1   : > { %v3769_v9 = vrot.slane %v3761_v62, 9  ;;  %v1789_v13 = vsel %vm430_vm0, %v1775_v6, 0  ;;  %v978_v15 = vrot.slane %v977_v7, 4  ;;  %v1702_v16 = vrot.slane %v4725_v50, 5  ;;  %v3795_v50 = vld [vmem:[%s4247_s7 + $0x64] sm:$0xf] }
  0xe2   : > { %v1705_v18 = vrot.slane %v4729_v56, 5  ;;  %1815 = vmatpush.bf16.xpose.msrb.mxu3 %v1789_v13  ;;  %v988_v19 = vrot.slane %v987_v11, 4  ;;  %v1202_v21 = vsel %vm4456_vm6, %v3724_v12, %v1201_v17  ;;  %v2023_v22 = vshrl.u32 %v3794_v8, 16 }
  0xe3   : > { %v983_v23 = vsel %vm4268_vm3, %v978_v15, %v982_v61  ;;  %v1257_v24 = vunpack.c.l.b16 %v1202_v21  ;;  %v1703_v26 = vsel %vm4456_vm6, %v3769_v9, %v1702_v16  ;;  %v1704_v27 = vrot.slane %v1702_v16, 4  ;;  %v3792_v61 = vld [vmem:[%s4247_s7 + $0x54] sm:$0xf]  ;;  %v3803_v16 = vld [vmem:[%s4247_s7 + $0x5c] sm:$0x1] }
  0xe4   : > { %v993_v56 = vsel %vm4268_vm3, %v988_v19, %v992_v1  ;;  %v1321_v30 = vunpack.c.l.b16 %v983_v23  ;;  %v1758_v31 = vunpack.c.l.b16 %v1703_v26  ;;  %v2025_v39 = vrot.slane %v2023_v22, 4  ;;  %v3910_v19 = vld [vmem:[%s4247_s7 + $0x60] sm:$0xf] }
  0xe5   : > { %v1322_v35 = vunpack.c.l.b16 %v993_v56  ;;  %v1706_v38 = vsel %vm4456_vm6, %v1704_v27, %v1705_v18  ;;  %v2026_v42 = vshll.u32 %v3794_v8, 16  ;;  %v2032_v43 = vshll.u32 %v3795_v50, 16 }
  0xe6   : > { %v1759_v41 = vunpack.c.l.b16 %v1706_v38  ;;  %v2036_v45 = vshrl.u32 %v3795_v50, 16  ;;  %v2042_v40 = vshll.u32 %v3804_v25, 16  ;;  %v2488_v47 = vshrl.u32 %v3913_v33, 16 }
  0xe7   : > { %2281 = vmatpush.bf16.xpose.msra.mxu2 %v2279_v14  ;;  %v1203_v14 = vrot.slane %v1201_v17, 4  ;;  %v1337_v32 = vpack.c.b16 %v1322_v35, %v1321_v30  ;;  %v2028_v49 = vrot.slane %v2026_v42, 5  ;;  %v2034_v46 = vrot.slane %v2032_v43, 5 }
  0xe8   : > { %v1774_v48 = vpack.c.b16 %v1759_v41, %v1758_v31  ;;  %v2038_v52 = vrot.slane %v2036_v45, 4  ;;  %v2044_v58 = vrot.slane %v2042_v40, 5  ;;  %v2490_v5 = vrot.slane %v2488_v47, 4  ;;  %v3911_v31 = vld [vmem:[%s4247_s7 + $0x64] sm:$0xf]  ;;  %v4035_v41 = vld [vmem:[%s4247_s7 + $0x48] sm:$0xff] }
  0xe9   : > { %v1205_v28 = vsel %vm4456_vm6, %v1203_v14, %v1204_v20  ;;  %v1349_v53 = vsel %vm430_vm0, %v1337_v32, 0  ;;  %v2029_v2 = vor.u32 %v2028_v49, %v2025_v39  ;;  %v2491_v60 = vshll.u32 %v3913_v33, 16  ;;  %v3793_v20 = vld [vmem:[%s4247_s7 + $0x58] sm:$0xf]  ;;  %v3912_v39 = vld [vmem:[%s4247_s7 + $0x68] sm:$0x1] }
  0xea   : > { %v1258_v34 = vunpack.c.l.b16 %v1205_v28  ;;  %1379 = vmatpush.bf16.xpose.msrb.mxu1 %v1349_v53  ;;  %v1786_v10 = vsel %vm430_vm0, %v1774_v48, 0  ;;  %v2039_v59 = vor.u32 %v2038_v52, %v2034_v46  ;;  %v2497_v62 = vshll.u32 %v3914_v44, 16 }
  0xeb   : > { %1816 = vmatpush.bf16.xpose.msrb.mxu3 %v1786_v10  ;;  %v2501_v63 = vshrl.u32 %v3914_v44, 16  ;;  %v2507_v0 = vshll.u32 %v3915_v55, 16  ;;  %v2174_v1 = vsel %vm430_vm0, %v4036_v36, 0  ;;  %v2030_v6 = vrot.slane %v2029_v2, 4  ;;  %v4042_v36 = vld [vmem:[%s4247_s7 + $0x48] sm:$0xff] }
  0xec   : > { %v1273_v51 = vpack.c.b16 %v1258_v34, %v1257_v24  ;;  %v2040_v7 = vrot.slane %v2039_v59, 4  ;;  %v2273_v12 = vsel %vm430_vm0, %v4043_v54, 0  ;;  %v2499_v8 = vrot.slane %v2497_v62, 5 }
  0xed   : > { %v2503_v11 = vrot.slane %v2501_v63, 4  ;;  %v2509_v17 = vrot.slane %v2507_v0, 5  ;;  %v1999_v9 = vshrl.u32 %v3792_v61, 16  ;;  %v2002_v18 = vshll.u32 %v3792_v61, 16  ;;  %v3802_v61 = vld [vmem:[%s4247_s7 + $0x50] sm:$0x1] }
  0xee   : > { %v1285_v57 = vsel %vm430_vm0, %v1273_v51, 0  ;;  %v2045_v13 = vsel %vm4268_vm3, %v2040_v7, %v2044_v58  ;;  %v2008_v27 = vshll.u32 %v3793_v20, 16  ;;  %v2012_v50 = vshrl.u32 %v3793_v20, 16  ;;  %v3790_v58 = vld [vmem:[%s4247_s7 + $0x48] sm:$0xf] }
  0xef   : > { %2282 = vmatpush.bf16.xpose.msra.mxu2 %v2276_v4  ;;  %1315 = vmatpush.bf16.xpose.msrb.mxu0 %v1285_v57  ;;  %v2493_v4 = vrot.slane %v2491_v60, 5  ;;  %v2063_v14 = vunpack.c.l.b16 %v2045_v13  ;;  %v2504_v22 = vor.u32 %v2503_v11, %v2499_v8  ;;  %v2001_v23 = vrot.slane %v1999_v9, 4  ;;  %v3907_v9 = vld [vmem:[%s4247_s7 + $0x54] sm:$0xf] }
  0xf0   : > { %v2004_v26 = vrot.slane %v2002_v18, 5  ;;  %v2018_v28 = vshll.u32 %v3803_v16, 16  ;;  %v2464_v25 = vshrl.u32 %v3910_v19, 16  ;;  %v2010_v34 = vrot.slane %v2008_v27, 5  ;;  %v3909_v27 = vld [vmem:[%s4247_s7 + $0x5c] sm:$0x1] }
  0xf1   : > { %v2494_v15 = vor.u32 %v2493_v4, %v2490_v5  ;;  %v2505_v30 = vrot.slane %v2504_v22, 4  ;;  %v2014_v38 = vrot.slane %v2012_v50, 4  ;;  %v2467_v48 = vshll.u32 %v3910_v19, 16  ;;  %v3791_v5 = vld [vmem:[%s4247_s7 + $0x4c] sm:$0xf] }
  0xf2   : > { %2179 = vmatpush.bf16.xpose.msra.mxu1 %v4771_v3  ;;  %v2035_v3 = vsel %vm4268_vm3, %v2030_v6, %v2034_v46  ;;  %v2005_v35 = vor.u32 %v2004_v26, %v2001_v23  ;;  %v2020_v32 = vrot.slane %v2018_v28, 5  ;;  %v2466_v47 = vrot.slane %v2464_v25, 4  ;;  %v3908_v22 = vld [vmem:[%s4247_s7 + $0x58] sm:$0xf] }
  0xf3   : > { %v2062_v21 = vunpack.c.l.b16 %v2035_v3  ;;  %v2495_v24 = vrot.slane %v2494_v15, 4  ;;  %v2510_v43 = vsel %vm4268_vm3, %v2505_v30, %v2509_v17  ;;  %v2015_v44 = vor.u32 %v2014_v38, %v2010_v34 }
  0xf4   : > { %v2528_v51 = vunpack.c.l.b16 %v2510_v43  ;;  %v2006_v40 = vrot.slane %v2005_v35, 4  ;;  %v2473_v49 = vshll.u32 %v3911_v31, 16  ;;  %v2477_v46 = vshrl.u32 %v3911_v31, 16  ;;  %v4034_v43 = vld [vmem:[%s4247_s7 + $0x3c] sm:$0xff] }
  0xf5   : > { %v2071_v56 = vpack.c.b16 %v2063_v14, %v2062_v21  ;;  %v2500_v33 = vsel %vm4268_vm3, %v2495_v24, %v2499_v8  ;;  %v2483_v52 = vshll.u32 %v3912_v39, 16  ;;  %v2016_v53 = vrot.slane %v2015_v44, 4 }
  0xf6   : > { %v2527_v45 = vunpack.c.l.b16 %v2500_v33  ;;  %v2011_v54 = vsel %vm4268_vm3, %v2006_v40, %v2010_v34  ;;  %v2171_v57 = vsel %vm430_vm0, %v4035_v41, 0  ;;  %v2469_v2 = vrot.slane %v2467_v48, 5 }
  0xf7   : > { %2283 = vmatpush.bf16.xpose.msra.mxu2 %v2273_v12  ;;  %v2097_v42 = vsel %vm430_vm0, %v2071_v56, 0  ;;  %v2060_v10 = vunpack.c.l.b16 %v2011_v54  ;;  %v2475_v59 = vrot.slane %v2473_v49, 5  ;;  %v2479_v60 = vrot.slane %v2477_v46, 4 }
  0xf8   : > { %2099 = vmatpush.bf16.xpose.msra.mxu0 %v2097_v42  ;;  %v2536_v55 = vpack.c.b16 %v2528_v51, %v2527_v45  ;;  %v2021_v63 = vsel %vm4268_vm3, %v2016_v53, %v2020_v32  ;;  %v2485_v0 = vrot.slane %v2483_v52, 5  ;;  %v2470_v7 = vor.u32 %v2469_v2, %v2466_v47  ;;  %v180_v45 = vld [vmem:[%s5410_s2] sm:$0xff]  ;;  %v3788_v47 = vld [vmem:[%s4247_s7 + $0x3c] sm:$0xf] }
  0xf9   : > { %v2061_v6 = vunpack.c.l.b16 %v2021_v63  ;;  %v2480_v4 = vor.u32 %v2479_v60, %v2475_v59  ;;  %v1975_v12 = vshrl.u32 %v3790_v58, 16  ;;  %v1978_v8 = vshll.u32 %v3790_v58, 16  ;;  %v4041_v32 = vld [vmem:[%s4247_s7 + $0x3c] sm:$0xff] }
  0xfa   : > { %2180 = vmatpush.bf16.xpose.msra.mxu1 %v2174_v1  ;;  %v2562_v62 = vsel %vm430_vm0, %v2536_v55, 0  ;;  %v2270_v1 = vsel %vm430_vm0, %v4042_v36, 0  ;;  %v1984_v11 = vshll.u32 %v3791_v5, 16  ;;  %v1988_v17 = vshrl.u32 %v3791_v5, 16  ;;  %v3789_v55 = vld [vmem:[%s4247_s7 + $0x40] sm:$0xf] }
  0xfb   : > { %2564 = vmatpush.bf16.xpose.msra.mxu3 %v2562_v62  ;;  %v1994_v20 = vshll.u32 %v3802_v61, 16  ;;  %v2070_v3 = vpack.c.b16 %v2061_v6, %v2060_v10  ;;  %v2471_v13 = vrot.slane %v2470_v7, 4  ;;  %v2481_v15 = vrot.slane %v2480_v4, 4  ;;  %v3801_v5 = vld [vmem:[%s4247_s7 + $0x44] sm:$0x1] }
  0xfc   : > { %v1977_v16 = vrot.slane %v1975_v12, 4  ;;  %v1980_v18 = vrot.slane %v1978_v8, 5  ;;  %v1986_v19 = vrot.slane %v1984_v11, 5  ;;  %v1990_v21 = vrot.slane %v1988_v17, 4  ;;  %v3905_v8 = vld [vmem:[%s4247_s7 + $0x4c] sm:$0xf] }
  0xfd   : > { %v1996_v14 = vrot.slane %v1994_v20, 5  ;;  %v2094_v23 = vsel %vm430_vm0, %v2070_v3, 0  ;;  %v2476_v24 = vsel %vm4268_vm3, %v2471_v13, %v2475_v59  ;;  %v2486_v26 = vsel %vm4268_vm3, %v2481_v15, %v2485_v0 }
  0xfe   : > { %v2440_v50 = vshrl.u32 %v3907_v9, 16  ;;  %v2525_v56 = vunpack.c.l.b16 %v2476_v24  ;;  %v2526_v30 = vunpack.c.l.b16 %v2486_v26  ;;  %v1981_v28 = vor.u32 %v1980_v18, %v1977_v16  ;;  %v3906_v18 = vld [vmem:[%s4247_s7 + $0x50] sm:$0x1] }
  0xff   : > { %2284 = vmatpush.bf16.xpose.msra.mxu2 %v2270_v1  ;;  %v1991_v31 = vor.u32 %v1990_v21, %v1986_v19  ;;  %v2443_v33 = vshll.u32 %v3907_v9, 16  ;;  %v2449_v35 = vshll.u32 %v3908_v22, 16  ;;  %v2453_v34 = vshrl.u32 %v3908_v22, 16  ;;  %v3904_v1 = vld [vmem:[%s4247_s7 + $0x48] sm:$0xf] }
 0x100   : > { %2100 = vmatpush.bf16.xpose.msra.mxu0 %v2094_v23  ;;  %v2442_v25 = vrot.slane %v2440_v50, 4  ;;  %v2535_v38 = vpack.c.b16 %v2526_v30, %v2525_v56  ;;  %v1982_v39 = vrot.slane %v1981_v28, 4  ;;  %v2459_v42 = vshll.u32 %v3909_v27, 16  ;;  %v4033_v23 = vld [vmem:[%s4247_s7 + $0x30] sm:$0xff] }
 0x101   : > { %v1992_v41 = vrot.slane %v1991_v31, 4  ;;  %v2445_v51 = vrot.slane %v2443_v33, 5  ;;  %v2451_v40 = vrot.slane %v2449_v35, 5  ;;  %v2455_v44 = vrot.slane %v2453_v34, 4  ;;  %v4040_v56 = vld [vmem:[%s4247_s7 + $0x30] sm:$0xff] }
 0x102   : > { %2181 = vmatpush.bf16.xpose.msra.mxu1 %v2171_v57  ;;  %v2559_v36 = vsel %vm430_vm0, %v2535_v38, 0  ;;  %v1987_v48 = vsel %vm4268_vm3, %v1982_v39, %v1986_v19  ;;  %v2461_v46 = vrot.slane %v2459_v42, 5  ;;  %v4161_v52 = vmov 0   ;;  %v3786_v33 = vld [vmem:[%s4247_s7 + $0x30] sm:$0xf] }
 0x103   : > { %v1997_v49 = vsel %vm4268_vm3, %v1992_v41, %v1996_v14  ;;  %4104 = vset.pattern.permute.xlu0 %v4161_v52  ;;  %2565 = vmatpush.bf16.xpose.msra.mxu3 %v2559_v36  ;;  %v2058_v54 = vunpack.c.l.b16 %v1987_v48  ;;  %v2446_v57 = vor.u32 %v2445_v51, %v2442_v25  ;;  %v2456_v58 = vor.u32 %v2455_v44, %v2451_v40  ;;  %v3787_v41 = vld [vmem:[%s4247_s7 + $0x34] sm:$0xf]  ;;  %v3800_v51 = vld [vmem:[%s4247_s7 + $0x38] sm:$0x1] }
 0x104   : > { %v2059_v53 = vunpack.c.l.b16 %v1997_v49  ;;  %939 = vperm.xlu0 %4104, %v180_v45   ;;  %v2168_v10 = vsel %vm430_vm0, %v4034_v43, 0  ;;  %v2267_v2 = vsel %vm430_vm0, %v4041_v32, 0  ;;  %v1951_v59 = vshrl.u32 %v3788_v47, 16 }
 0x105   : > { %v1954_v60 = vshll.u32 %v3788_v47, 16  ;;  %v2447_v62 = vrot.slane %v2446_v57, 4  ;;  %v2457_v63 = vrot.slane %v2456_v58, 4  ;;  %v1960_v0 = vshll.u32 %v3789_v55, 16 }
 0x106   : > { %v2069_v61 = vpack.c.b16 %v2059_v53, %v2058_v54  ;;  %v1953_v6 = vrot.slane %v1951_v59, 4  ;;  %v1964_v4 = vshrl.u32 %v3789_v55, 16  ;;  %v1970_v12 = vshll.u32 %v3801_v5, 16  ;;  %v3901_v5 = vld [vmem:[%s4247_s7 + $0x3c] sm:$0xf] }
 0x107   : > { %2285 = vmatpush.bf16.xpose.msra.mxu2 %v2267_v2  ;;  %v1956_v7 = vrot.slane %v1954_v60, 5  ;;  %v2452_v17 = vsel %vm4268_vm3, %v2447_v62, %v2451_v40  ;;  %v2462_v20 = vsel %vm4268_vm3, %v2457_v63, %v2461_v46  ;;  %v1962_v9 = vrot.slane %v1960_v0, 5  ;;  %v3759_v40 = vld [vmem:[%s5409_s1 + $0x18] sm:$0xf] }
 0x108   : > { %v2091_v11 = vsel %vm430_vm0, %v2069_v61, 0  ;;  %v2523_v3 = vunpack.c.l.b16 %v2452_v17  ;;  %v2524_v13 = vunpack.c.l.b16 %v2462_v20  ;;  %v1966_v16 = vrot.slane %v1964_v4, 4  ;;  %3760 = vmatmul.msk.bf16.vlgmr.msrb.gmra.mxu2 %vm430_vm0, %v3759_v40  ;;  %v3902_v61 = vld [vmem:[%s4247_s7 + $0x40] sm:$0xf] }
 0x109   : > { %2101 = vmatpush.bf16.xpose.msra.mxu0 %v2091_v11  ;;  %v1957_v15 = vor.u32 %v1956_v7, %v1953_v6  ;;  %v1972_v19 = vrot.slane %v1970_v12, 5  ;;  %v2416_v21 = vshrl.u32 %v3904_v1, 16  ;;  %v2419_v14 = vshll.u32 %v3904_v1, 16  ;;  %v3903_v6 = vld [vmem:[%s4247_s7 + $0x44] sm:$0x1] }
 0x10a   : > { %2182 = vmatpush.bf16.xpose.msra.mxu1 %v2168_v10  ;;  %v2425_v22 = vshll.u32 %v3905_v8, 16  ;;  %v2534_v24 = vpack.c.b16 %v2524_v13, %v2523_v3  ;;  %v1967_v27 = vor.u32 %v1966_v16, %v1962_v9  ;;  %v2429_v50 = vshrl.u32 %v3905_v8, 16  ;;  %v4032_v11 = vld [vmem:[%s4247_s7 + $0x24] sm:$0xff] }
 0x10b   : > { %v1958_v26 = vrot.slane %v1957_v15, 4  ;;  %v2418_v30 = vrot.slane %v2416_v21, 4  ;;  %v2421_v28 = vrot.slane %v2419_v14, 5  ;;  %v2435_v25 = vshll.u32 %v3906_v18, 16 }
 0x10c   : > { %v2427_v31 = vrot.slane %v2425_v22, 5  ;;  %v2556_v35 = vsel %vm430_vm0, %v2534_v24, 0  ;;  %v1968_v38 = vrot.slane %v1967_v27, 4  ;;  %v2431_v39 = vrot.slane %v2429_v50, 4  ;;  %v3784_v24 = vld [vmem:[%s4247_s7 + $0x24] sm:$0xf] }
 0x10d   : > { %v1963_v34 = vsel %vm4268_vm3, %v1958_v26, %v1962_v9  ;;  %2566 = vmatpush.bf16.xpose.msra.mxu3 %v2556_v35  ;;  %v2422_v43 = vor.u32 %v2421_v28, %v2418_v30  ;;  %v2437_v45 = vrot.slane %v2435_v25, 5  ;;  %v2165_v32 = vsel %vm430_vm0, %v4033_v23, 0  ;;  %v3785_v30 = vld [vmem:[%s4247_s7 + $0x28] sm:$0xf]  ;;  %v3799_v35 = vld [vmem:[%s4247_s7 + $0x2c] sm:$0x1] }
 0x10e   : > { %v2056_v42 = vunpack.c.l.b16 %v1963_v34  ;;  %v1973_v44 = vsel %vm4268_vm3, %v1968_v38, %v1972_v19  ;;  %v2432_v47 = vor.u32 %v2431_v39, %v2427_v31  ;;  %v2264_v36 = vsel %vm430_vm0, %v4040_v56, 0  ;;  %v4039_v19 = vld [vmem:[%s4247_s7 + $0x24] sm:$0xff] }
 0x10f   : > { %v1927_v48 = vshrl.u32 %v3786_v33, 16  ;;  %v2057_v49 = vunpack.c.l.b16 %v1973_v44  ;;  %v2423_v46 = vrot.slane %v2422_v43, 4  ;;  %2286 = vmatpush.bf16.xpose.msra.mxu2 %v2264_v36  ;;  %v1930_v52 = vshll.u32 %v3786_v33, 16  ;;  %v3898_v36 = vld [vmem:[%s4247_s7 + $0x30] sm:$0xf] }
 0x110   : > { %v1936_v55 = vshll.u32 %v3787_v41, 16  ;;  %v2433_v54 = vrot.slane %v2432_v47, 4  ;;  %v1940_v57 = vshrl.u32 %v3787_v41, 16  ;;  %v1946_v58 = vshll.u32 %v3800_v51, 16 }
 0x111   : > { %v1929_v53 = vrot.slane %v1927_v48, 4  ;;  %v2068_v10 = vpack.c.b16 %v2057_v49, %v2056_v42  ;;  %v2428_v2 = vsel %vm4268_vm3, %v2423_v46, %v2427_v31  ;;  %v1932_v59 = vrot.slane %v1930_v52, 5 }
 0x112   : > { %2183 = vmatpush.bf16.xpose.msra.mxu1 %v2165_v32  ;;  %v1938_v60 = vrot.slane %v1936_v55, 5  ;;  %v2438_v62 = vsel %vm4268_vm3, %v2433_v54, %v2437_v45  ;;  %v2521_v63 = vunpack.c.l.b16 %v2428_v2  ;;  %v1942_v0 = vrot.slane %v1940_v57, 4  ;;  %v3899_v55 = vld [vmem:[%s4247_s7 + $0x34] sm:$0xf]  ;;  %v3900_v54 = vld [vmem:[%s4247_s7 + $0x38] sm:$0x1] }
 0x113   : > { %v1948_v1 = vrot.slane %v1946_v58, 5  ;;  %v2088_v7 = vsel %vm430_vm0, %v2068_v10, 0  ;;  %v2522_v4 = vunpack.c.l.b16 %v2438_v62  ;;  %v1933_v12 = vor.u32 %v1932_v59, %v1929_v53  ;;  %v3777_v10 = vld [vmem:[%s5409_s1 + $0x1c] sm:$0xf]  ;;  %v3732_v2 = vld [vmem:[%s5409_s1 + $0x14] sm:$0xf] }
 0x114   : > { %v2392_v8 = vshrl.u32 %v3901_v5, 16  ;;  %2102 = vmatpush.bf16.xpose.msra.mxu0 %v2088_v7  ;;  %v1943_v17 = vor.u32 %v1942_v0, %v1938_v60  ;;  %v2395_v20 = vshll.u32 %v3901_v5, 16  ;;  %v2401_v9 = vshll.u32 %v3902_v61, 16  ;;  %3778 = vmatmul.msk.bf16.vlgmr.msrb.gmra.mxu3 %vm430_vm0, %v3777_v10 }
 0x115   : > { %v2405_v3 = vshrl.u32 %v3902_v61, 16  ;;  %v2533_v13 = vpack.c.b16 %v2522_v4, %v2521_v63  ;;  %v1934_v15 = vrot.slane %v1933_v12, 4  ;;  %v2411_v18 = vshll.u32 %v3903_v6, 16  ;;  %v3723_v63 = vld [vmem:[%s5409_s1 + $0x10] sm:$0xf]  ;;  %v4031_v4 = vld [vmem:[%s4247_s7 + $0x18] sm:$0xff]  ;;  %3733 = vmatmul.msk.bf16.vlgmr.msrb.gmra.mxu0 %vm430_vm0, %v3732_v2 }
 0x116   : > { %v2394_v16 = vrot.slane %v2392_v8, 4  ;;  %v1944_v21 = vrot.slane %v1943_v17, 4  ;;  %v2397_v14 = vrot.slane %v2395_v20, 5  ;;  %v2403_v22 = vrot.slane %v2401_v9, 5  ;;  %v4038_v12 = vld [vmem:[%s4247_s7 + $0x18] sm:$0xff]  ;;  %3734 = vmatmul.msk.bf16.vlgmr.msrb.gmra.mxu1 %vm430_vm0, %v3723_v63 }
 0x117   : > { %v2407_v23 = vrot.slane %v2405_v3, 4  ;;  %v2553_v26 = vsel %vm430_vm0, %v2533_v13, 0  ;;  %v1939_v27 = vsel %vm4268_vm3, %v1934_v15, %v1938_v60  ;;  %v2413_v50 = vrot.slane %v2411_v18, 5  ;;  %v3984_v9 = vld [vmem:[%s4247_s7 + $0x6c] sm:$0xf] }
 0x118   : > { %v2162_v56 = vsel %vm430_vm0, %v4032_v11, 0  ;;  %2567 = vmatpush.bf16.xpose.msra.mxu3 %v2553_v26  ;;  %v1949_v28 = vsel %vm4268_vm3, %v1944_v21, %v1948_v1  ;;  %v2054_v31 = vunpack.c.l.b16 %v1939_v27  ;;  %v2398_v25 = vor.u32 %v2397_v14, %v2394_v16  ;;  %v4924_v18 = vld [vmem:[%s4247_s7 + $0x70] sm:$0xf]  ;;  %v3896_v63 = vld [vmem:[%s4247_s7 + $0x28] sm:$0xf] }
 0x119   : > { %v2408_v33 = vor.u32 %v2407_v23, %v2403_v22  ;;  %v2055_v34 = vunpack.c.l.b16 %v1949_v28  ;;  %v2261_v38 = vsel %vm430_vm0, %v4039_v19, 0  ;;  %v1903_v39 = vshrl.u32 %v3784_v24, 16  ;;  %v4929_v23 = vld [vmem:[%s4247_s7 + $0x74] sm:$0x1] }
 0x11a   : > { %2184 = vmatpush.bf16.xpose.msra.mxu1 %v2162_v56  ;;  %v1906_v41 = vshll.u32 %v3784_v24, 16  ;;  %v2399_v42 = vrot.slane %v2398_v25, 4  ;;  %2287 = vmatpush.bf16.xpose.msra.mxu2 %v2261_v38  ;;  %v1912_v45 = vshll.u32 %v3785_v30, 16  ;;  %v1916_v32 = vshrl.u32 %v3785_v30, 16  ;;  %v3782_v38 = vld [vmem:[%s4247_s7 + $0x18] sm:$0xf] }
 0x11b   : > { %v2409_v43 = vrot.slane %v2408_v33, 4  ;;  %v2067_v51 = vpack.c.b16 %v2055_v34, %v2054_v31  ;;  %v1905_v40 = vrot.slane %v1903_v39, 4  ;;  %v1922_v47 = vshll.u32 %v3799_v35, 16 }
 0x11c   : > { %v1908_v44 = vrot.slane %v1906_v41, 5  ;;  %v2404_v48 = vsel %vm4268_vm3, %v2399_v42, %v2403_v22  ;;  %v1914_v46 = vrot.slane %v1912_v45, 5  ;;  %v1918_v52 = vrot.slane %v1916_v32, 4  ;;  %v3783_v45 = vld [vmem:[%s4247_s7 + $0x1c] sm:$0xf] }
 0x11d   : > { %v2414_v49 = vsel %vm4268_vm3, %v2409_v43, %v2413_v50  ;;  %v2085_v53 = vsel %vm430_vm0, %v2067_v51, 0  ;;  %v2519_v57 = vunpack.c.l.b16 %v2404_v48  ;;  %v1924_v60 = vrot.slane %v1922_v47, 5  ;;  %v3798_v47 = vld [vmem:[%s4247_s7 + $0x20] sm:$0x1] }
 0x11e   : > { %v2520_v58 = vunpack.c.l.b16 %v2414_v49  ;;  %v1909_v5 = vor.u32 %v1908_v44, %v1905_v40  ;;  %2103 = vmatpush.bf16.xpose.msra.mxu0 %v2085_v53  ;;  %v1919_v59 = vor.u32 %v1918_v52, %v1914_v46  ;;  %v2368_v61 = vshrl.u32 %v3898_v36, 16 }
 0x11f   : > { %v2371_v62 = vshll.u32 %v3898_v36, 16  ;;  %v2377_v6 = vshll.u32 %v3899_v55, 16  ;;  %v2381_v7 = vshrl.u32 %v3899_v55, 16  ;;  %v2387_v20 = vshll.u32 %v3900_v54, 16 }
 0x120   : > { %v2532_v0 = vpack.c.b16 %v2520_v58, %v2519_v57  ;;  %v1910_v1 = vrot.slane %v1909_v5, 4  ;;  %v1920_v8 = vrot.slane %v1919_v59, 4  ;;  %v2370_v11 = vrot.slane %v2368_v61, 4  ;;  %v3895_v57 = vld [vmem:[%s4247_s7 + $0x24] sm:$0xf] }
 0x121   : > { %v2373_v17 = vrot.slane %v2371_v62, 5  ;;  %v2379_v15 = vrot.slane %v2377_v6, 5  ;;  %v2383_v16 = vrot.slane %v2381_v7, 4  ;;  %v2389_v22 = vrot.slane %v2387_v20, 5  ;;  %v3897_v7 = vld [vmem:[%s4247_s7 + $0x2c] sm:$0x1] }
 0x122   : > { %v2550_v3 = vsel %vm430_vm0, %v2532_v0, 0  ;;  %v1915_v13 = vsel %vm4268_vm3, %v1910_v1, %v1914_v46  ;;  %v1925_v19 = vsel %vm4268_vm3, %v1920_v8, %v1924_v60  ;;  %v2159_v27 = vsel %vm430_vm0, %v4031_v4, 0 }
 0x123   : > { %2568 = vmatpush.bf16.xpose.msra.mxu3 %v2550_v3  ;;  %v2052_v21 = vunpack.c.l.b16 %v1915_v13  ;;  %v2374_v14 = vor.u32 %v2373_v17, %v2370_v11  ;;  %v2053_v24 = vunpack.c.l.b16 %v1925_v19  ;;  %v2384_v26 = vor.u32 %v2383_v16, %v2379_v15  ;;  %2185 = vmatpush.bf16.xpose.msra.mxu1 %v2159_v27 }
 0x124   : > { %v2258_v50 = vsel %vm430_vm0, %v4038_v12, 0  ;;  %v3212_v30 = vshrl.u32 %v3984_v9, 16  ;;  %v3215_v28 = vshll.u32 %v3984_v9, 16  ;;  %v3221_v31 = vshll.u32 %v4924_v18, 16  ;;  %v4030_v12 = vld [vmem:[%s4247_s7 + $0xc] sm:$0xff] }
 0x125   : > { %v2375_v56 = vrot.slane %v2374_v14, 4  ;;  %2288 = vmatpush.bf16.xpose.msra.mxu2 %v2258_v50  ;;  %v2066_v25 = vpack.c.b16 %v2053_v24, %v2052_v21  ;;  %v2385_v33 = vrot.slane %v2384_v26, 4  ;;  %v3225_v35 = vshrl.u32 %v4924_v18, 16 }
 0x126   : > { %v3231_v34 = vshll.u32 %v4929_v23, 16  ;;  %v3214_v41 = vrot.slane %v3212_v30, 4  ;;  %v3217_v42 = vrot.slane %v3215_v28, 5  ;;  %v3223_v43 = vrot.slane %v3221_v31, 5 }
 0x127   : > { %v2380_v39 = vsel %vm4268_vm3, %v2375_v56, %v2379_v15  ;;  %v2082_v32 = vsel %vm430_vm0, %v2066_v25, 0  ;;  %v2390_v51 = vsel %vm4268_vm3, %v2385_v33, %v2389_v22  ;;  %v3227_v44 = vrot.slane %v3225_v35, 4  ;;  %v3940_v22 = vld [vmem:[%s4247_s7 + $0x60] sm:$0xf]  ;;  %v4956_v56 = vld [vmem:[%s4247_s7 + $0x64] sm:$0xf] }
 0x128   : > { %v2517_v40 = vunpack.c.l.b16 %v2380_v39  ;;  %2104 = vmatpush.bf16.xpose.msra.mxu0 %v2082_v32  ;;  %v2518_v36 = vunpack.c.l.b16 %v2390_v51  ;;  %v3218_v48 = vor.u32 %v3217_v42, %v3214_v41  ;;  %v3233_v49 = vrot.slane %v3231_v34, 5  ;;  %v4963_v33 = vld [vmem:[%s4247_s7 + $0x68] sm:$0x1] }
 0x129   : > { %v1879_v46 = vshrl.u32 %v3782_v38, 16  ;;  %v3228_v52 = vor.u32 %v3227_v44, %v3223_v43  ;;  %v1882_v55 = vshll.u32 %v3782_v38, 16  ;;  %v1888_v54 = vshll.u32 %v3783_v45, 16 }
 0x12a   : > { %v1892_v53 = vshrl.u32 %v3783_v45, 16  ;;  %v2531_v58 = vpack.c.b16 %v2518_v36, %v2517_v40  ;;  %v3219_v5 = vrot.slane %v3218_v48, 4  ;;  %v1898_v2 = vshll.u32 %v3798_v47, 16  ;;  %v3981_v47 = vld [vmem:[%s4247_s7 + $0x60] sm:$0xf] }
 0x12b   : > { %v1881_v10 = vrot.slane %v1879_v46, 4  ;;  %v3229_v59 = vrot.slane %v3228_v52, 4  ;;  %v1884_v60 = vrot.slane %v1882_v55, 5  ;;  %v1890_v61 = vrot.slane %v1888_v54, 5  ;;  %v4971_v52 = vld [vmem:[%s4247_s7 + $0x64] sm:$0xf] }
 0x12c   : > { %v1894_v62 = vrot.slane %v1892_v53, 4  ;;  %v2547_v0 = vsel %vm430_vm0, %v2531_v58, 0  ;;  %v3224_v1 = vsel %vm4268_vm3, %v3219_v5, %v3223_v43  ;;  %v1900_v6 = vrot.slane %v1898_v2, 5  ;;  %v4977_v58 = vld [vmem:[%s4247_s7 + $0x68] sm:$0x1] }
 0x12d   : > { %v2344_v4 = vshrl.u32 %v3895_v57, 16  ;;  %2569 = vmatpush.bf16.xpose.msra.mxu3 %v2547_v0  ;;  %v3234_v8 = vsel %vm4268_vm3, %v3229_v59, %v3233_v49  ;;  %v3251_v11 = vunpack.c.l.b16 %v3224_v1  ;;  %v1885_v17 = vor.u32 %v1884_v60, %v1881_v10  ;;  %v3780_v0 = vld [vmem:[%s4247_s7 + $0xc] sm:$0xf] }
 0x12e   : > { %v1895_v20 = vor.u32 %v1894_v62, %v1890_v61  ;;  %v3252_v9 = vunpack.c.l.b16 %v3234_v8  ;;  %v2347_v13 = vshll.u32 %v3895_v57, 16  ;;  %v2353_v15 = vshll.u32 %v3896_v63, 16 }
 0x12f   : > { %v2346_v3 = vrot.slane %v2344_v4, 4  ;;  %v1886_v16 = vrot.slane %v1885_v17, 4  ;;  %v2357_v21 = vshrl.u32 %v3896_v63, 16  ;;  %v2363_v14 = vshll.u32 %v3897_v7, 16 }
 0x130   : > { %v1896_v19 = vrot.slane %v1895_v20, 4  ;;  %v3260_v24 = vpack.c.b16 %v3252_v9, %v3251_v11  ;;  %v2349_v26 = vrot.slane %v2347_v13, 5  ;;  %v2355_v27 = vrot.slane %v2353_v15, 5  ;;  %v3781_v20 = vld [vmem:[%s4247_s7 + $0x10] sm:$0xf] }
 0x131   : > { %v2156_v50 = vsel %vm430_vm0, %v4030_v12, 0  ;;  %v1891_v30 = vsel %vm4268_vm3, %v1886_v16, %v1890_v61  ;;  %v2359_v31 = vrot.slane %v2357_v21, 4  ;;  %v2365_v25 = vrot.slane %v2363_v14, 5  ;;  %v3797_v15 = vld [vmem:[%s4247_s7 + $0x14] sm:$0x1] }
 0x132   : > { %v1901_v28 = vsel %vm4268_vm3, %v1896_v19, %v1900_v6  ;;  %2186 = vmatpush.bf16.xpose.msra.mxu1 %v2156_v50  ;;  %v3286_v35 = vsel %vm430_vm0, %v3260_v24, 0  ;;  %v2050_v34 = vunpack.c.l.b16 %v1891_v30  ;;  %v2350_v39 = vor.u32 %v2349_v26, %v2346_v3  ;;  %v3892_v24 = vld [vmem:[%s4247_s7 + $0x18] sm:$0xf] }
 0x133   : > { %v2051_v38 = vunpack.c.l.b16 %v1901_v28  ;;  %3288 = vmatpush.bf16.xpose.msrb.mxu2 %v3286_v35  ;;  %v2360_v41 = vor.u32 %v2359_v31, %v2355_v27  ;;  %v2776_v42 = vshrl.u32 %v3940_v22, 16  ;;  %v2779_v43 = vshll.u32 %v3940_v22, 16 }
 0x134   : > { %v2785_v45 = vshll.u32 %v4956_v56, 16  ;;  %v2351_v51 = vrot.slane %v2350_v39, 4  ;;  %v2789_v40 = vshrl.u32 %v4956_v56, 16  ;;  %v2795_v44 = vshll.u32 %v4963_v33, 16 }
 0x135   : > { %v2065_v32 = vpack.c.b16 %v2051_v38, %v2050_v34  ;;  %v2361_v36 = vrot.slane %v2360_v41, 4  ;;  %v2778_v48 = vrot.slane %v2776_v42, 4  ;;  %v2781_v49 = vrot.slane %v2779_v43, 5  ;;  %v3893_v41 = vld [vmem:[%s4247_s7 + $0x1c] sm:$0xf] }
 0x136   : > { %v2787_v46 = vrot.slane %v2785_v45, 5  ;;  %v2356_v54 = vsel %vm4268_vm3, %v2351_v51, %v2355_v27  ;;  %v2791_v53 = vrot.slane %v2789_v40, 4  ;;  %v2797_v57 = vrot.slane %v2795_v44, 5  ;;  %v3894_v40 = vld [vmem:[%s4247_s7 + $0x20] sm:$0x1] }
 0x137   : > { %v2079_v55 = vsel %vm430_vm0, %v2065_v32, 0  ;;  %v2366_v5 = vsel %vm4268_vm3, %v2361_v36, %v2365_v25  ;;  %v2515_v10 = vunpack.c.l.b16 %v2356_v54  ;;  %v2782_v2 = vor.u32 %v2781_v49, %v2778_v48  ;;  %v3951_v49 = vld [vmem:[%s4247_s7 + $0x60] sm:$0xe] }
 0x138   : > { %2105 = vmatpush.bf16.xpose.msra.mxu0 %v2079_v55  ;;  %v3188_v59 = vshrl.u32 %v3981_v47, 16  ;;  %v2516_v60 = vunpack.c.l.b16 %v2366_v5  ;;  %v2792_v61 = vor.u32 %v2791_v53, %v2787_v46  ;;  %v3191_v62 = vshll.u32 %v3981_v47, 16 }
 0x139   : > { %v3197_v63 = vshll.u32 %v4971_v52, 16  ;;  %v2783_v1 = vrot.slane %v2782_v2, 4  ;;  %v3201_v7 = vshrl.u32 %v4971_v52, 16  ;;  %v3207_v4 = vshll.u32 %v4977_v58, 16 }
 0x13a   : > { %v3190_v6 = vrot.slane %v3188_v59, 4  ;;  %v2530_v12 = vpack.c.b16 %v2516_v60, %v2515_v10  ;;  %v2793_v8 = vrot.slane %v2792_v61, 4  ;;  %v3193_v11 = vrot.slane %v3191_v62, 5 }
 0x13b   : > { %v3199_v17 = vrot.slane %v3197_v63, 5  ;;  %v2788_v9 = vsel %vm4268_vm3, %v2783_v1, %v2787_v46  ;;  %v3203_v3 = vrot.slane %v3201_v7, 4  ;;  %v3209_v13 = vrot.slane %v3207_v4, 5  ;;  %v3996_v7 = vld [vmem:[%s4247_s7 + $0x6c] sm:$0xe] }
 0x13c   : > { %v1855_v16 = vshrl.u32 %v3780_v0, 16  ;;  %v2544_v19 = vsel %vm430_vm0, %v2530_v12, 0  ;;  %v2798_v21 = vsel %vm4268_vm3, %v2793_v8, %v2797_v57  ;;  %v2969_v14 = vunpack.c.l.b16 %v2788_v9 }
 0x13d   : > { %v3194_v22 = vor.u32 %v3193_v11, %v3190_v6  ;;  %2570 = vmatpush.bf16.xpose.msra.mxu3 %v2544_v19  ;;  %v2970_v26 = vunpack.c.l.b16 %v2798_v21  ;;  %v3204_v27 = vor.u32 %v3203_v3, %v3199_v17  ;;  %v1858_v30 = vshll.u32 %v3780_v0, 16 }
 0x13e   : > { %v1857_v50 = vrot.slane %v1855_v16, 4  ;;  %v1864_v31 = vshll.u32 %v3781_v20, 16  ;;  %v1868_v25 = vshrl.u32 %v3781_v20, 16  ;;  %v1874_v35 = vshll.u32 %v3797_v15, 16 }
 0x13f   : > { %v3195_v28 = vrot.slane %v3194_v22, 4  ;;  %v2978_v34 = vpack.c.b16 %v2970_v26, %v2969_v14  ;;  %v3205_v38 = vrot.slane %v3204_v27, 4  ;;  %v1860_v39 = vrot.slane %v1858_v30, 5  ;;  %v5019_v30 = vld [vmem:[%s4247_s7 + $0x58] sm:$0xf] }
 0x140   : > { %v2320_v42 = vshrl.u32 %v3892_v24, 16  ;;  %v1866_v45 = vrot.slane %v1864_v31, 5  ;;  %v1870_v32 = vrot.slane %v1868_v25, 4  ;;  %v1876_v51 = vrot.slane %v1874_v35, 5  ;;  %v5027_v25 = vld [vmem:[%s4247_s7 + $0x5c] sm:$0x1] }
 0x141   : > { %v3200_v43 = vsel %vm4268_vm3, %v3195_v28, %v3199_v17  ;;  %v3004_v44 = vsel %vm430_vm0, %v2978_v34, 0  ;;  %v3210_v47 = vsel %vm4268_vm3, %v3205_v38, %v3209_v13  ;;  %v1861_v48 = vor.u32 %v1860_v39, %v1857_v50  ;;  %v3937_v50 = vld [vmem:[%s4247_s7 + $0x54] sm:$0xf] }
 0x142   : > { %v3249_v36 = vunpack.c.l.b16 %v3200_v43  ;;  %3006 = vmatpush.bf16.xpose.msrb.mxu1 %v3004_v44  ;;  %v3250_v46 = vunpack.c.l.b16 %v3210_v47  ;;  %v1871_v55 = vor.u32 %v1870_v32, %v1866_v45  ;;  %v2322_v54 = vrot.slane %v2320_v42, 4  ;;  %v3978_v47 = vld [vmem:[%s4247_s7 + $0x54] sm:$0xf] }
 0x143   : > { %v2323_v53 = vshll.u32 %v3892_v24, 16  ;;  %v1862_v57 = vrot.slane %v1861_v48, 4  ;;  %v2329_v5 = vshll.u32 %v3893_v41, 16  ;;  %v2333_v10 = vshrl.u32 %v3893_v41, 16 }
 0x144   : > { %v2339_v2 = vshll.u32 %v3894_v40, 16  ;;  %v3259_v59 = vpack.c.b16 %v3250_v46, %v3249_v36  ;;  %v1872_v60 = vrot.slane %v1871_v55, 4  ;;  %v3959_v62 = vrot.slane %v3951_v49, 9  ;;  %v5036_v36 = vld [vmem:[%s4247_s7 + $0x58] sm:$0xf] }
 0x145   : > { %v2325_v61 = vrot.slane %v2323_v53, 5  ;;  %v1867_v63 = vsel %vm4268_vm3, %v1862_v57, %v1866_v45  ;;  %v2331_v0 = vrot.slane %v2329_v5, 5  ;;  %v2335_v1 = vrot.slane %v2333_v10, 4 }
 0x146   : > { %v2341_v6 = vrot.slane %v2339_v2, 5  ;;  %v3283_v4 = vsel %vm430_vm0, %v3259_v59, 0  ;;  %v1877_v12 = vsel %vm4268_vm3, %v1872_v60, %v1876_v51  ;;  %v2048_v8 = vunpack.c.l.b16 %v1867_v63  ;;  %v3950_v2 = vld [vmem:[%s4247_s7 + $0x54] sm:$0xe] }
 0x147   : > { %v2326_v11 = vor.u32 %v2325_v61, %v2322_v54  ;;  %3289 = vmatpush.bf16.xpose.msrb.mxu2 %v3283_v4  ;;  %v2049_v17 = vunpack.c.l.b16 %v1877_v12  ;;  %v2336_v20 = vor.u32 %v2335_v1, %v2331_v0  ;;  %v2884_v9 = vrot.slane %v4956_v56, 5  ;;  %v5039_v54 = vld [vmem:[%s4247_s7 + $0x5c] sm:$0x1] }
 0x148   : > { %v2887_v3 = vrot.slane %v4963_v33, 5  ;;  %v4004_v15 = vrot.slane %v3996_v7, 9  ;;  %v3385_v16 = vrot.slane %v4924_v18, 5  ;;  %v3388_v19 = vrot.slane %v4929_v23, 5 }
 0x149   : > { %v2327_v13 = vrot.slane %v2326_v11, 4  ;;  %v2064_v21 = vpack.c.b16 %v2049_v17, %v2048_v8  ;;  %v2337_v14 = vrot.slane %v2336_v20, 4  ;;  %v2885_v22 = vsel %vm4456_vm6, %v3959_v62, %v2884_v9  ;;  %v3995_v11 = vld [vmem:[%s4247_s7 + $0x60] sm:$0xe] }
 0x14a   : > { %v2886_v24 = vrot.slane %v2884_v9, 4  ;;  %v2905_v27 = vunpack.c.l.b16 %v2885_v22  ;;  %v3386_v56 = vsel %vm4456_vm6, %v4004_v15, %v3385_v16  ;;  %v3387_v33 = vrot.slane %v3385_v16, 4 }
 0x14b   : > { %v2332_v26 = vsel %vm4268_vm3, %v2327_v13, %v2331_v0  ;;  %v2076_v18 = vsel %vm430_vm0, %v2064_v21, 0  ;;  %v2342_v23 = vsel %vm4268_vm3, %v2337_v14, %v2341_v6  ;;  %v3406_v39 = vunpack.c.l.b16 %v3386_v56 }
 0x14c   : > { %v2513_v28 = vunpack.c.l.b16 %v2332_v26  ;;  %v2888_v31 = vsel %vm4456_vm6, %v2886_v24, %v2887_v3  ;;  %2106 = vmatpush.bf16.xpose.msra.mxu0 %v2076_v18  ;;  %v2514_v35 = vunpack.c.l.b16 %v2342_v23  ;;  %v3389_v38 = vsel %vm4456_vm6, %v3387_v33, %v3388_v19  ;;  %v3934_v26 = vld [vmem:[%s4247_s7 + $0x48] sm:$0xf] }
 0x14d   : > { %v2906_v34 = vunpack.c.l.b16 %v2888_v31  ;;  %v3407_v41 = vunpack.c.l.b16 %v3389_v38  ;;  %v2752_v42 = vshrl.u32 %v3937_v50, 16  ;;  %v2755_v43 = vshll.u32 %v3937_v50, 16 }
 0x14e   : > { %v2761_v45 = vshll.u32 %v5019_v30, 16  ;;  %v2529_v32 = vpack.c.b16 %v2514_v35, %v2513_v28  ;;  %v2765_v40 = vshrl.u32 %v5019_v30, 16  ;;  %v2771_v44 = vshll.u32 %v5027_v25, 16 }
 0x14f   : > { %v2914_v51 = vpack.c.b16 %v2906_v34, %v2905_v27  ;;  %v3415_v48 = vpack.c.b16 %v3407_v41, %v3406_v39  ;;  %v2754_v49 = vrot.slane %v2752_v42, 4  ;;  %v2757_v46 = vrot.slane %v2755_v43, 5  ;;  %v5065_v34 = vld [vmem:[%s4247_s7 + $0x4c] sm:$0xf] }
 0x150   : > { %v2763_v55 = vrot.slane %v2761_v45, 5  ;;  %v2541_v53 = vsel %vm430_vm0, %v2529_v32, 0  ;;  %v2767_v5 = vrot.slane %v2765_v40, 4  ;;  %v2773_v10 = vrot.slane %v2771_v44, 5 }
 0x151   : > { %v2940_v57 = vsel %vm430_vm0, %v2914_v51, 0  ;;  %2571 = vmatpush.bf16.xpose.msra.mxu3 %v2541_v53  ;;  %v3441_v59 = vsel %vm430_vm0, %v3415_v48, 0  ;;  %v2758_v60 = vor.u32 %v2757_v46, %v2754_v49  ;;  %v3164_v61 = vshrl.u32 %v3978_v47, 16  ;;  %v3975_v49 = vld [vmem:[%s4247_s7 + $0x48] sm:$0xf] }
 0x152   : > { %v3167_v62 = vshll.u32 %v3978_v47, 16  ;;  %v2768_v63 = vor.u32 %v2767_v5, %v2763_v55  ;;  %v3173_v0 = vshll.u32 %v5036_v36, 16  ;;  %v3177_v1 = vshrl.u32 %v5036_v36, 16  ;;  %v5082_v5 = vld [vmem:[%s4247_s7 + $0x4c] sm:$0xf] }
 0x153   : > { %v3183_v6 = vshll.u32 %v5039_v54, 16  ;;  %v2759_v7 = vrot.slane %v2758_v60, 4  ;;  %v3166_v4 = vrot.slane %v3164_v61, 4  ;;  %v3958_v8 = vrot.slane %v3950_v2, 9  ;;  %v5086_v61 = vld [vmem:[%s4247_s7 + $0x50] sm:$0x1] }
 0x154   : > { %2942 = vmatpush.bf16.xpose.msrb.mxu0 %v2940_v57  ;;  %v3169_v12 = vrot.slane %v3167_v62, 5  ;;  %v2769_v17 = vrot.slane %v2768_v63, 4  ;;  %v3175_v20 = vrot.slane %v3173_v0, 5  ;;  %v3179_v9 = vrot.slane %v3177_v1, 4 }
 0x155   : > { %v3185_v3 = vrot.slane %v3183_v6, 5  ;;  %v2764_v13 = vsel %vm4268_vm3, %v2759_v7, %v2763_v55  ;;  %v2877_v16 = vrot.slane %v5019_v30, 5  ;;  %v2880_v19 = vrot.slane %v5027_v25, 5 }
 0x156   : > { %v3170_v15 = vor.u32 %v3169_v12, %v3166_v4  ;;  %v2774_v21 = vsel %vm4268_vm3, %v2769_v17, %v2773_v10  ;;  %v2967_v14 = vunpack.c.l.b16 %v2764_v13  ;;  %v3180_v22 = vor.u32 %v3179_v9, %v3175_v20 }
 0x157   : > { %v4003_v24 = vrot.slane %v3995_v11, 9  ;;  %v2968_v27 = vunpack.c.l.b16 %v2774_v21  ;;  %v2878_v33 = vsel %vm4456_vm6, %v3958_v8, %v2877_v16  ;;  %v2879_v50 = vrot.slane %v2877_v16, 4  ;;  %v3949_v8 = vld [vmem:[%s4247_s7 + $0x48] sm:$0xe] }
 0x158   : > { %v3171_v56 = vrot.slane %v3170_v15, 4  ;;  %v3181_v18 = vrot.slane %v3180_v22, 4  ;;  %v2903_v23 = vunpack.c.l.b16 %v2878_v33  ;;  %v3378_v30 = vrot.slane %v4971_v52, 5 }
 0x159   : > { %3443 = vmatpush.bf16.xpose.msrb.mxu3 %v3441_v59  ;;  %v3381_v28 = vrot.slane %v4977_v58, 5  ;;  %v2977_v31 = vpack.c.b16 %v2968_v27, %v2967_v14  ;;  %v2881_v35 = vsel %vm4456_vm6, %v2879_v50, %v2880_v19  ;;  %v2728_v38 = vshrl.u32 %v3934_v26, 16  ;;  %v5072_v58 = vld [vmem:[%s4247_s7 + $0x50] sm:$0x1]  ;;  %v3994_v19 = vld [vmem:[%s4247_s7 + $0x54] sm:$0xe] }
 0x15a   : > { %v3176_v25 = vsel %vm4268_vm3, %v3171_v56, %v3175_v20  ;;  %v3186_v39 = vsel %vm4268_vm3, %v3181_v18, %v3185_v3  ;;  %v2904_v42 = vunpack.c.l.b16 %v2881_v35  ;;  %v3379_v52 = vsel %vm4456_vm6, %v4003_v24, %v3378_v30 }
 0x15b   : > { %v3247_v41 = vunpack.c.l.b16 %v3176_v25  ;;  %v3001_v43 = vsel %vm430_vm0, %v2977_v31, 0  ;;  %v3248_v45 = vunpack.c.l.b16 %v3186_v39  ;;  %v3380_v32 = vrot.slane %v3378_v30, 4 }
 0x15c   : > { %v3404_v51 = vunpack.c.l.b16 %v3379_v52  ;;  %3007 = vmatpush.bf16.xpose.msrb.mxu1 %v3001_v43  ;;  %v2913_v40 = vpack.c.b16 %v2904_v42, %v2903_v23  ;;  %v2730_v44 = vrot.slane %v2728_v38, 4  ;;  %v2731_v47 = vshll.u32 %v3934_v26, 16 }
 0x15d   : > { %v2737_v48 = vshll.u32 %v5065_v34, 16  ;;  %v3258_v46 = vpack.c.b16 %v3248_v45, %v3247_v41  ;;  %v3382_v55 = vsel %vm4456_vm6, %v3380_v32, %v3381_v28  ;;  %v2741_v53 = vshrl.u32 %v5065_v34, 16  ;;  %v3931_v28 = vld [vmem:[%s4247_s7 + $0x3c] sm:$0xf]  ;;  %v5111_v45 = vld [vmem:[%s4247_s7 + $0x40] sm:$0xf] }
 0x15e   : > { %v2747_v57 = vshll.u32 %v5072_v58, 16  ;;  %v2937_v10 = vsel %vm430_vm0, %v2913_v40, 0  ;;  %v3405_v2 = vunpack.c.l.b16 %v3382_v55  ;;  %v2733_v59 = vrot.slane %v2731_v47, 5 }
 0x15f   : > { %v2739_v60 = vrot.slane %v2737_v48, 5  ;;  %v3280_v62 = vsel %vm430_vm0, %v3258_v46, 0  ;;  %2943 = vmatpush.bf16.xpose.msrb.mxu0 %v2937_v10  ;;  %v2743_v63 = vrot.slane %v2741_v53, 4  ;;  %v3140_v1 = vshrl.u32 %v3975_v49, 16 }
 0x160   : > { %v2749_v0 = vrot.slane %v2747_v57, 5  ;;  %3290 = vmatpush.bf16.xpose.msrb.mxu2 %v3280_v62  ;;  %v3414_v6 = vpack.c.b16 %v3405_v2, %v3404_v51  ;;  %v2734_v7 = vor.u32 %v2733_v59, %v2730_v44  ;;  %v3143_v4 = vshll.u32 %v3975_v49, 16  ;;  %v3972_v2 = vld [vmem:[%s4247_s7 + $0x3c] sm:$0xf] }
 0x161   : > { %v3149_v12 = vshll.u32 %v5082_v5, 16  ;;  %v2744_v11 = vor.u32 %v2743_v63, %v2739_v60  ;;  %v3142_v17 = vrot.slane %v3140_v1, 4  ;;  %v3153_v20 = vshrl.u32 %v5082_v5, 16 }
 0x162   : > { %v3159_v9 = vshll.u32 %v5086_v61, 16  ;;  %v3438_v3 = vsel %vm430_vm0, %v3414_v6, 0  ;;  %v2735_v13 = vrot.slane %v2734_v7, 4  ;;  %v3145_v15 = vrot.slane %v3143_v4, 5 }
 0x163   : > { %v3151_v16 = vrot.slane %v3149_v12, 5  ;;  %3444 = vmatpush.bf16.xpose.msrb.mxu3 %v3438_v3  ;;  %v2745_v21 = vrot.slane %v2744_v11, 4  ;;  %v3155_v14 = vrot.slane %v3153_v20, 4  ;;  %v3957_v24 = vrot.slane %v3949_v8, 9  ;;  %v5132_v12 = vld [vmem:[%s4247_s7 + $0x44] sm:$0x1] }
 0x164   : > { %v3161_v22 = vrot.slane %v3159_v9, 5  ;;  %v2740_v26 = vsel %vm4268_vm3, %v2735_v13, %v2739_v60  ;;  %v3146_v27 = vor.u32 %v3145_v15, %v3142_v17  ;;  %v2870_v56 = vrot.slane %v5065_v34, 5 }
 0x165   : > { %v2873_v33 = vrot.slane %v5072_v58, 5  ;;  %v2750_v50 = vsel %vm4268_vm3, %v2745_v21, %v2749_v0  ;;  %v2965_v18 = vunpack.c.l.b16 %v2740_v26  ;;  %v3156_v23 = vor.u32 %v3155_v14, %v3151_v16  ;;  %v5128_v0 = vld [vmem:[%s4247_s7 + $0x40] sm:$0xf] }
 0x166   : > { %v4002_v30 = vrot.slane %v3994_v19, 9  ;;  %v2966_v31 = vunpack.c.l.b16 %v2750_v50  ;;  %v3147_v25 = vrot.slane %v3146_v27, 4  ;;  %v2871_v35 = vsel %vm4456_vm6, %v3957_v24, %v2870_v56 }
 0x167   : > { %v2872_v38 = vrot.slane %v2870_v56, 4  ;;  %v3157_v39 = vrot.slane %v3156_v23, 4  ;;  %v2901_v41 = vunpack.c.l.b16 %v2871_v35  ;;  %v3371_v34 = vrot.slane %v5036_v36, 5 }
 0x168   : > { %v3374_v42 = vrot.slane %v5039_v54, 5  ;;  %v2976_v52 = vpack.c.b16 %v2966_v31, %v2965_v18  ;;  %v3152_v58 = vsel %vm4268_vm3, %v3147_v25, %v3151_v16  ;;  %v2704_v32 = vshrl.u32 %v3931_v28, 16  ;;  %v5118_v54 = vld [vmem:[%s4247_s7 + $0x44] sm:$0x1]  ;;  %v3948_v16 = vld [vmem:[%s4247_s7 + $0x3c] sm:$0xe] }
 0x169   : > { %v2874_v43 = vsel %vm4456_vm6, %v2872_v38, %v2873_v33  ;;  %v3162_v51 = vsel %vm4268_vm3, %v3157_v39, %v3161_v22  ;;  %v3245_v40 = vunpack.c.l.b16 %v3152_v58  ;;  %v3372_v36 = vsel %vm4456_vm6, %v4002_v30, %v3371_v34  ;;  %v3993_v33 = vld [vmem:[%s4247_s7 + $0x48] sm:$0xe] }
 0x16a   : > { %v2902_v44 = vunpack.c.l.b16 %v2874_v43  ;;  %v2998_v47 = vsel %vm430_vm0, %v2976_v52, 0  ;;  %v3246_v48 = vunpack.c.l.b16 %v3162_v51  ;;  %v3373_v49 = vrot.slane %v3371_v34, 4 }
 0x16b   : > { %v3402_v46 = vunpack.c.l.b16 %v3372_v36  ;;  %3008 = vmatpush.bf16.xpose.msrb.mxu1 %v2998_v47  ;;  %v2706_v53 = vrot.slane %v2704_v32, 4  ;;  %v2707_v57 = vshll.u32 %v3931_v28, 16  ;;  %v2713_v10 = vshll.u32 %v5111_v45, 16 }
 0x16c   : > { %v2912_v55 = vpack.c.b16 %v2902_v44, %v2901_v41  ;;  %v3257_v59 = vpack.c.b16 %v3246_v48, %v3245_v40  ;;  %v3375_v60 = vsel %vm4456_vm6, %v3373_v49, %v3374_v42  ;;  %v2717_v62 = vshrl.u32 %v5111_v45, 16  ;;  %v3928_v42 = vld [vmem:[%s4247_s7 + $0x30] sm:$0xf]  ;;  %v5157_v48 = vld [vmem:[%s4247_s7 + $0x34] sm:$0xf] }
 0x16d   : > { %v2723_v63 = vshll.u32 %v5118_v54, 16  ;;  %v3403_v6 = vunpack.c.l.b16 %v3375_v60  ;;  %v2709_v7 = vrot.slane %v2707_v57, 5  ;;  %v2715_v4 = vrot.slane %v2713_v10, 5  ;;  %v3858_v57 = vld [vmem:[%s5409_s1 + $0x28] sm:$0xf] }
 0x16e   : > { %v2934_v1 = vsel %vm430_vm0, %v2912_v55, 0  ;;  %v3277_v8 = vsel %vm430_vm0, %v3257_v59, 0  ;;  %v2719_v11 = vrot.slane %v2717_v62, 4  ;;  %v3116_v20 = vshrl.u32 %v3972_v2, 16  ;;  %3891 = vmatmul.msk.bf16.vlgmr.msra.gmra.mxu2 %vm430_vm0, %v3858_v57 }
 0x16f   : > { %2944 = vmatpush.bf16.xpose.msrb.mxu0 %v2934_v1  ;;  %v2725_v17 = vrot.slane %v2723_v63, 5  ;;  %3291 = vmatpush.bf16.xpose.msrb.mxu2 %v3277_v8  ;;  %v3413_v9 = vpack.c.b16 %v3403_v6, %v3402_v46  ;;  %v2710_v3 = vor.u32 %v2709_v7, %v2706_v53  ;;  %v3119_v13 = vshll.u32 %v3972_v2, 16  ;;  %v3969_v7 = vld [vmem:[%s4247_s7 + $0x30] sm:$0xf] }
 0x170   : > { %v3125_v15 = vshll.u32 %v5128_v0, 16  ;;  %v2720_v19 = vor.u32 %v2719_v11, %v2715_v4  ;;  %v3118_v21 = vrot.slane %v3116_v20, 4  ;;  %v3129_v14 = vshrl.u32 %v5128_v0, 16  ;;  %v5178_v20 = vld [vmem:[%s4247_s7 + $0x34] sm:$0xf] }
 0x171   : > { %v3135_v22 = vshll.u32 %v5132_v12, 16  ;;  %v3435_v24 = vsel %vm430_vm0, %v3413_v9, 0  ;;  %v2711_v26 = vrot.slane %v2710_v3, 4  ;;  %v3121_v27 = vrot.slane %v3119_v13, 5  ;;  %v5181_v9 = vld [vmem:[%s4247_s7 + $0x38] sm:$0x1] }
 0x172   : > { %v3127_v56 = vrot.slane %v3125_v15, 5  ;;  %3445 = vmatpush.bf16.xpose.msrb.mxu3 %v3435_v24  ;;  %v2721_v50 = vrot.slane %v2720_v19, 4  ;;  %v3131_v18 = vrot.slane %v3129_v14, 4  ;;  %v3956_v30 = vrot.slane %v3948_v16, 9  ;;  %v3916_v19 = vld [vmem:[%s5409_s1 + $0x2c] sm:$0xf] }
 0x173   : > { %v3137_v23 = vrot.slane %v3135_v22, 5  ;;  %v2716_v28 = vsel %vm4268_vm3, %v2711_v26, %v2715_v4  ;;  %v3122_v31 = vor.u32 %v3121_v27, %v3118_v21  ;;  %v2863_v25 = vrot.slane %v5111_v45, 5  ;;  %3917 = vmatmul.msk.bf16.vlgmr.msra.gmra.mxu3 %vm430_vm0, %v3916_v19  ;;  %v3966_v19 = vld [vmem:[%s4247_s7 + $0x24] sm:$0xf] }
 0x174   : > { %v2866_v35 = vrot.slane %v5118_v54, 5  ;;  %v2726_v38 = vsel %vm4268_vm3, %v2721_v50, %v2725_v17  ;;  %v2963_v39 = vunpack.c.l.b16 %v2716_v28  ;;  %v3132_v41 = vor.u32 %v3131_v18, %v3127_v56  ;;  %v3947_v50 = vld [vmem:[%s4247_s7 + $0x30] sm:$0xe]  ;;  %v3992_v18 = vld [vmem:[%s4247_s7 + $0x3c] sm:$0xe] }
 0x175   : > { %v4001_v34 = vrot.slane %v3993_v33, 9  ;;  %v2964_v52 = vunpack.c.l.b16 %v2726_v38  ;;  %v3123_v58 = vrot.slane %v3122_v31, 4  ;;  %v2864_v43 = vsel %vm4456_vm6, %v3956_v30, %v2863_v25 }
 0x176   : > { %v2865_v32 = vrot.slane %v2863_v25, 4  ;;  %v3133_v51 = vrot.slane %v3132_v41, 4  ;;  %v2899_v40 = vunpack.c.l.b16 %v2864_v43  ;;  %v3364_v45 = vrot.slane %v5082_v5, 5  ;;  %v3805_v25 = vld [vmem:[%s5409_s1 + $0x24] sm:$0xf] }
 0x177   : > { %v3367_v44 = vrot.slane %v5086_v61, 5  ;;  %v2975_v36 = vpack.c.b16 %v2964_v52, %v2963_v39  ;;  %v3128_v54 = vsel %vm4268_vm3, %v3123_v58, %v3127_v56  ;;  %v2680_v49 = vshrl.u32 %v3928_v42, 16  ;;  %v5164_v61 = vld [vmem:[%s4247_s7 + $0x38] sm:$0x1]  ;;  %3806 = vmatmul.msk.bf16.vlgmr.msra.gmra.mxu0 %vm430_vm0, %v3805_v25 }
 0x178   : > { %v2867_v47 = vsel %vm4456_vm6, %v2865_v32, %v2866_v35  ;;  %v3138_v46 = vsel %vm4268_vm3, %v3133_v51, %v3137_v23  ;;  %v3243_v55 = vunpack.c.l.b16 %v3128_v54  ;;  %v3365_v5 = vsel %vm4456_vm6, %v4001_v34, %v3364_v45  ;;  %v3796_v34 = vld [vmem:[%s5409_s1 + $0x20] sm:$0xf] }
 0x179   : > { %v2900_v53 = vunpack.c.l.b16 %v2867_v47  ;;  %v2995_v10 = vsel %vm430_vm0, %v2975_v36, 0  ;;  %v3244_v2 = vunpack.c.l.b16 %v3138_v46  ;;  %v3366_v59 = vrot.slane %v3364_v45, 4  ;;  %3839 = vmatmul.msk.bf16.vlgmr.msra.gmra.mxu1 %vm430_vm0, %v3796_v34 }
 0x17a   : > { %v3400_v60 = vunpack.c.l.b16 %v3365_v5  ;;  %3009 = vmatpush.bf16.xpose.msrb.mxu1 %v2995_v10  ;;  %v2682_v63 = vrot.slane %v2680_v49, 4  ;;  %v2683_v1 = vshll.u32 %v3928_v42, 16  ;;  %v2689_v6 = vshll.u32 %v5157_v48, 16  ;;  %v3925_v49 = vld [vmem:[%s4247_s7 + $0x24] sm:$0xf] }
 0x17b   : > { %v2911_v62 = vpack.c.b16 %v2900_v53, %v2899_v40  ;;  %v3256_v4 = vpack.c.b16 %v3244_v2, %v3243_v55  ;;  %v3368_v8 = vsel %vm4456_vm6, %v3366_v59, %v3367_v44  ;;  %v2693_v11 = vshrl.u32 %v5157_v48, 16 }
 0x17c   : > { %v2699_v17 = vshll.u32 %v5164_v61, 16  ;;  %v3401_v13 = vunpack.c.l.b16 %v3368_v8  ;;  %v2685_v15 = vrot.slane %v2683_v1, 5  ;;  %v2691_v16 = vrot.slane %v2689_v6, 5 }
 0x17d   : > { %v2931_v3 = vsel %vm430_vm0, %v2911_v62, 0  ;;  %v3274_v21 = vsel %vm430_vm0, %v3256_v4, 0  ;;  %v2695_v14 = vrot.slane %v2693_v11, 4  ;;  %v3092_v24 = vshrl.u32 %v3969_v7, 16  ;;  %v5219_v62 = vld [vmem:[%s4247_s7 + $0x28] sm:$0xf] }
 0x17e   : > { %2945 = vmatpush.bf16.xpose.msrb.mxu0 %v2931_v3  ;;  %v2701_v22 = vrot.slane %v2699_v17, 5  ;;  %3292 = vmatpush.bf16.xpose.msrb.mxu2 %v3274_v21  ;;  %v3412_v26 = vpack.c.b16 %v3401_v13, %v3400_v60  ;;  %v2686_v27 = vor.u32 %v2685_v15, %v2682_v63  ;;  %v3095_v56 = vshll.u32 %v3969_v7, 16 }
 0x17f   : > { %v3101_v33 = vshll.u32 %v5178_v20, 16  ;;  %v2696_v23 = vor.u32 %v2695_v14, %v2691_v16  ;;  %v3094_v30 = vrot.slane %v3092_v24, 4  ;;  %v3105_v28 = vshrl.u32 %v5178_v20, 16 }
 0x180   : > { %v3111_v31 = vshll.u32 %v5181_v9, 16  ;;  %v3432_v35 = vsel %vm430_vm0, %v3412_v26, 0  ;;  %v2687_v38 = vrot.slane %v2686_v27, 4  ;;  %v3097_v39 = vrot.slane %v3095_v56, 5  ;;  %v5236_v26 = vld [vmem:[%s4247_s7 + $0x28] sm:$0xf] }
 0x181   : > { %v3103_v41 = vrot.slane %v3101_v33, 5  ;;  %3446 = vmatpush.bf16.xpose.msrb.mxu3 %v3432_v35  ;;  %v2697_v42 = vrot.slane %v2696_v23, 4  ;;  %v3107_v52 = vrot.slane %v3105_v28, 4  ;;  %v3955_v43 = vrot.slane %v3947_v50, 9 }
 0x182   : > { %v3113_v58 = vrot.slane %v3111_v31, 5  ;;  %v2692_v32 = vsel %vm4268_vm3, %v2687_v38, %v2691_v16  ;;  %v3098_v51 = vor.u32 %v3097_v39, %v3094_v30  ;;  %v2856_v40 = vrot.slane %v5157_v48, 5 }
 0x183   : > { %v2859_v45 = vrot.slane %v5164_v61, 5  ;;  %v2702_v44 = vsel %vm4268_vm3, %v2697_v42, %v2701_v22  ;;  %v2961_v36 = vunpack.c.l.b16 %v2692_v32  ;;  %v3108_v54 = vor.u32 %v3107_v52, %v3103_v41 }
 0x184   : > { %v4000_v47 = vrot.slane %v3992_v18, 9  ;;  %v2962_v46 = vunpack.c.l.b16 %v2702_v44  ;;  %v3099_v55 = vrot.slane %v3098_v51, 4  ;;  %v2857_v53 = vsel %vm4456_vm6, %v3955_v43, %v2856_v40  ;;  %v5240_v18 = vld [vmem:[%s4247_s7 + $0x2c] sm:$0x1] }
 0x185   : > { %v2858_v5 = vrot.slane %v2856_v40, 4  ;;  %v3109_v57 = vrot.slane %v3108_v54, 4  ;;  %v2897_v10 = vunpack.c.l.b16 %v2857_v53  ;;  %v3357_v48 = vrot.slane %v5128_v0, 5 }
 0x186   : > { %v3360_v61 = vrot.slane %v5132_v12, 5  ;;  %v2974_v2 = vpack.c.b16 %v2962_v46, %v2961_v36  ;;  %v3104_v59 = vsel %vm4268_vm3, %v3099_v55, %v3103_v41  ;;  %v2656_v63 = vshrl.u32 %v3925_v49, 16  ;;  %v5226_v12 = vld [vmem:[%s4247_s7 + $0x2c] sm:$0x1]  ;;  %v3946_v41 = vld [vmem:[%s4247_s7 + $0x24] sm:$0xe] }
 0x187   : > { %v2860_v60 = vsel %vm4456_vm6, %v2858_v5, %v2859_v45  ;;  %v3114_v1 = vsel %vm4268_vm3, %v3109_v57, %v3113_v58  ;;  %v3241_v6 = vunpack.c.l.b16 %v3104_v59  ;;  %v3358_v0 = vsel %vm4456_vm6, %v4000_v47, %v3357_v48  ;;  %v3991_v45 = vld [vmem:[%s4247_s7 + $0x30] sm:$0xe] }
 0x188   : > { %v2898_v7 = vunpack.c.l.b16 %v2860_v60  ;;  %v2992_v4 = vsel %vm430_vm0, %v2974_v2, 0  ;;  %v3242_v8 = vunpack.c.l.b16 %v3114_v1  ;;  %v3359_v11 = vrot.slane %v3357_v48, 4 }
 0x189   : > { %v3398_v17 = vunpack.c.l.b16 %v3358_v0  ;;  %3010 = vmatpush.bf16.xpose.msrb.mxu1 %v2992_v4  ;;  %v2658_v13 = vrot.slane %v2656_v63, 4  ;;  %v2659_v15 = vshll.u32 %v3925_v49, 16  ;;  %v2665_v16 = vshll.u32 %v5219_v62, 16 }
 0x18a   : > { %v2910_v3 = vpack.c.b16 %v2898_v7, %v2897_v10  ;;  %v3255_v21 = vpack.c.b16 %v3242_v8, %v3241_v6  ;;  %v3361_v14 = vsel %vm4456_vm6, %v3359_v11, %v3360_v61  ;;  %v2669_v22 = vshrl.u32 %v5219_v62, 16  ;;  %v3922_v61 = vld [vmem:[%s4247_s7 + $0x18] sm:$0xf]  ;;  %v5265_v8 = vld [vmem:[%s4247_s7 + $0x1c] sm:$0xf] }
 0x18b   : > { %v2675_v24 = vshll.u32 %v5226_v12, 16  ;;  %v3399_v56 = vunpack.c.l.b16 %v3361_v14  ;;  %v2661_v33 = vrot.slane %v2659_v15, 5  ;;  %v2667_v50 = vrot.slane %v2665_v16, 5 }
 0x18c   : > { %v2928_v27 = vsel %vm430_vm0, %v2910_v3, 0  ;;  %v3271_v23 = vsel %vm430_vm0, %v3255_v21, 0  ;;  %v2671_v30 = vrot.slane %v2669_v22, 4  ;;  %v3068_v31 = vshrl.u32 %v3966_v19, 16 }
 0x18d   : > { %2946 = vmatpush.bf16.xpose.msrb.mxu0 %v2928_v27  ;;  %v2677_v28 = vrot.slane %v2675_v24, 5  ;;  %3293 = vmatpush.bf16.xpose.msrb.mxu2 %v3271_v23  ;;  %v3411_v25 = vpack.c.b16 %v3399_v56, %v3398_v17  ;;  %v2662_v35 = vor.u32 %v2661_v33, %v2658_v13  ;;  %v3071_v38 = vshll.u32 %v3966_v19, 16  ;;  %v3963_v56 = vld [vmem:[%s4247_s7 + $0x18] sm:$0xf] }
 0x18e   : > { %v3077_v39 = vshll.u32 %v5236_v26, 16  ;;  %v2672_v34 = vor.u32 %v2671_v30, %v2667_v50  ;;  %v3070_v42 = vrot.slane %v3068_v31, 4  ;;  %v3081_v52 = vshrl.u32 %v5236_v26, 16 }
 0x18f   : > { %v3087_v58 = vshll.u32 %v5240_v18, 16  ;;  %v3429_v43 = vsel %vm430_vm0, %v3411_v25, 0  ;;  %v2663_v32 = vrot.slane %v2662_v35, 4  ;;  %v3073_v51 = vrot.slane %v3071_v38, 5 }
 0x190   : > { %v3079_v40 = vrot.slane %v3077_v39, 5  ;;  %3447 = vmatpush.bf16.xpose.msrb.mxu3 %v3429_v43  ;;  %v2673_v44 = vrot.slane %v2672_v34, 4  ;;  %v3083_v36 = vrot.slane %v3081_v52, 4  ;;  %v3954_v47 = vrot.slane %v3946_v41, 9  ;;  %v5286_v39 = vld [vmem:[%s4247_s7 + $0x20] sm:$0x1] }
 0x191   : > { %v3089_v54 = vrot.slane %v3087_v58, 5  ;;  %v2668_v49 = vsel %vm4268_vm3, %v2663_v32, %v2667_v50  ;;  %v3074_v46 = vor.u32 %v3073_v51, %v3070_v42  ;;  %v2849_v55 = vrot.slane %v5219_v62, 5 }
 0x192   : > { %v2852_v53 = vrot.slane %v5226_v12, 5  ;;  %v2678_v5 = vsel %vm4268_vm3, %v2673_v44, %v2677_v28  ;;  %v2959_v57 = vunpack.c.l.b16 %v2668_v49  ;;  %v3084_v10 = vor.u32 %v3083_v36, %v3079_v40  ;;  %v5282_v28 = vld [vmem:[%s4247_s7 + $0x1c] sm:$0xf]  ;;  %v5295_v49 = vpop.f32.mrf.mxu1 }
 0x193   : > { %v3999_v48 = vrot.slane %v3991_v45, 9  ;;  %v2960_v2 = vunpack.c.l.b16 %v2678_v5  ;;  %v3075_v59 = vrot.slane %v3074_v46, 4  ;;  %v2850_v60 = vsel %vm4456_vm6, %v3954_v47, %v2849_v55  ;;  %v5293_v47 = vpop.f32.mrf.mxu0 }
 0x194   : > { %v2851_v63 = vrot.slane %v2849_v55, 4  ;;  %v3085_v1 = vrot.slane %v3084_v10, 4  ;;  %v2895_v6 = vunpack.c.l.b16 %v2850_v60  ;;  %v3350_v62 = vrot.slane %v5178_v20, 5  ;;  %v5299_v10 = vpop.f32.mrf.mxu2 }
 0x195   : > { %v3353_v7 = vrot.slane %v5181_v9, 5  ;;  %v2973_v0 = vpack.c.b16 %v2960_v2, %v2959_v57  ;;  %v3080_v12 = vsel %vm4268_vm3, %v3075_v59, %v3079_v40  ;;  %v2632_v11 = vshrl.u32 %v3922_v61, 16  ;;  %v5272_v9 = vld [vmem:[%s4247_s7 + $0x20] sm:$0x1]  ;;  %v3945_v40 = vld [vmem:[%s4247_s7 + $0x18] sm:$0xe] }
 0x196   : > { %v2853_v4 = vsel %vm4456_vm6, %v2851_v63, %v2852_v53  ;;  %v3090_v17 = vsel %vm4268_vm3, %v3085_v1, %v3089_v54  ;;  %v3239_v3 = vunpack.c.l.b16 %v3080_v12  ;;  %v3351_v20 = vsel %vm4456_vm6, %v3999_v48, %v3350_v62  ;;  %v3990_v57 = vld [vmem:[%s4247_s7 + $0x24] sm:$0xe]  ;;  %v5301_v48 = vpop.f32.mrf.mxu3 }
 0x197   : > { %v2896_v13 = vunpack.c.l.b16 %v2853_v4  ;;  %v2989_v15 = vsel %vm430_vm0, %v2973_v0, 0  ;;  %v3240_v16 = vunpack.c.l.b16 %v3090_v17  ;;  %v3352_v19 = vrot.slane %v3350_v62, 4 }
 0x198   : > { %v3396_v21 = vunpack.c.l.b16 %v3351_v20  ;;  %3011 = vmatpush.bf16.xpose.msrb.mxu1 %v2989_v15  ;;  %v2634_v22 = vrot.slane %v2632_v11, 4  ;;  %v2635_v24 = vshll.u32 %v3922_v61, 16  ;;  %v2641_v27 = vshll.u32 %v5265_v8, 16  ;;  %v3919_v11 = vld [vmem:[%s4247_s7 + $0xc] sm:$0xf] }
 0x199   : > { %v2909_v14 = vpack.c.b16 %v2896_v13, %v2895_v6  ;;  %v3254_v33 = vpack.c.b16 %v3240_v16, %v3239_v3  ;;  %v3354_v50 = vsel %vm4456_vm6, %v3352_v19, %v3353_v7  ;;  %v2645_v23 = vshrl.u32 %v5265_v8, 16 }
 0x19a   : > { %v2651_v30 = vshll.u32 %v5272_v9, 16  ;;  %v3397_v25 = vunpack.c.l.b16 %v3354_v50  ;;  %v2637_v35 = vrot.slane %v2635_v24, 5  ;;  %v2643_v38 = vrot.slane %v2641_v27, 5  ;;  %v3921_v50 = vld [vmem:[%s4247_s7 + $0x14] sm:$0x1] }
 0x19b   : > { %v2925_v31 = vsel %vm430_vm0, %v2909_v14, 0  ;;  %v3268_v41 = vsel %vm430_vm0, %v3254_v33, 0  ;;  %v2647_v34 = vrot.slane %v2645_v23, 4  ;;  %v3044_v52 = vshrl.u32 %v3963_v56, 16  ;;  %v549_v23 = vpop.f32.mrf.mxu1 }
 0x19c   : > { %2947 = vmatpush.bf16.xpose.msrb.mxu0 %v2925_v31  ;;  %v2653_v42 = vrot.slane %v2651_v30, 5  ;;  %3294 = vmatpush.bf16.xpose.msrb.mxu2 %v3268_v41  ;;  %v3410_v58 = vpack.c.b16 %v3397_v25, %v3396_v21  ;;  %v2638_v43 = vor.u32 %v2637_v35, %v2634_v22  ;;  %v3047_v32 = vshll.u32 %v3963_v56, 16  ;;  %v3920_v22 = vld [vmem:[%s4247_s7 + $0x10] sm:$0xf] }
 0x19d   : > { %v3053_v51 = vshll.u32 %v5282_v28, 16  ;;  %v2648_v45 = vor.u32 %v2647_v34, %v2643_v38  ;;  %v3046_v44 = vrot.slane %v3044_v52, 4  ;;  %v3057_v36 = vshrl.u32 %v5282_v28, 16 }
 0x19e   : > { %v3063_v54 = vshll.u32 %v5286_v39, 16  ;;  %v3426_v46 = vsel %vm430_vm0, %v3410_v58, 0  ;;  %v2639_v55 = vrot.slane %v2638_v43, 4  ;;  %v3049_v53 = vrot.slane %v3047_v32, 5  ;;  %v934_v41 = vpop.f32.mrf.mxu3  ;;  %v3944_v43 = vld [vmem:[%s4247_s7 + $0xc] sm:$0xe] }
 0x19f   : > { %v3055_v5 = vrot.slane %v3053_v51, 5  ;;  %3448 = vmatpush.bf16.xpose.msrb.mxu3 %v3426_v46  ;;  %v2649_v61 = vrot.slane %v2648_v45, 4  ;;  %v3059_v2 = vrot.slane %v3057_v36, 4  ;;  %v3953_v60 = vrot.slane %v3945_v40, 9 }
 0x1a0   : > { %v3065_v59 = vrot.slane %v3063_v54, 5  ;;  %v2644_v63 = vsel %vm4268_vm3, %v2639_v55, %v2643_v38  ;;  %v3050_v1 = vor.u32 %v3049_v53, %v3046_v44  ;;  %v2842_v6 = vrot.slane %v5265_v8, 5  ;;  %v651_v38 = vpop.f32.mrf.mxu2  ;;  %v3989_v55 = vld [vmem:[%s4247_s7 + $0x18] sm:$0xe] }
 0x1a1   : > { %v2845_v62 = vrot.slane %v5272_v9, 5  ;;  %v2654_v7 = vsel %vm4268_vm3, %v2649_v61, %v2653_v42  ;;  %v2957_v0 = vunpack.c.l.b16 %v2644_v63  ;;  %v3060_v12 = vor.u32 %v3059_v2, %v3055_v5 }
 0x1a2   : > { %v3998_v4 = vrot.slane %v3990_v57, 9  ;;  %v2958_v17 = vunpack.c.l.b16 %v2654_v7  ;;  %v3051_v3 = vrot.slane %v3050_v1, 4  ;;  %v2843_v13 = vsel %vm4456_vm6, %v3953_v60, %v2842_v6 }
 0x1a3   : > { %v2844_v20 = vrot.slane %v2842_v6, 4  ;;  %v3061_v15 = vrot.slane %v3060_v12, 4  ;;  %v2893_v16 = vunpack.c.l.b16 %v2843_v13  ;;  %v3343_v8 = vrot.slane %v5236_v26, 5 }
 0x1a4   : > { %v3346_v9 = vrot.slane %v5240_v18, 5  ;;  %v2972_v19 = vpack.c.b16 %v2958_v17, %v2957_v0  ;;  %v3056_v21 = vsel %vm4268_vm3, %v3051_v3, %v3055_v5  ;;  %v2608_v24 = vshrl.u32 %v3919_v11, 16  ;;  %v469_v18 = vpop.f32.mrf.mxu0  ;;  %v1381_v3 = vpop.f32.mrf.mxu1 }
 0x1a5   : > { %v2846_v14 = vsel %vm4456_vm6, %v2844_v20, %v2845_v62  ;;  %v3066_v27 = vsel %vm4268_vm3, %v3061_v15, %v3065_v59  ;;  %v3237_v56 = vunpack.c.l.b16 %v3056_v21  ;;  %v3344_v26 = vsel %vm4456_vm6, %v3998_v4, %v3343_v8 }
 0x1a6   : > { %v2894_v33 = vunpack.c.l.b16 %v2846_v14  ;;  %v2986_v30 = vsel %vm430_vm0, %v2972_v19, 0  ;;  %v3238_v31 = vunpack.c.l.b16 %v3066_v27  ;;  %v3345_v25 = vrot.slane %v3343_v8, 4 }
 0x1a7   : > { %v3394_v35 = vunpack.c.l.b16 %v3344_v26  ;;  %3012 = vmatpush.bf16.xpose.msrb.mxu1 %v2986_v30  ;;  %v2610_v42 = vrot.slane %v2608_v24, 4  ;;  %v2611_v52 = vshll.u32 %v3919_v11, 16  ;;  %v2617_v58 = vshll.u32 %v3920_v22, 16  ;;  %v940_v30 = vpop.permute.xlu0 %939 }
 0x1a8   : > { %v2908_v34 = vpack.c.b16 %v2894_v33, %v2893_v16  ;;  %v3253_v32 = vpack.c.b16 %v3238_v31, %v3237_v56  ;;  %v3347_v51 = vsel %vm4456_vm6, %v3345_v25, %v3346_v9  ;;  %v2621_v40 = vshrl.u32 %v3920_v22, 16  ;;  %v1663_v8 = vpop.f32.mrf.mxu2  ;;  %v3987_v9 = vld [vmem:[%s5409_s1 + $0x38] sm:$0xf] }
 0x1a9   : > { %v2627_v45 = vshll.u32 %v3921_v50, 16  ;;  %v3395_v36 = vunpack.c.l.b16 %v3347_v51  ;;  %v2613_v54 = vrot.slane %v2611_v52, 5  ;;  %v2619_v46 = vrot.slane %v2617_v58, 5 }
 0x1aa   : > { %v2922_v44 = vsel %vm430_vm0, %v2908_v34, 0  ;;  %v3265_v53 = vsel %vm430_vm0, %v3253_v32, 0  ;;  %v2623_v5 = vrot.slane %v2621_v40, 4  ;;  %v3952_v61 = vrot.slane %v3944_v43, 9  ;;  %v3943_v40 = vld [vmem:[%s5409_s1 + $0x30] sm:$0xf] }
 0x1ab   : > { %2948 = vmatpush.bf16.xpose.msrb.mxu0 %v2922_v44  ;;  %v2629_v57 = vrot.slane %v2627_v45, 5  ;;  %3295 = vmatpush.bf16.xpose.msrb.mxu2 %v3265_v53  ;;  %v3409_v2 = vpack.c.b16 %v3395_v36, %v3394_v35  ;;  %v2614_v59 = vor.u32 %v2613_v54, %v2610_v42  ;;  %v2835_v60 = vrot.slane %v3920_v22, 5  ;;  %v4005_v45 = vld [vmem:[%s5409_s1 + $0x3c] sm:$0xf] }
 0x1ac   : > { %v2838_v63 = vrot.slane %v3921_v50, 5  ;;  %v2624_v1 = vor.u32 %v2623_v5, %v2619_v46  ;;  %v3997_v6 = vrot.slane %v3989_v55, 9  ;;  %v3336_v62 = vrot.slane %v5282_v28, 5  ;;  %v1317_v17 = vpop.f32.mrf.mxu0  ;;  %v1818_v28 = vpop.f32.mrf.mxu3 }
 0x1ad   : > { %v3339_v7 = vrot.slane %v5286_v39, 5  ;;  %v3423_v0 = vsel %vm430_vm0, %v3409_v2, 0  ;;  %v2615_v12 = vrot.slane %v2614_v59, 4  ;;  %v2836_v4 = vsel %vm4456_vm6, %v3952_v61, %v2835_v60  ;;  %v1383_v34 = vpop.f32.mrf.mxu1 }
 0x1ae   : > { %v2837_v11 = vrot.slane %v2835_v60, 4  ;;  %3449 = vmatpush.bf16.xpose.msrb.mxu3 %v3423_v0  ;;  %v2625_v13 = vrot.slane %v2624_v1, 4  ;;  %v2891_v20 = vunpack.c.l.b16 %v2836_v4  ;;  %v3337_v15 = vsel %vm4456_vm6, %v3997_v6, %v3336_v62 }
 0x1af   : > { %v3338_v16 = vrot.slane %v3336_v62, 4  ;;  %v2620_v39 = vsel %vm4268_vm3, %v2615_v12, %v2619_v46  ;;  %v3392_v21 = vunpack.c.l.b16 %v3337_v15  ;;  %v548_v14 = vadd.f32 %v5295_v49, %v5293_v47 }
 0x1b0   : > { %v2839_v19 = vsel %vm4456_vm6, %v2837_v11, %v2838_v63  ;;  %v2630_v22 = vsel %vm4268_vm3, %v2625_v13, %v2629_v57  ;;  %v2955_v24 = vunpack.c.l.b16 %v2620_v39  ;;  %v1382_v18 = vadd.f32 %v1381_v3, %v1317_v17  ;;  %v1665_v42 = vpop.f32.mrf.mxu2 }
 0x1b1   : > { %v2892_v27 = vunpack.c.l.b16 %v2839_v19  ;;  %v3340_v56 = vsel %vm4456_vm6, %v3338_v16, %v3339_v7  ;;  %v2956_v33 = vunpack.c.l.b16 %v2630_v22  ;;  %v653_v50 = vadd.f32 %v5299_v10, %v548_v14 }
 0x1b2   : > { %v3393_v26 = vunpack.c.l.b16 %v3340_v56  ;;  %3988 = vmatmul.msk.bf16.vlgmr.msrb.gmra.mxu2 %vm430_vm0, %v3987_v9  ;;  %v1667_v49 = vadd.f32 %v1663_v8, %v1382_v18 }
 0x1b3   : > { %v2907_v23 = vpack.c.b16 %v2892_v27, %v2891_v20  ;;  %v2971_v31 = vpack.c.b16 %v2956_v33, %v2955_v24  ;;  %v936_v37 = vadd.f32 %v5301_v48, %v653_v50  ;;  %v3960_v48 = vld [vmem:[%s5409_s1 + $0x34] sm:$0xf] }
 0x1b4   : > { %v3408_v47 = vpack.c.b16 %v3393_v26, %v3392_v21  ;;  %v1822_v38 = vadd.f32 %v1818_v28, %v1667_v49  ;;  %v1319_v41 = vpop.f32.mrf.mxu0  ;;  %v1820_v52 = vpop.f32.mrf.mxu3 }
 0x1b5   : > { %v2919_v25 = vsel %vm430_vm0, %v2907_v23, 0  ;;  %v2983_v29 = vsel %vm430_vm0, %v2971_v31, 0  ;;  %v942_v10 = vadd.f32 %v940_v30, %v936_v37 }
 0x1b6   : > { %2949 = vmatpush.bf16.xpose.msrb.mxu0 %v2919_v25  ;;  %v3420_v35 = vsel %vm430_vm0, %v3408_v47, 0  ;;  %3013 = vmatpush.bf16.xpose.msrb.mxu1 %v2983_v29  ;;  %v1823_v43 = vadd.f32 %v1822_v38, %v940_v30 }
 0x1b7   : > { %3450 = vmatpush.bf16.xpose.msrb.mxu3 %v3420_v35  ;;  %v943_v58 = vmax.f32 %v942_v10, 0.0 }
 0x1b8   : > { %v1824_v51 = vmax.f32 %v1823_v43, 0.0 }
 0x1b9   : > { %v944_v32 = vpack.c.bf16 %v943_v58, %v943_v58 }
 0x1ba   : > { %v1825_v44 = vpack.c.bf16 %v1824_v51, %v1824_v51 }
 0x1bb   : > { %945 = vst [vmem:[%s5367_s21] sm:$0xf] %v944_v32 }
 0x1bc   : > { %3779 = vst [vmem:[%s5367_s21 + $0x4] sm:$0xf] %v1825_v44 }
 0x1bd   : > { %3961 = vmatmul.msk.bf16.vlgmr.msrb.gmra.mxu0 %vm430_vm0, %v3960_v48  ;;  %3962 = vmatmul.msk.bf16.vlgmr.msrb.gmra.mxu1 %vm430_vm0, %v3943_v40 }
 0x1be   : > { %4006 = vmatmul.msk.bf16.vlgmr.msrb.gmra.mxu3 %vm430_vm0, %v4005_v45 }
 0x1c2   : > { %v3489_v39 = vld [vmem:[%s5367_s21] sm:$0xf] (%p4228_p5) }
 0x1c3   : > { %v3491_v9 = vld [vmem:[%s5367_s21 + $0x4] sm:$0xf] (%p4228_p5)  ;;  %3490 = vst [vmem:[%s3472_s29] sm:$0xf] (%p4228_p5), %v3489_v39 }
 0x1c4   : > { %3492 = vst [vmem:[%s3472_s29 + $0x8] sm:$0xf] (%p4228_p5), %v3491_v9 }
 0x1f1   : > { %v2290_v36 = vpop.f32.mrf.mxu2 }
 0x1f4   : > { %v2108_v54 = vpop.f32.mrf.mxu0 }
 0x1f6   : > { %v2188_v46 = vpop.f32.mrf.mxu1  ;;  %v2573_v53 = vpop.f32.mrf.mxu3 }
 0x1f7   : > { %v2189_v55 = vadd.f32 %v2188_v46, %v2108_v54 }
 0x1f9   : > { %v2294_v5 = vadd.f32 %v2290_v36, %v2189_v55  ;;  %v2292_v61 = vpop.f32.mrf.mxu2 }
 0x1fb   : > { %v2577_v57 = vadd.f32 %v2573_v53, %v2294_v5 }
 0x1fc   : > { %v2110_v59 = vpop.f32.mrf.mxu0 }
 0x1fd   : > { %v2578_v2 = vadd.f32 %v2577_v57, %v940_v30 }
 0x1fe   : > { %v2190_v60 = vpop.f32.mrf.mxu1  ;;  %v2575_v1 = vpop.f32.mrf.mxu3 }
 0x1ff   : > { %v2579_v63 = vmax.f32 %v2578_v2, 0.0 }
 0x201   : > { %v2580_v6 = vpack.c.bf16 %v2579_v63, %v2579_v63 }
 0x203   : > { %3918 = vst [vmem:[%s5367_s21 + $0x8] sm:$0xf] %v2580_v6 }
 0x20a   : > { %v3493_v19 = vld [vmem:[%s5367_s21 + $0x8] sm:$0xf] (%p4228_p5) }
 0x20b   : > { %3494 = vst [vmem:[%s3472_s29 + $0x10] sm:$0xf] (%p4228_p5), %v3493_v19 }
 0x235   : > { %v3297_v62 = vpop.f32.mrf.mxu2 }
 0x23a   : > { %v2951_v7 = vpop.f32.mrf.mxu0  ;;  %v3015_v0 = vpop.f32.mrf.mxu1 }
 0x23b   : > { %v3016_v12 = vadd.f32 %v3015_v0, %v2951_v7 }
 0x23d   : > { %v3299_v4 = vpop.f32.mrf.mxu2  ;;  %v3301_v11 = vadd.f32 %v3297_v62, %v3016_v12 }
 0x241   : > { %v3452_v17 = vpop.f32.mrf.mxu3 }
 0x242   : > { %v3456_v3 = vadd.f32 %v3452_v17, %v3301_v11  ;;  %v2953_v13 = vpop.f32.mrf.mxu0  ;;  %v3017_v20 = vpop.f32.mrf.mxu1 }
 0x244   : > { %v3457_v15 = vadd.f32 %v3456_v3, %v940_v30 }
 0x246   : > { %v3458_v16 = vmax.f32 %v3457_v15, 0.0  ;;  %3468 = sbr.rel (!%p4228_p5) target bundleno = 595 (0x253), region = 36 }
 0x248   : > { %v3459_v8 = vpack.c.bf16 %v3458_v16, %v3458_v16 }
 0x249   : > { %v3454_v28 = vpop.f32.mrf.mxu3 }
 0x24a   : > { %4007 = vst [vmem:[%s5367_s21 + $0xc] sm:$0xf] %v3459_v8 }
 0x251   : > { %v3495_v21 = vld [vmem:[%s5367_s21 + $0xc] sm:$0xf] }
 0x252   : > { %3496 = vst [vmem:[%s3472_s29 + $0x18] sm:$0xf] %v3495_v21 }
 0x253 PF: > { %s13_s18 = sadd.s32 1, %s4159_s18   ;;  %s5417_s12 = smov %s4139_s13 }
 0x254   : > { %p10_p10 = scmp.ge.s32.totalorder %s13_s18, 6   ;;  %s5418_s13 = smov %s4239_s27 }
 0x255   : > { %s5419_s14 = smov %s4151_s16  ;;  %s5420_s15 = smov %s4155_s17 }
 0x256   : > { %s5421_s16 = smov %s5424_s19  ;;  %s5422_s17 = smov %s5428_s20 }
 0x257   :  { %12 = sbr.rel (!%p10_p10) target bundleno = 4 (0x4), region = 124 }

</bundles_post_ra>
